<compile_context>
chip_gen: v7x
topology: tpu7x:2x2x1
jax: 0.10.0
libtpu: 0.0.40
codegen_flags: <defaults>
</compile_context>

<pallas_src>
import functools

import jax
import jax.numpy as jnp
from jax.experimental import pallas as pl
from jax.experimental.pallas import tpu as pltpu

VOCAB = 9892
EMB = 100
HIDDEN = 10

# TPU-friendly padded sizes (lane dim multiple of 128, sublane multiple of 8).
EMB_PAD = 128            # 100  -> 128
HIDDEN_PAD = 128         # 10   -> 128
VOCAB_PAD = 9984         # 9892 -> 78 * 128


def _round_up(x, m):
    return (x + m - 1) // m * m


def rnn_lm_kernel(emb_ref, w_ih_ref, w_hh_ref, b_h_ref, w_u_ref, b_u_ref,
                  out_ref, h_ref, *, seq_len, seq_tile):
    # emb_ref : (T, BB, EMB_PAD)          time-major tile of embedded tokens
    # w_ih_ref: (EMB_PAD, HIDDEN_PAD)     input->hidden  (transposed, zero-padded)
    # w_hh_ref: (HIDDEN_PAD, HIDDEN_PAD)  hidden->hidden (transposed, zero-padded)
    # b_h_ref : (1, HIDDEN_PAD)           b_ih + b_hh    (zero-padded)
    # w_u_ref : (HIDDEN_PAD, VOCAB_PAD)   output projection (transposed, padded)
    # b_u_ref : (1, VOCAB_PAD)
    # out_ref : (BB, VOCAB_PAD)           resident across the seq grid axis
    # h_ref   : (BB, HIDDEN_PAD)          VMEM scratch carrying the hidden state
    s = pl.program_id(1)

    @pl.when(s == 0)
    def _():
        h_ref[...] = jnp.zeros_like(h_ref)

    T, BB, E = emb_ref.shape
    H = w_hh_ref.shape[0]

    # Hoist the input projection out of the serial recurrence: one big,
    # well-shaped MXU matmul per seq tile instead of T tiny ones sitting on
    # the loop-carried dependence chain.
    x = emb_ref[...]                                          # (T, BB, E)
    pre = jnp.dot(x.reshape(T * BB, E), w_ih_ref[...],
                  preferred_element_type=jnp.float32)
    pre = pre.reshape(T, BB, H) + b_h_ref[...]                # (T, BB, H)

    w_hh = w_hh_ref[...]
    base_t = s * seq_tile
    h = h_ref[...]
    # Fully unrolled (T is a small static Python int): lets the EUP tanh of
    # step t co-issue with the MXU matmul of step t+1.
    for t in range(T):
        h_new = jnp.tanh(
            pre[t] + jnp.dot(h, w_hh, preferred_element_type=jnp.float32))
        # Mask timesteps past the true sequence length (seq was padded up to a
        # multiple of the tile size); padded steps leave h unchanged.
        h = jnp.where(base_t + t < seq_len, h_new, h)
    h_ref[...] = h

    @pl.when(s == pl.num_programs(1) - 1)
    def _():
        out_ref[...] = (
            jnp.dot(h, w_u_ref[...], preferred_element_type=jnp.float32)
            + b_u_ref[...])


def pad_params(params):
    """Zero-pad weights once to TPU-friendly shapes.

    Padded W_ih/W_hh columns, b_h entries and W_U rows are zero, so padded
    hidden units stay exactly 0 through tanh and results are unchanged.
    """
    emb = jnp.zeros((VOCAB, EMB_PAD), jnp.float32)
    emb = emb.at[:, :EMB].set(params["emb_table"])
    w_ih = jnp.zeros((EMB_PAD, HIDDEN_PAD), jnp.float32)
    w_ih = w_ih.at[:EMB, :HIDDEN].set(params["w_ih"])
    w_hh = jnp.zeros((HIDDEN_PAD, HIDDEN_PAD), jnp.float32)
    w_hh = w_hh.at[:HIDDEN, :HIDDEN].set(params["w_hh"])
    b_h = jnp.zeros((1, HIDDEN_PAD), jnp.float32)
    b_h = b_h.at[:, :HIDDEN].set(params["b_h"])
    w_u = jnp.zeros((HIDDEN_PAD, VOCAB_PAD), jnp.float32)
    w_u = w_u.at[:HIDDEN, :VOCAB].set(params["w_u"])
    b_u = jnp.zeros((1, VOCAB_PAD), jnp.float32)
    b_u = b_u.at[:, :VOCAB].set(params["b_u"])
    return dict(emb_table=emb, w_ih=w_ih, w_hh=w_hh,
                b_h=b_h, w_u=w_u, b_u=b_u)


@functools.partial(jax.jit, static_argnames=("seq_tile", "batch_block"))
def rnn_lang_model_forward(x_ids, padded_params, *, seq_tile=32, batch_block=8):
    """x_ids: (batch, seq) int32 token ids. Returns (batch, VOCAB) float32."""
    batch, seq = x_ids.shape
    BB = batch_block
    assert BB % 8 == 0, "batch_block must be a multiple of 8 (sublane tile)"

    b_pad = _round_up(max(batch, BB), BB)
    T = min(seq_tile, seq)
    seq_pad = _round_up(seq, T)

    # Time-major, padded token ids (pad tokens = 0; padded timesteps are masked
    # inside the kernel, padded batch rows are sliced away below).
    ids = jnp.zeros((seq_pad, b_pad), jnp.int32)
    ids = ids.at[:seq, :batch].set(jnp.transpose(x_ids).astype(jnp.int32))

    # Embedding gather directly in time-major order -> no extra transpose
    # round-trip of the (batch, seq, EMB) activation slab through HBM.
    # Columns 100..127 of emb_table are zero, so rows arrive pre-padded.
    embedded = padded_params["emb_table"][ids]        # (seq_pad, b_pad, EMB_PAD)
    # TODO(synk): fully fuse the embedding gather into the kernel via scalar
    # prefetch + manual DMA gather to drop one more HBM round-trip.

    n_b = b_pad // BB
    n_s = seq_pad // T

    kernel = functools.partial(rnn_lm_kernel, seq_len=seq, seq_tile=T)

    flops = (2 * seq_pad * b_pad * EMB_PAD * HIDDEN_PAD          # input proj
             + 2 * seq_pad * b_pad * HIDDEN_PAD * HIDDEN_PAD     # recurrence
             + 2 * b_pad * HIDDEN_PAD * VOCAB_PAD)               # final proj
    bytes_accessed = 4 * (seq_pad * b_pad * EMB_PAD
                          + EMB_PAD * HIDDEN_PAD
                          + HIDDEN_PAD * HIDDEN_PAD
                          + HIDDEN_PAD * VOCAB_PAD
                          + b_pad * VOCAB_PAD)

    out = pl.pallas_call(
        kernel,
        out_shape=jax.ShapeDtypeStruct((b_pad, VOCAB_PAD), jnp.float32),
        grid_spec=pltpu.PrefetchScalarGridSpec(
            num_scalar_prefetch=0,
            grid=(n_b, n_s),
            in_specs=[
                # streamed, seq-tiled activations (double-buffered by Pallas)
                pl.BlockSpec((T, BB, EMB_PAD), lambda b, s: (s, b, 0)),
                # weights: constant block index -> loaded once, stay resident
                pl.BlockSpec((EMB_PAD, HIDDEN_PAD), lambda b, s: (0, 0)),
                pl.BlockSpec((HIDDEN_PAD, HIDDEN_PAD), lambda b, s: (0, 0)),
                pl.BlockSpec((1, HIDDEN_PAD), lambda b, s: (0, 0)),
                pl.BlockSpec((HIDDEN_PAD, VOCAB_PAD), lambda b, s: (0, 0)),
                pl.BlockSpec((1, VOCAB_PAD), lambda b, s: (0, 0)),
            ],
            out_specs=pl.BlockSpec((BB, VOCAB_PAD), lambda b, s: (b, 0)),
            scratch_shapes=[pltpu.VMEM((BB, HIDDEN_PAD), jnp.float32)],
        ),
        compiler_params=pltpu.CompilerParams(
            dimension_semantics=("parallel", "arbitrary"),
            vmem_limit_bytes=32 * 1024 * 1024,   # safe on v5e/v6e and v7x
        ),
        cost_estimate=pl.CostEstimate(
            flops=flops,
            transcendentals=seq_pad * b_pad * HIDDEN_PAD,
            bytes_accessed=bytes_accessed,
        ),
    )(embedded,
      padded_params["w_ih"], padded_params["w_hh"], padded_params["b_h"],
      padded_params["w_u"], padded_params["b_u"])

    return out[:batch, :VOCAB]


def init_params(key):
    k0, k1, k2, k3, k4, k5, k6 = jax.random.split(key, 7)
    bound_rnn = 1.0 / jnp.sqrt(HIDDEN)
    bound_u = 1.0 / jnp.sqrt(HIDDEN)
    return {
        "emb_table": jax.random.normal(k0, (VOCAB, EMB), jnp.float32),
        # stored transposed relative to PyTorch's (hidden, input) layout
        "w_ih": jax.random.uniform(k1, (EMB, HIDDEN), jnp.float32, -bound_rnn, bound_rnn),
        "w_hh": jax.random.uniform(k2, (HIDDEN, HIDDEN), jnp.float32, -bound_rnn, bound_rnn),
        "b_h": (jax.random.uniform(k3, (1, HIDDEN), jnp.float32, -bound_rnn, bound_rnn)
                + jax.random.uniform(k4, (1, HIDDEN), jnp.float32, -bound_rnn, bound_rnn)),
        "w_u": jax.random.uniform(k5, (HIDDEN, VOCAB), jnp.float32, -bound_u, bound_u),
        "b_u": jax.random.uniform(k6, (1, VOCAB), jnp.float32, -bound_u, bound_u),
    }


def reference_forward(x_ids, params):
    """Pure-JAX reference of the PyTorch forward for correctness checking."""
    embedded = params["emb_table"][x_ids]  # (batch, seq, EMB)
    batch, seq, _ = embedded.shape
    h = jnp.zeros((batch, HIDDEN), jnp.float32)
    for t in range(seq):
        h = jnp.tanh(embedded[:, t, :] @ params["w_ih"]
                     + h @ params["w_hh"] + params["b_h"])
    return h @ params["w_u"] + params["b_u"]  # (batch, VOCAB)


if __name__ == "__main__":
    key = jax.random.PRNGKey(0)
    pkey, xkey, xkey2 = jax.random.split(key, 3)
    params = init_params(pkey)
    padded = pad_params(params)

    # Test 1: batch=2, seq=8, seq_tile=4 -> 2 seq tiles (exercises the hidden-
    # state carry across grid steps and the pl.when init/finalize).
    batch, seq = 2, 8
    x_ids = jax.random.randint(xkey, (batch, seq), 0, VOCAB, dtype=jnp.int32)
    out = rnn_lang_model_forward(x_ids, padded, seq_tile=4)
    out = jax.block_until_ready(out)
    ref = reference_forward(x_ids, params)
    assert out.shape == (batch, VOCAB), out.shape
    assert jnp.allclose(out, ref, atol=1e-4, rtol=1e-4), \
        float(jnp.max(jnp.abs(out - ref)))

    # Test 2: ragged shapes -> exercises seq masking (10 -> 12) and batch
    # padding (3 -> 8).
    batch2, seq2 = 3, 10
    x_ids2 = jax.random.randint(xkey2, (batch2, seq2), 0, VOCAB, dtype=jnp.int32)
    out2 = rnn_lang_model_forward(x_ids2, padded, seq_tile=4)
    out2 = jax.block_until_ready(out2)
    ref2 = reference_forward(x_ids2, params)
    assert out2.shape == (batch2, VOCAB), out2.shape
    assert jnp.allclose(out2, ref2, atol=1e-4, rtol=1e-4), \
        float(jnp.max(jnp.abs(out2 - ref2)))

    print("KERNEL_OK")
</pallas_src>

<mosaic_0001>
module attributes {stable_mosaic.version = 11 : i64} {
  func.func @rnn_lm_kernel(%arg0: i32, %arg1: i32, %arg2: memref<4x8x128xf32, #tpu.memory_space<vmem>>, %arg3: memref<128x128xf32, #tpu.memory_space<vmem>>, %arg4: memref<128x128xf32, #tpu.memory_space<vmem>>, %arg5: memref<1x128xf32, #tpu.memory_space<vmem>>, %arg6: memref<128x9984xf32, #tpu.memory_space<vmem>>, %arg7: memref<1x9984xf32, #tpu.memory_space<vmem>>, %arg8: memref<8x9984xf32, #tpu.memory_space<vmem>>, %arg9: memref<8x128xf32, #tpu.memory_space<vmem>>) attributes {dimension_semantics = [#tpu.dimension_semantics<parallel>, #tpu.dimension_semantics<arbitrary>], iteration_bounds = array<i64: 1, 2>, scalar_prefetch = 0 : i64, scratch_operands = 1 : i64, tpu.core_type = #tpu.core_type<tc>, window_params = [{transform_indices = @transform_0, window_bounds = array<i64: 4, 8, 128>}, {pipeline_mode = #tpu.pipeline_mode<synchronous>, transform_indices = @transform_1, window_bounds = array<i64: 128, 128>}, {pipeline_mode = #tpu.pipeline_mode<synchronous>, transform_indices = @transform_2, window_bounds = array<i64: 128, 128>}, {pipeline_mode = #tpu.pipeline_mode<synchronous>, transform_indices = @transform_3, window_bounds = array<i64: 1, 128>}, {pipeline_mode = #tpu.pipeline_mode<synchronous>, transform_indices = @transform_4, window_bounds = array<i64: 128, 9984>}, {pipeline_mode = #tpu.pipeline_mode<synchronous>, transform_indices = @transform_5, window_bounds = array<i64: 1, 9984>}, {transform_indices = @transform_6, window_bounds = array<i64: 8, 9984>}]} {
    %c0_i32 = arith.constant 0 : i32
    %0 = arith.cmpi eq, %arg1, %c0_i32 : i32
    %1 = arith.extui %0 : i1 to i32
    %c0_i32_0 = arith.constant 0 : i32
    %2 = arith.cmpi ne, %1, %c0_i32_0 : i32
    scf.if %2 {
      %cst_23 = arith.constant 0.000000e+00 : f32
      %51 = vector.broadcast %cst_23 : f32 to vector<8x128xf32>
      %c0_24 = arith.constant 0 : index
      %c0_25 = arith.constant 0 : index
      %52 = vector.load %arg9[%c0_24, %c0_25] : memref<8x128xf32, #tpu.memory_space<vmem>>, vector<8x128xf32>
      tpu.vector_store %arg9[%c0_24, %c0_25], %51 {strides = array<i32>} : memref<8x128xf32, #tpu.memory_space<vmem>>, vector<8x128xf32>,
    } else {
    }
    %c0 = arith.constant 0 : index
    %c0_1 = arith.constant 0 : index
    %c0_2 = arith.constant 0 : index
    %3 = vector.load %arg2[%c0, %c0_1, %c0_2] : memref<4x8x128xf32, #tpu.memory_space<vmem>>, vector<4x8x128xf32>
    %4 = vector.shape_cast %3 : vector<4x8x128xf32> to vector<32x128xf32>
    %c0_3 = arith.constant 0 : index
    %c0_4 = arith.constant 0 : index
    %5 = vector.load %arg3[%c0_3, %c0_4] : memref<128x128xf32, #tpu.memory_space<vmem>>, vector<128x128xf32>
    %cst = arith.constant dense<0.000000e+00> : vector<32x128xf32>
    %6 = tpu.matmul %4, %5, %cst {dimension_numbers = #tpu.dot_dimension_numbers<[1], [0], [0], [1], [0, 0, 1, 1], [], []>} : vector<32x128xf32>, vector<128x128xf32>, vector<32x128xf32> -> vector<32x128xf32>
    %7 = vector.shape_cast %6 : vector<32x128xf32> to vector<4x8x128xf32>
    %c0_5 = arith.constant 0 : index
    %c0_6 = arith.constant 0 : index
    %8 = vector.load %arg5[%c0_5, %c0_6] : memref<1x128xf32, #tpu.memory_space<vmem>>, vector<1x128xf32>
    %9 = vector.shape_cast %8 : vector<1x128xf32> to vector<1x1x128xf32>
    %10 = vector.broadcast %9 : vector<1x1x128xf32> to vector<4x8x128xf32>
    %11 = arith.addf %7, %10 : vector<4x8x128xf32>
    %c0_7 = arith.constant 0 : index
    %c0_8 = arith.constant 0 : index
    %12 = vector.load %arg4[%c0_7, %c0_8] : memref<128x128xf32, #tpu.memory_space<vmem>>, vector<128x128xf32>
    %c4_i32 = arith.constant 4 : i32
    %13 = arith.muli %arg1, %c4_i32 : i32
    %c0_9 = arith.constant 0 : index
    %c0_10 = arith.constant 0 : index
    %14 = vector.load %arg9[%c0_9, %c0_10] : memref<8x128xf32, #tpu.memory_space<vmem>>, vector<8x128xf32>
    %15 = vector.extract_strided_slice %11 {offsets = [0, 0, 0], sizes = [1, 8, 128], strides = [1, 1, 1]} : vector<4x8x128xf32> to vector<1x8x128xf32>
    %16 = vector.shape_cast %15 : vector<1x8x128xf32> to vector<8x128xf32>
    %cst_11 = arith.constant dense<0.000000e+00> : vector<8x128xf32>
    %17 = tpu.matmul %14, %12, %cst_11 {dimension_numbers = #tpu.dot_dimension_numbers<[1], [0], [0], [1], [0, 0, 1, 1], [], []>} : vector<8x128xf32>, vector<128x128xf32>, vector<8x128xf32> -> vector<8x128xf32>
    %18 = arith.addf %16, %17 : vector<8x128xf32>
    %19 = math.tanh %18 : vector<8x128xf32>
    %c0_i32_12 = arith.constant 0 : i32
    %20 = arith.addi %13, %c0_i32_12 : i32
    %c8_i32 = arith.constant 8 : i32
    %21 = arith.cmpi slt, %20, %c8_i32 : i32
    %22 = arith.select %21, %19, %14 : vector<8x128xf32>
    %23 = vector.extract_strided_slice %11 {offsets = [1, 0, 0], sizes = [1, 8, 128], strides = [1, 1, 1]} : vector<4x8x128xf32> to vector<1x8x128xf32>
    %24 = vector.shape_cast %23 : vector<1x8x128xf32> to vector<8x128xf32>
    %cst_13 = arith.constant dense<0.000000e+00> : vector<8x128xf32>
    %25 = tpu.matmul %22, %12, %cst_13 {dimension_numbers = #tpu.dot_dimension_numbers<[1], [0], [0], [1], [0, 0, 1, 1], [], []>} : vector<8x128xf32>, vector<128x128xf32>, vector<8x128xf32> -> vector<8x128xf32>
    %26 = arith.addf %24, %25 : vector<8x128xf32>
    %27 = math.tanh %26 : vector<8x128xf32>
    %c1_i32 = arith.constant 1 : i32
    %28 = arith.addi %13, %c1_i32 : i32
    %c8_i32_14 = arith.constant 8 : i32
    %29 = arith.cmpi slt, %28, %c8_i32_14 : i32
    %30 = arith.select %29, %27, %22 : vector<8x128xf32>
    %31 = vector.extract_strided_slice %11 {offsets = [2, 0, 0], sizes = [1, 8, 128], strides = [1, 1, 1]} : vector<4x8x128xf32> to vector<1x8x128xf32>
    %32 = vector.shape_cast %31 : vector<1x8x128xf32> to vector<8x128xf32>
    %cst_15 = arith.constant dense<0.000000e+00> : vector<8x128xf32>
    %33 = tpu.matmul %30, %12, %cst_15 {dimension_numbers = #tpu.dot_dimension_numbers<[1], [0], [0], [1], [0, 0, 1, 1], [], []>} : vector<8x128xf32>, vector<128x128xf32>, vector<8x128xf32> -> vector<8x128xf32>
    %34 = arith.addf %32, %33 : vector<8x128xf32>
    %35 = math.tanh %34 : vector<8x128xf32>
    %c2_i32 = arith.constant 2 : i32
    %36 = arith.addi %13, %c2_i32 : i32
    %c8_i32_16 = arith.constant 8 : i32
    %37 = arith.cmpi slt, %36, %c8_i32_16 : i32
    %38 = arith.select %37, %35, %30 : vector<8x128xf32>
    %39 = vector.extract_strided_slice %11 {offsets = [3, 0, 0], sizes = [1, 8, 128], strides = [1, 1, 1]} : vector<4x8x128xf32> to vector<1x8x128xf32>
    %40 = vector.shape_cast %39 : vector<1x8x128xf32> to vector<8x128xf32>
    %cst_17 = arith.constant dense<0.000000e+00> : vector<8x128xf32>
    %41 = tpu.matmul %38, %12, %cst_17 {dimension_numbers = #tpu.dot_dimension_numbers<[1], [0], [0], [1], [0, 0, 1, 1], [], []>} : vector<8x128xf32>, vector<128x128xf32>, vector<8x128xf32> -> vector<8x128xf32>
    %42 = arith.addf %40, %41 : vector<8x128xf32>
    %43 = math.tanh %42 : vector<8x128xf32>
    %c3_i32 = arith.constant 3 : i32
    %44 = arith.addi %13, %c3_i32 : i32
    %c8_i32_18 = arith.constant 8 : i32
    %45 = arith.cmpi slt, %44, %c8_i32_18 : i32
    %46 = arith.select %45, %43, %38 : vector<8x128xf32>
    %c0_19 = arith.constant 0 : index
    %c0_20 = arith.constant 0 : index
    %47 = vector.load %arg9[%c0_19, %c0_20] : memref<8x128xf32, #tpu.memory_space<vmem>>, vector<8x128xf32>
    tpu.vector_store %arg9[%c0_19, %c0_20], %46 {strides = array<i32>} : memref<8x128xf32, #tpu.memory_space<vmem>>, vector<8x128xf32>,
    %c1_i32_21 = arith.constant 1 : i32
    %48 = arith.cmpi eq, %arg1, %c1_i32_21 : i32
    %49 = arith.extui %48 : i1 to i32
    %c0_i32_22 = arith.constant 0 : i32
    %50 = arith.cmpi ne, %49, %c0_i32_22 : i32
    scf.if %50 {
      %c0_23 = arith.constant 0 : index
      %c0_24 = arith.constant 0 : index
      %51 = vector.load %arg6[%c0_23, %c0_24] : memref<128x9984xf32, #tpu.memory_space<vmem>>, vector<128x9984xf32>
      %cst_25 = arith.constant dense<0.000000e+00> : vector<8x9984xf32>
      %52 = tpu.matmul %46, %51, %cst_25 {dimension_numbers = #tpu.dot_dimension_numbers<[1], [0], [0], [1], [0, 0, 1, 1], [], []>} : vector<8x128xf32>, vector<128x9984xf32>, vector<8x9984xf32> -> vector<8x9984xf32>
      %c0_26 = arith.constant 0 : index
      %c0_27 = arith.constant 0 : index
      %53 = vector.load %arg7[%c0_26, %c0_27] : memref<1x9984xf32, #tpu.memory_space<vmem>>, vector<1x9984xf32>
      %54 = vector.broadcast %53 : vector<1x9984xf32> to vector<8x9984xf32>
      %55 = arith.addf %52, %54 : vector<8x9984xf32>
      %c0_28 = arith.constant 0 : index
      %c0_29 = arith.constant 0 : index
      %56 = vector.load %arg8[%c0_28, %c0_29] : memref<8x9984xf32, #tpu.memory_space<vmem>>, vector<8x9984xf32>
      tpu.vector_store %arg8[%c0_28, %c0_29], %55 {strides = array<i32>} : memref<8x9984xf32, #tpu.memory_space<vmem>>, vector<8x9984xf32>,
    } else {
    }
    return
  }
  func.func @transform_0(%arg0: i32, %arg1: i32) -> (i32, i32, i32) {
    %c0_i32 = arith.constant 0 : i32
    %c0_i32_0 = arith.constant 0 : i32
    return %arg1, %arg0, %c0_i32 : i32, i32, i32
  }
  func.func @transform_1(%arg0: i32, %arg1: i32) -> (i32, i32) {
    %c0_i32 = arith.constant 0 : i32
    %c0_i32_0 = arith.constant 0 : i32
    %c0_i32_1 = arith.constant 0 : i32
    return %c0_i32, %c0_i32_0 : i32, i32
  }
  func.func @transform_2(%arg0: i32, %arg1: i32) -> (i32, i32) {
    %c0_i32 = arith.constant 0 : i32
    %c0_i32_0 = arith.constant 0 : i32
    %c0_i32_1 = arith.constant 0 : i32
    return %c0_i32, %c0_i32_0 : i32, i32
  }
  func.func @transform_3(%arg0: i32, %arg1: i32) -> (i32, i32) {
    %c0_i32 = arith.constant 0 : i32
    %c0_i32_0 = arith.constant 0 : i32
    %c0_i32_1 = arith.constant 0 : i32
    return %c0_i32, %c0_i32_0 : i32, i32
  }
  func.func @transform_4(%arg0: i32, %arg1: i32) -> (i32, i32) {
    %c0_i32 = arith.constant 0 : i32
    %c0_i32_0 = arith.constant 0 : i32
    %c0_i32_1 = arith.constant 0 : i32
    return %c0_i32, %c0_i32_0 : i32, i32
  }
  func.func @transform_5(%arg0: i32, %arg1: i32) -> (i32, i32) {
    %c0_i32 = arith.constant 0 : i32
    %c0_i32_0 = arith.constant 0 : i32
    %c0_i32_1 = arith.constant 0 : i32
    return %c0_i32, %c0_i32_0 : i32, i32
  }
  func.func @transform_6(%arg0: i32, %arg1: i32) -> (i32, i32) {
    %c0_i32 = arith.constant 0 : i32
    %c0_i32_0 = arith.constant 0 : i32
    return %arg0, %c0_i32 : i32, i32
  }
}

</mosaic_0001>

<bundles_post_ra>
// kernel: rnn_lang_model_forward.1
= control target key start
LH: loop header
LB: loop body
LE: loop exit
PB: predicated region body
PF: predicated region fallthrough
CT: control target
= control target key end

     0   :  { %11 = vsyncpa [#allocation4], 0  ;;  %s8158_s0 = inlined_call_operand.vmem [shape: f32[8,8,128], index: 0, kind: input, shape index: {}]   ;;  %s8159_s1 = inlined_call_operand.hbm [shape: f32[128,128], index: 1, kind: input, shape index: {}]   ;;  %s8160_s2 = inlined_call_operand.hbm [shape: f32[128,128], index: 2, kind: input, shape index: {}]   ;;  %s8161_s3 = inlined_call_operand.hbm [shape: f32[1,128], index: 3, kind: input, shape index: {}]   ;;  %s8162_s4 = inlined_call_operand.hbm [shape: f32[128,9984], index: 4, kind: input, shape index: {}]   ;;  %s8163_s5 = inlined_call_operand.hbm [shape: f32[1,9984], index: 5, kind: input, shape index: {}]   ;;  %s8164_s6 = inlined_call_operand.vmem [shape: f32[8,9984], index: 6, kind: output, shape index: {}]  }
   0x1   :  { %12 = vsyncpa [#allocation6], 0 }
   0x2   :  { %13 = vsyncpa [#allocation9], 0  ;;  %s7402_s21 = smov 0   ;;  %s7404_s22 = smov 0  }
   0x3   :  { %s7406_s23 = smov 0  }
   0x4 LB: > { %s5420_s24 = sadd.s32 4294967295, %s7351_s23   ;;  %p5421_p0 = scmp.ge.s32.totalorder %s7351_s23, 1  ;;  %s7351_s23 = sphi %s7406_s23, %s19_s23   ;;  %s7347_s22 = sphi %s7404_s22, %s8175_s22   ;;  %s7343_s21 = sphi %s7402_s21, %s8174_s21  }
   0x5   : > { %p195_p1 = scmp.lt.s32.totalorder %s7351_s23, 3  ;;  %p7420_p2 = scmp.eq.s32.totalorder %s5420_s24, 0 }
   0x6   : > { %s7353_s27 = smov [#allocation5]   ;;  %s7354_s29 = smov [#allocation8]  }
   0x7   : > { %s8168_s25 = scalar_select %p7420_p2, 1, 0 }
   0x8   : > { %p7424_p3 = pnand %p5421_p0, %p195_p1  ;;  %s220_s28 = sshll.u32 %s7353_s27, 4  ;;  %s221_s28 = int_to_ptr.vmem [resolvable:$true] %s220_s28 }
   0x9   : > { %s244_s30 = sshll.u32 %s7354_s29, 4  ;;  %s7177_s10 = scalar_lea.hbm %s8160_s2, 2048  ;;  %s7430_s30 = int_to_ptr.vmem [resolvable:$true] %s244_s30 }
   0xa   : > { %s8169_s26 = scalar_select %p7424_p3, 1, 0 }
   0xb   : > { %p7105_p4 = pneg %p7424_p3  ;;  %p7178_p6 = scmp.ne.s32.totalorder %s8160_s2, %s7177_s10 }
   0xc   : > { %p7184_p10 = scmp.lt.u32.totalorder %s7177_s10, %s8160_s2 }
   0xd   : > { %p7434_p5 = pnand %p7420_p2, %p7105_p4 }
   0xf   : > { %p7446_p7 = pneg %p7434_p5 }
  0x11   : > { %p7180_p8 = pnand %p7446_p7, %p7178_p6 }
  0x13   : > { %p7181_p9 = pneg %p7180_p8 }
  0x15   : > { %p7186_p11 = pnand %p7184_p10, %p7181_p9 }
  0x17   : > { %7189 = shalt.err (!%p7186_p11)
}
  0x18   : > { %s7190_s16 = scalar_lea.vmem %s221_s28, 2048  ;;  %p7198_p1 = scmp.lt.s32.totalorder %s221_s28, %s221_s28 }
  0x19   : > { %p7191_p12 = scmp.ne.s32.totalorder %s221_s28, %s7190_s16  ;;  %p7199_p4 = scmp.lt.s32.totalorder %s7190_s16, %s7190_s16 }
  0x1b   : > { %p7193_p13 = pnand %p7191_p12, %p7446_p7  ;;  %p7200_p2 = por %p7199_p4, %p7198_p1 }
  0x1d   : > { %p7194_p0 = pneg %p7193_p13 }
  0x1f   : > { %p7201_p3 = pnand %p7200_p2, %p7194_p0 }
  0x21   : > { %7204 = shalt.err (!%p7201_p3)
}
  0x22   : > { %s7355_s17 = smov 128   ;;  %s7356_s18 = smov 8  }
  0x23   : > { %7111 = dma.hbm_to_vmem [thread:$0]  (!%p7434_p5), %s8160_s2, 2048, %s221_s28, [#allocation6], %s7355_s17, %s7355_s17, %s7356_s18  }
  0x24   : > { %s7205_s29 = scalar_lea.hbm %s8162_s4, 159744 }
  0x25   : > { %p7206_p2 = scmp.ne.s32.totalorder %s8162_s4, %s7205_s29  ;;  %p7212_p8 = scmp.lt.u32.totalorder %s7205_s29, %s8162_s4 }
  0x27   : > { %p7208_p3 = pnand %p7206_p2, %p7446_p7 }
  0x29   : > { %p7209_p6 = pneg %p7208_p3 }
  0x2b   : > { %p7214_p9 = pnand %p7212_p8, %p7209_p6 }
  0x2d   : > { %7217 = shalt.err (!%p7214_p9)
}
  0x2e   : > { %s7218_s28 = scalar_lea.vmem %s7430_s30, 159744  ;;  %p7226_p13 = scmp.lt.s32.totalorder %s7430_s30, %s7430_s30 }
  0x2f   : > { %p7219_p10 = scmp.ne.s32.totalorder %s7430_s30, %s7218_s28  ;;  %p7227_p0 = scmp.lt.s32.totalorder %s7218_s28, %s7218_s28 }
  0x31   : > { %p7221_p11 = pnand %p7219_p10, %p7446_p7  ;;  %p7228_p1 = por %p7227_p0, %p7226_p13 }
  0x33   : > { %p7222_p12 = pneg %p7221_p11 }
  0x35   : > { %p7229_p4 = pnand %p7228_p1, %p7222_p12 }
  0x37   : > { %7232 = shalt.err (!%p7229_p4)
}
  0x38   : > { %s7357_s12 = smov 9984   ;;  %s7358_s14 = smov 624  }
  0x39   : > { %7117 = dma.hbm_to_vmem [thread:$0]  (!%p7434_p5), %s8162_s4, 159744, %s7430_s30, [#allocation9], %s7357_s12, %s7357_s12, %s7358_s14  }
  0x3a   : > { %s28_s19 = sadd.s32 1, %s7347_s22  ;;  %s7359_s20 = smov [#allocation3]  }
  0x3b   : > { %p29_p2 = scmp.ge.s32.totalorder %s28_s19, 2  ;;  %s207_s24 = sshll.u32 %s7359_s20, 4  ;;  %s208_s24 = int_to_ptr.vmem [resolvable:$true] %s207_s24 }
  0x3c   : > { %s7360_s27 = smov [#allocation7]   ;;  %s7233_s10 = scalar_lea.hbm %s8159_s1, 2048 }
  0x3d   : > { %s8177_s19 = smov (%p29_p2, %s28_s19), 0  ;;  %s234_s29 = sshll.u32 %s7360_s27, 4  ;;  %s235_s29 = int_to_ptr.vmem [resolvable:$true] %s234_s29 }
  0x3e   : > { %p7234_p3 = scmp.ne.s32.totalorder %s8159_s1, %s7233_s10  ;;  %p7240_p9 = scmp.lt.u32.totalorder %s7233_s10, %s8159_s1 }
  0x40   : > { %p7236_p6 = pnand %p7234_p3, %p7446_p7 }
  0x42   : > { %p7237_p8 = pneg %p7236_p6 }
  0x44   : > { %p7242_p10 = pnand %p7240_p9, %p7237_p8 }
  0x46   : > { %7245 = shalt.err (!%p7242_p10)
}
  0x47   : > { %s7246_s14 = scalar_lea.vmem %s208_s24, 2048  ;;  %p7254_p0 = scmp.lt.s32.totalorder %s208_s24, %s208_s24 }
  0x48   : > { %p7247_p11 = scmp.ne.s32.totalorder %s208_s24, %s7246_s14  ;;  %p7255_p1 = scmp.lt.s32.totalorder %s7246_s14, %s7246_s14 }
  0x4a   : > { %p7249_p12 = pnand %p7247_p11, %p7446_p7  ;;  %p7256_p4 = por %p7255_p1, %p7254_p0 }
  0x4c   : > { %p7250_p13 = pneg %p7249_p12 }
  0x4e   : > { %p7257_p2 = pnand %p7256_p4, %p7250_p13 }
  0x50   : > { %7260 = shalt.err (!%p7257_p2)
}
  0x51   : > { %7108 = dma.hbm_to_vmem [thread:$0]  (!%p7434_p5), %s8159_s1, 2048, %s208_s24, [#allocation4], %s7355_s17, %s7355_s17, %s7356_s18  }
  0x52   : > { %s7261_s8 = scalar_lea.hbm %s8161_s3, 16 }
  0x53   : > { %p7262_p3 = scmp.ne.s32.totalorder %s8161_s3, %s7261_s8  ;;  %p7268_p9 = scmp.lt.u32.totalorder %s7261_s8, %s8161_s3 }
  0x55   : > { %p7264_p6 = pnand %p7262_p3, %p7446_p7 }
  0x57   : > { %p7265_p8 = pneg %p7264_p6 }
  0x59   : > { %p7270_p10 = pnand %p7268_p9, %p7265_p8 }
  0x5b   : > { %7273 = shalt.err (!%p7270_p10)
}
  0x5c   : > { %s7274_s30 = scalar_lea.vmem %s235_s29, 16  ;;  %s7281_s17 = scalar_lea.vmem %s235_s29, 32 }
  0x5d   : > { %p7275_p11 = scmp.ne.s32.totalorder %s235_s29, %s7274_s30  ;;  %p7282_p0 = scmp.lt.s32.totalorder %s235_s29, %s235_s29 }
  0x5e   : > { %p7283_p1 = scmp.lt.s32.totalorder %s7281_s17, %s7274_s30 }
  0x5f   : > { %p7277_p12 = pnand %p7275_p11, %p7446_p7 }
  0x60   : > { %p7284_p4 = por %p7283_p1, %p7282_p0 }
  0x61   : > { %p7278_p13 = pneg %p7277_p12 }
  0x63   : > { %p7285_p2 = pnand %p7284_p4, %p7278_p13 }
  0x65   : > { %7288 = shalt.err (!%p7285_p2)
}
  0x66   : > { %7114 = dma.hbm_to_vmem [thread:$0]  (!%p7434_p5), %s8161_s3, 16, %s235_s29, [#allocation6]  }
  0x67   : > { %s7361_s12 = smov [#allocation10]   ;;  %s7289_s20 = scalar_lea.hbm %s8163_s5, 1248 }
  0x68   : > { %s258_s14 = sshll.u32 %s7361_s12, 4  ;;  %p7290_p3 = scmp.ne.s32.totalorder %s8163_s5, %s7289_s20  ;;  %s259_s14 = int_to_ptr.vmem [resolvable:$true] %s258_s14 }
  0x69   : > { %p7296_p9 = scmp.lt.u32.totalorder %s7289_s20, %s8163_s5 }
  0x6a   : > { %p7292_p6 = pnand %p7290_p3, %p7446_p7 }
  0x6c   : > { %p7293_p8 = pneg %p7292_p6 }
  0x6e   : > { %p7298_p10 = pnand %p7296_p9, %p7293_p8 }
  0x70   : > { %7301 = shalt.err (!%p7298_p10)
}
  0x71   : > { %s7302_s29 = scalar_lea.vmem %s259_s14, 1248  ;;  %p7310_p0 = scmp.lt.s32.totalorder %s259_s14, %s259_s14 }
  0x72   : > { %p7303_p11 = scmp.ne.s32.totalorder %s259_s14, %s7302_s29  ;;  %p7311_p1 = scmp.lt.s32.totalorder %s7302_s29, %s7302_s29 }
  0x74   : > { %p7305_p12 = pnand %p7303_p11, %p7446_p7  ;;  %p7312_p4 = por %p7311_p1, %p7310_p0 }
  0x76   : > { %p7306_p13 = pneg %p7305_p12 }
  0x78   : > { %p7313_p2 = pnand %p7312_p4, %p7306_p13 }
  0x7a   : > { %7316 = shalt.err (!%p7313_p2)
}
  0x7b   : > { %7120 = dma.hbm_to_vmem [thread:$0]  (!%p7434_p5), %s8163_s5, 1248, %s259_s14, [#allocation9]  }
  0x7c   : > { %p8172_p3 = scmp.ne.s32.totalorder %s8169_s26, 0 }
  0x7d   : > { %p8173_p6 = scmp.ne.s32.totalorder (!%p8172_p3), %s8168_s25, 0 }
  0x7e   : > { %283 = sbr.rel (%p8172_p3) target bundleno = 1914 (0x77a), region = 44 }
  0x85   : > { %7330 = dma.done.wait (%p8173_p6), [#allocation4], 2048  }
  0x86   : > { %7332 = vsyncadd (%p8173_p6), [#allocation4], 4294965248 }
  0x87   : > { %7334 = dma.done.wait (%p8173_p6), [#allocation6], 2064  }
  0x88   : > { %7336 = vsyncadd (%p8173_p6), [#allocation6], 4294965232 }
  0x89   : > { %7338 = dma.done.wait (%p8173_p6), [#allocation9], 160992  }
  0x8a   : > { %7340 = vsyncadd (%p8173_p6), [#allocation9], 4294806304  ;;  %s7563_s26 = sshll.u32 %s7343_s21, 2  ;;  %p5436_p7 = scmp.ne.s32.totalorder %s7343_s21, 0 }
  0x8b   : > { %p333_p5 = scmp.lt.s32.totalorder %s7563_s26, 7  ;;  %v7362_v0 = vmov (!%p5436_p7), 0.0  }
  0x8c   : > { %349 = sbr.rel (%p5436_p7) target bundleno = 147 (0x93), region = 68  ;;  %350 = vst [vmem:[#allocation2] sm:$0xff] (!%p5436_p7), %v7362_v0 }
  0x8d   : > { %s334_s7 = scalar_select %p333_p5, %s7563_s26, 7 }
  0x8f   : > { %s5435_s13 = sshll.u32 %s334_s7, 3 }
  0x90   : > { %s7570_s18 = scalar_lea.vmem %s8158_s0, %s5435_s13 }
  0x93 PF: > { %v355_v1 = vld [vmem:[#allocation3] sm:$0xff]  ;;  %v356_v2 = vld [vmem:[#allocation3 + $0x8] sm:$0xff]  ;;  %v7363_v5 = vmov 0.0|0.0   ;;  %v357_v7 = vld [vmem:[#allocation3 + $0x10] sm:$0xff]  ;;  %vm7364_vm0 = vmmov 0   ;;  %v7365_v9 = vmov 0.0  }
  0x94   : > { %v467_v3 = vld [vmem:[#allocation5] sm:$0xff]  ;;  %v5709_v4 = vpack.c.bf16 %v356_v2, %v355_v1  ;;  %5741 = vmatprep.subr.bf16.mxu1 %v7363_v5  ;;  %v468_v6 = vld [vmem:[#allocation5 + $0x8] sm:$0xff]  ;;  %v358_v8 = vld [vmem:[#allocation3 + $0x18] sm:$0xff]  ;;  %5601 = vmatprep.mubr.msk.f32.mxu1 %vm7364_vm0, %v7365_v9  ;;  %p557_p8 = scmp.lt.s32.totalorder %s7563_s26, 8  ;;  %s634_s24 = sadd.s32 1, %s7563_s26 }
  0x95   : > { %v7576_v10 = vpack.c.bf16 %v468_v6, %v467_v3  ;;  %v5713_v11 = vpack.c.bf16 %v358_v8, %v357_v7  ;;  %v469_v12 = vld [vmem:[#allocation5 + $0x10] sm:$0xff]  ;;  %v470_v13 = vld [vmem:[#allocation5 + $0x18] sm:$0xff]  ;;  %v359_v14 = vld [vmem:[#allocation3 + $0x20] sm:$0xff]  ;;  %p635_p9 = scmp.lt.s32.totalorder %s634_s24, 8  ;;  %s712_s14 = sadd.s32 2, %s7563_s26 }
  0x96   : > { %5710 = vmatprep.subr.bf16.mxu0 %v5709_v4  ;;  %v360_v15 = vld [vmem:[#allocation3 + $0x28] sm:$0xff]  ;;  %v7579_v16 = vpack.c.bf16 %v470_v13, %v469_v12  ;;  %v471_v18 = vld [vmem:[#allocation5 + $0x20] sm:$0xff]  ;;  %v361_v20 = vld [vmem:[#allocation3 + $0x30] sm:$0xff]  ;;  %s558_s25 = scalar_select %p557_p8, 1, 0 }
  0x97   : > { %5712 = vmatpush3.bf16.msra.mxu0 %v5709_v4  ;;  %5743 = vmatpush3.bf16.msra.mxu1 %v7576_v10  ;;  %v5717_v17 = vpack.c.bf16 %v360_v15, %v359_v14  ;;  %v472_v19 = vld [vmem:[#allocation5 + $0x28] sm:$0xff]  ;;  %v362_v21 = vld [vmem:[#allocation3 + $0x38] sm:$0xff]  ;;  %v473_v24 = vld [vmem:[#allocation5 + $0x30] sm:$0xff]  ;;  %s636_s12 = scalar_select %p635_p9, 1, 0 }
  0x98   : > { %5714 = vmatprep.subr.bf16.mxu0 %v5713_v11  ;;  %5744 = vmatprep.subr.bf16.mxu1 %v7363_v5  ;;  %v7583_v22 = vpack.c.bf16 %v472_v19, %v471_v18  ;;  %v5721_v23 = vpack.c.bf16 %v362_v21, %v361_v20  ;;  %v474_v25 = vld [vmem:[#allocation5 + $0x38] sm:$0xff]  ;;  %v363_v26 = vld [vmem:[#allocation3 + $0x40] sm:$0xff]  ;;  %v364_v27 = vld [vmem:[#allocation3 + $0x48] sm:$0xff]  ;;  %v559_v63 = vstv %s558_s25  ;;  %p713_p10 = scmp.lt.s32.totalorder %s712_s14, 8  ;;  %s790_s16 = sadd.s32 3, %s7563_s26 }
  0x99   : > { %v351_v28 = vld [vmem:[%s7570_s18] sm:$0xff]  ;;  %v7588_v29 = vpack.c.bf16 %v474_v25, %v473_v24  ;;  %v5725_v30 = vpack.c.bf16 %v364_v27, %v363_v26  ;;  %v475_v31 = vld [vmem:[#allocation5 + $0x40] sm:$0xff]  ;;  %v476_v32 = vld [vmem:[#allocation5 + $0x48] sm:$0xff]  ;;  %vm560_vm1 = vcmp.eq.s32.totalorder %v559_v63, 1  ;;  %p791_p11 = scmp.lt.s32.totalorder %s790_s16, 8  ;;  %p5439_p12 = scmp.ne.s32.totalorder %s7343_s21, 1 }
  0x9a   : > { %5563 = vmatprep.mubr.f32.mxu0 %v351_v28  ;;  %v365_v33 = vld [vmem:[#allocation3 + $0x50] sm:$0xff]  ;;  %v366_v34 = vld [vmem:[#allocation3 + $0x58] sm:$0xff]  ;;  %v7592_v35 = vpack.c.bf16 %v476_v32, %v475_v31  ;;  %v367_v39 = vld [vmem:[#allocation3 + $0x60] sm:$0xff]  ;;  %s714_s15 = scalar_select %p713_p10, 1, 0 }
  0x9b   : > { %5716 = vmatpush3.bf16.msra.mxu0 %v5713_v11  ;;  %5746 = vmatpush3.bf16.msra.mxu1 %v7579_v16  ;;  %v5729_v36 = vpack.c.bf16 %v366_v34, %v365_v33  ;;  %v477_v37 = vld [vmem:[#allocation5 + $0x50] sm:$0xff]  ;;  %v478_v38 = vld [vmem:[#allocation5 + $0x58] sm:$0xff]  ;;  %v368_v40 = vld [vmem:[#allocation3 + $0x68] sm:$0xff]  ;;  %s792_s20 = scalar_select %p791_p11, 1, 0 }
  0x9c   : > { %5718 = vmatprep.subr.bf16.mxu0 %v5717_v17  ;;  %5747 = vmatprep.subr.bf16.mxu1 %v7363_v5  ;;  %v7596_v41 = vpack.c.bf16 %v478_v38, %v477_v37  ;;  %v5733_v42 = vpack.c.bf16 %v368_v40, %v367_v39  ;;  %v479_v43 = vld [vmem:[#allocation5 + $0x60] sm:$0xff]  ;;  %v480_v44 = vld [vmem:[#allocation5 + $0x68] sm:$0xff]  ;;  %v369_v45 = vld [vmem:[#allocation3 + $0x70] sm:$0xff]  ;;  %v715_v15 = vstv %s714_s15  ;;  %v7366_v32 = vmov (!%p5439_p12), 0.0  }
  0x9d   : > { %v370_v46 = vld [vmem:[#allocation3 + $0x78] sm:$0xff]  ;;  %v7600_v47 = vpack.c.bf16 %v480_v44, %v479_v43  ;;  %v481_v49 = vld [vmem:[#allocation5 + $0x70] sm:$0xff]  ;;  %v352_v52 = vld [vmem:[%s7570_s18 + $0x8] sm:$0xff]  ;;  %vm716_vm3 = vcmp.eq.s32.totalorder %v715_v15, 1 }
  0x9e   : > { %v5737_v48 = vpack.c.bf16 %v370_v46, %v369_v45  ;;  %v482_v50 = vld [vmem:[#allocation5 + $0x78] sm:$0xff]  ;;  %v353_v54 = vld [vmem:[%s7570_s18 + $0x10] sm:$0xff]  ;;  %v354_v55 = vld [vmem:[%s7570_s18 + $0x18] sm:$0xff] }
  0x9f   : > { %5720 = vmatpush3.bf16.msra.mxu0 %v5717_v17  ;;  %5749 = vmatpush3.bf16.msra.mxu1 %v7583_v22  ;;  %v7604_v51 = vpack.c.bf16 %v482_v50, %v481_v49  ;;  %v484_v53 = vld [vmem:[#allocation2] sm:$0xff]  ;;  %v5437_v56 = vld [vmem:[#allocation7] ss:$0 sm:$0xff]  ;;  %v802_v25 = vld [vmem:[#allocation8 + $0x8] sm:$0xff] (!%p5439_p12) }
  0xa0   : > { %5722 = vmatprep.subr.bf16.mxu0 %v5721_v23  ;;  %5750 = vmatprep.subr.bf16.mxu1 %v7363_v5  ;;  %v880_v26 = vld [vmem:[#allocation8 + $0x278] sm:$0xff] (!%p5439_p12)  ;;  %v801_v27 = vld [vmem:[#allocation8] sm:$0xff] (!%p5439_p12)  ;;  %v1114_v37 = vld [vmem:[#allocation8 + $0x9c8] sm:$0xff] (!%p5439_p12) }
  0xa1   : > { %v5837_v28 = vpack.c.bf16 (!%p5439_p12), %v880_v26, %v802_v25  ;;  %v1036_v31 = vld [vmem:[#allocation8 + $0x758] sm:$0xff] (!%p5439_p12)  ;;  %v1270_v43 = vld [vmem:[#allocation8 + $0xea8] sm:$0xff] (!%p5439_p12)  ;;  %v1815_v26 = vld [vmem:[#allocation8 + $0x1fb0] sm:$0xff] (!%p5439_p12) }
  0xa2   : > { %v1192_v38 = vld [vmem:[#allocation8 + $0xc38] sm:$0xff] (!%p5439_p12)  ;;  %v1426_v49 = vld [vmem:[#allocation8 + $0x1388] sm:$0xff] (!%p5439_p12) }
  0xa3   : > { %5724 = vmatpush3.bf16.msra.mxu0 %v5721_v23  ;;  %5752 = vmatpush3.bf16.msra.mxu1 %v7588_v29  ;;  %v5845_v40 = vpack.c.bf16 (!%p5439_p12), %v1192_v38, %v1114_v37  ;;  %v1348_v44 = vld [vmem:[#allocation8 + $0x1118] sm:$0xff] (!%p5439_p12)  ;;  %v1038_v63 = vld [vmem:[#allocation8 + $0x768] sm:$0xff] (!%p5439_p12)  ;;  %v1505_v37 = vld [vmem:[#allocation8 + $0x1600] sm:$0xff] (!%p5439_p12) }
  0xa4   : > { %5726 = vmatprep.subr.bf16.mxu0 %v5725_v30  ;;  %5753 = vmatprep.subr.bf16.mxu1 %v7363_v5  ;;  %v5849_v46 = vpack.c.bf16 (!%p5439_p12), %v1348_v44, %v1270_v43  ;;  %v1504_v50 = vld [vmem:[#allocation8 + $0x15f8] sm:$0xff] (!%p5439_p12) }
  0xa5   : > { %v1816_v15 = vld [vmem:[#allocation8 + $0x1fb8] sm:$0xff] (!%p5439_p12) }
  0xa6   : > { %v884_v43 = vld [vmem:[#allocation8 + $0x298] sm:$0xff] (!%p5439_p12) }
  0xa7   : > { %5728 = vmatpush3.bf16.msra.mxu0 %v5725_v30  ;;  %5755 = vmatpush3.bf16.msra.mxu1 %v7592_v35  ;;  %v958_v30 = vld [vmem:[#allocation8 + $0x4e8] sm:$0xff] (!%p5439_p12) }
  0xa8   : > { %5730 = vmatprep.subr.bf16.mxu0 %v5729_v36  ;;  %5756 = vmatprep.subr.bf16.mxu1 %v7363_v5  ;;  %v5841_v34 = vpack.c.bf16 (!%p5439_p12), %v1036_v31, %v958_v30  ;;  %v1972_v30 = vld [vmem:[#allocation8 + $0x2498] sm:$0xff] (!%p5439_p12) }
  0xab   : > { %5732 = vmatpush3.bf16.msra.mxu0 %v5729_v36  ;;  %5758 = vmatpush3.bf16.msra.mxu1 %v7596_v41  ;;  %v1035_v36 = vld [vmem:[#allocation8 + $0x750] sm:$0xff] (!%p5439_p12) }
  0xac   : > { %5734 = vmatprep.subr.bf16.mxu0 %v5733_v42  ;;  %5759 = vmatprep.subr.bf16.mxu1 %v7363_v5 }
  0xaf   : > { %5736 = vmatpush3.bf16.msra.mxu0 %v5733_v42  ;;  %5761 = vmatpush3.bf16.msra.mxu1 %v7600_v47  ;;  %v1191_v42 = vld [vmem:[#allocation8 + $0xc30] sm:$0xff] (!%p5439_p12) }
  0xb0   : > { %5738 = vmatprep.subr.bf16.mxu0 %v5737_v48  ;;  %5762 = vmatprep.subr.bf16.mxu1 %v7363_v5 }
  0xb3   : > { %5740 = vmatpush3.bf16.msra.mxu0 %v5737_v48  ;;  %5764 = vmatpush3.bf16.msra.mxu1 %v7604_v51  ;;  %v1347_v48 = vld [vmem:[#allocation8 + $0x1110] sm:$0xff] (!%p5439_p12) }
  0xb4   : > { %5765 = vmatprep.subr.bf16.mxu0 %v7363_v5  ;;  %5789 = vmatprep.subr.bf16.mxu1 %v7363_v5 }
  0xb6   : > { %5564 = vmatmul.mubr.f32.vlgmr.msra.gmra.mrb[0].mxu0 %v352_v52  ;;  %5602 = vmatmul.mubr.f32.vlgmr.msra.gmra.mrb[0].mxu1 %v484_v53  ;;  %v882_v52 = vld [vmem:[#allocation8 + $0x288] sm:$0xff] (!%p5439_p12) }
  0xb7   : > { %5767 = vmatpush3.bf16.msra.mxu0 %v7576_v10  ;;  %5791 = vmatpush3.bf16.msra.mxu1 %v7576_v10 }
  0xb8   : > { %5768 = vmatprep.subr.bf16.mxu0 %v7363_v5  ;;  %5792 = vmatprep.subr.bf16.mxu1 %v7363_v5 }
  0xb9   : > { %5671 = vmatprep.mubr.msk.f32.mxu1 %vm7364_vm0, %v7365_v9  ;;  %5566 = vmatprep.mubr.f32.mxu0 %v353_v54  ;;  %v881_v54 = vld [vmem:[#allocation8 + $0x280] sm:$0xff] (!%p5439_p12) }
  0xba   : > { %5567 = vmatmul.mubr.f32.gmra.mrb[2].mxu0 %v354_v55 }
  0xbb   : > { %5770 = vmatpush3.bf16.msra.mxu0 %v7579_v16  ;;  %5794 = vmatpush3.bf16.msra.mxu1 %v7579_v16 }
  0xbc   : > { %5771 = vmatprep.subr.bf16.mxu0 %v7363_v5  ;;  %5795 = vmatprep.subr.bf16.mxu1 %v7363_v5 }
  0xbd   : > { %5636 = vmatprep.mubr.msk.f32.mxu0 %vm7364_vm0, %v7365_v9 }
  0xbf   : > { %5773 = vmatpush3.bf16.msra.mxu0 %v7583_v22  ;;  %5797 = vmatpush3.bf16.msra.mxu1 %v7583_v22 }
  0xc0   : > { %5774 = vmatprep.subr.bf16.mxu0 %v7363_v5  ;;  %5798 = vmatprep.subr.bf16.mxu1 %v7363_v5 }
  0xc3   : > { %5776 = vmatpush3.bf16.msra.mxu0 %v7588_v29  ;;  %5800 = vmatpush3.bf16.msra.mxu1 %v7588_v29 }
  0xc4   : > { %5777 = vmatprep.subr.bf16.mxu0 %v7363_v5  ;;  %5801 = vmatprep.subr.bf16.mxu1 %v7363_v5 }
  0xc7   : > { %5779 = vmatpush3.bf16.msra.mxu0 %v7592_v35  ;;  %5803 = vmatpush3.bf16.msra.mxu1 %v7592_v35 }
  0xc8   : > { %5780 = vmatprep.subr.bf16.mxu0 %v7363_v5  ;;  %5804 = vmatprep.subr.bf16.mxu1 %v7363_v5 }
  0xcb   : > { %5782 = vmatpush3.bf16.msra.mxu0 %v7596_v41  ;;  %5806 = vmatpush3.bf16.msra.mxu1 %v7596_v41 }
  0xcc   : > { %5783 = vmatprep.subr.bf16.mxu0 %v7363_v5  ;;  %5807 = vmatprep.subr.bf16.mxu1 %v7363_v5 }
  0xcf   : > { %5785 = vmatpush3.bf16.msra.mxu0 %v7600_v47  ;;  %5809 = vmatpush3.bf16.msra.mxu1 %v7600_v47 }
  0xd0   : > { %5786 = vmatprep.subr.bf16.mxu0 %v7363_v5  ;;  %5810 = vmatprep.subr.bf16.mxu1 %v7363_v5 }
  0xd3   : > { %5788 = vmatpush3.bf16.msra.mxu0 %v7604_v51  ;;  %5812 = vmatpush3.bf16.msra.mxu1 %v7604_v51 }
  0xd4   : > { %5813 = vmatprep.subr.bf16.mxu0 %v7363_v5 }
 0x189   : > { %v5565_v57 = vpop.f32.mrb[0].mxu0  ;;  %v551_v58 = vpop.f32.mrb[0].mxu1 }
 0x18a   : > { %v437_v59 = vpop.f32.mrb[1].mxu0  ;;  %v5603_v60 = vpop.f32.mrb[1].mxu1  ;;  %v464_v4 = vadd.f32 %v5565_v57, %v5437_v56  ;;  %v1503_v57 = vld [vmem:[#allocation8 + $0x15f0] sm:$0xff] (!%p5439_p12) }
 0x18b   : > { %v463_v61 = vadd.f32 %v5437_v56, %v437_v59  ;;  %v5853_v60 = vpack.c.bf16 (!%p5439_p12), %v1504_v50, %v1426_v49  ;;  %v1661_v49 = vld [vmem:[#allocation8 + $0x1ae0] sm:$0xff] (!%p5439_p12) }
 0x18d   : > { %v555_v62 = vadd.f32 %v551_v58, %v463_v61  ;;  %v5568_v2 = vpop.f32.mrb[2].mxu0  ;;  %v1582_v61 = vld [vmem:[#allocation8 + $0x1868] sm:$0xff] (!%p5439_p12) }
 0x18e   : > { %v447_v3 = vpop.f32.mrb[3].mxu0  ;;  %v466_v18 = vadd.f32 %v5568_v2, %v5437_v56  ;;  %v959_v2 = vld [vmem:[#allocation8 + $0x4f0] sm:$0xff] (!%p5439_p12) }
 0x18f   : > { %7169 = vtanh.f32 %v555_v62  ;;  %v960_v62 = vld [vmem:[#allocation8 + $0x4f8] sm:$0xff] (!%p5439_p12) }
 0x199   : > { %v7170_v0 = vpop.eup %7169 }
 0x19a   : > { %v561_v1 = vsel %vm560_vm1, %v7170_v0, %v484_v53  ;;  %v803_v53 = vld [vmem:[#allocation8 + $0x10] sm:$0xff] (!%p5439_p12)  ;;  %v1660_v0 = vld [vmem:[#allocation8 + $0x1ad8] sm:$0xff] (!%p5439_p12) }
 0x19b   : > { %5637 = vmatmul.mubr.f32.vlgmr.msra.gmra.mrb[4].mxu0 %v561_v1  ;;  %v5871_v59 = vpack.c.bf16 (!%p5439_p12), %v881_v54, %v803_v53  ;;  %v1818_v53 = vld [vmem:[#allocation8 + $0x1fc8] sm:$0xff] (!%p5439_p12) }
 0x19c   : > { %5815 = vmatpush3.bf16.msra.mxu0 %v7576_v10  ;;  %5706 = vmatprep.mubr.msk.f32.mxu0 %vm7364_vm0, %v7365_v9  ;;  %v637_v9 = vstv %s636_s12  ;;  %v962_v54 = vld [vmem:[#allocation8 + $0x508] sm:$0xff] (!%p5439_p12) }
 0x19d   : > { %5816 = vmatprep.subr.bf16.mxu0 %v7363_v5  ;;  %vm638_vm2 = vcmp.eq.s32.totalorder %v637_v9, 1  ;;  %v1115_v9 = vld [vmem:[#allocation8 + $0x9d0] sm:$0xff] (!%p5439_p12) }
 0x1a0   : > { %5818 = vmatpush3.bf16.msra.mxu0 %v7579_v16 }
 0x1a1   : > { %5819 = vmatprep.subr.bf16.mxu0 %v7363_v5 }
 0x1a4   : > { %5821 = vmatpush3.bf16.msra.mxu0 %v7583_v22  ;;  %v793_v22 = vstv %s792_s20 }
 0x1a5   : > { %5822 = vmatprep.subr.bf16.mxu0 %v7363_v5  ;;  %vm794_vm4 = vcmp.eq.s32.totalorder %v793_v22, 1  ;;  %v1271_v22 = vld [vmem:[#allocation8 + $0xeb0] sm:$0xff] (!%p5439_p12) }
 0x1a8   : > { %5824 = vmatpush3.bf16.msra.mxu0 %v7588_v29  ;;  %v879_v29 = vld [vmem:[#allocation8 + $0x270] sm:$0xff] (!%p5439_p12) }
 0x1a9   : > { %5825 = vmatprep.subr.bf16.mxu0 %v7363_v5  ;;  %v5839_v33 = vpack.c.bf16 (!%p5439_p12), %v879_v29, %v801_v27  ;;  %v1428_v27 = vld [vmem:[#allocation8 + $0x1398] sm:$0xff] (!%p5439_p12)  ;;  %v1894_v29 = vld [vmem:[#allocation8 + $0x2228] sm:$0xff] (!%p5439_p12) }
 0x1aa   : > { %v5865_v38 = vpack.c.bf16 (!%p5439_p12), %v1972_v30, %v1894_v29 }
 0x1ac   : > { %5827 = vmatpush3.bf16.msra.mxu0 %v7592_v35  ;;  %v957_v35 = vld [vmem:[#allocation8 + $0x4e0] sm:$0xff] (!%p5439_p12) }
 0x1ad   : > { %5828 = vmatprep.subr.bf16.mxu0 %v7363_v5  ;;  %v5843_v39 = vpack.c.bf16 (!%p5439_p12), %v1035_v36, %v957_v35  ;;  %v1427_v36 = vld [vmem:[#allocation8 + $0x1390] sm:$0xff] (!%p5439_p12) }
 0x1ae   : > { %v5887_v44 = vpack.c.bf16 (!%p5439_p12), %v1505_v37, %v1427_v36  ;;  %v1507_v37 = vld [vmem:[#allocation8 + $0x1610] sm:$0xff] (!%p5439_p12) }
 0x1b0   : > { %5830 = vmatpush3.bf16.msra.mxu0 %v7596_v41  ;;  %v1113_v41 = vld [vmem:[#allocation8 + $0x9c0] sm:$0xff] (!%p5439_p12) }
 0x1b1   : > { %5831 = vmatprep.subr.bf16.mxu0 %v7363_v5  ;;  %v5847_v45 = vpack.c.bf16 (!%p5439_p12), %v1191_v42, %v1113_v41  ;;  %v1662_v41 = vld [vmem:[#allocation8 + $0x1ae8] sm:$0xff] (!%p5439_p12) }
 0x1b2   : > { %v806_v42 = vld [vmem:[#allocation8 + $0x28] sm:$0xff] (!%p5439_p12) }
 0x1b3   : > { %v5901_v50 = vpack.c.bf16 (!%p5439_p12), %v884_v43, %v806_v42 }
 0x1b4   : > { %5833 = vmatpush3.bf16.msra.mxu0 %v7600_v47  ;;  %v1269_v47 = vld [vmem:[#allocation8 + $0xea0] sm:$0xff] (!%p5439_p12) }
 0x1b5   : > { %5834 = vmatprep.subr.bf16.mxu0 %v7363_v5  ;;  %v465_v5 = vadd.f32 %v5437_v56, %v447_v3  ;;  %v5851_v55 = vpack.c.bf16 (!%p5439_p12), %v1347_v48, %v1269_v47  ;;  %v1425_v56 = vld [vmem:[#allocation8 + $0x1380] sm:$0xff] (!%p5439_p12)  ;;  %v1583_v48 = vld [vmem:[#allocation8 + $0x1870] sm:$0xff] (!%p5439_p12) }
 0x1b6   : > { %v1037_v3 = vld [vmem:[#allocation8 + $0x760] sm:$0xff] (!%p5439_p12) }
 0x1b8   : > { %5836 = vmatpush3.bf16.msra.mxu0 %v7604_v51  ;;  %v804_v51 = vld [vmem:[#allocation8 + $0x18] sm:$0xff] (!%p5439_p12) }
 0x1b9   : > { %5838 = vmatprep.subr.bf16.mxu0 (!%p5439_p12), %v5837_v28  ;;  %v5869_v58 = vpack.c.bf16 (!%p5439_p12), %v882_v52, %v804_v51  ;;  %v1506_v28 = vld [vmem:[#allocation8 + $0x1608] sm:$0xff] (!%p5439_p12)  ;;  %v883_v51 = vld [vmem:[#allocation8 + $0x290] sm:$0xff] (!%p5439_p12)  ;;  %v1740_v52 = vld [vmem:[#allocation8 + $0x1d58] sm:$0xff] (!%p5439_p12) }
 0x1ba   : > { %v5885_v35 = vpack.c.bf16 (!%p5439_p12), %v1506_v28, %v1428_v27  ;;  %v1430_v27 = vld [vmem:[#allocation8 + $0x13a8] sm:$0xff] (!%p5439_p12)  ;;  %v1508_v28 = vld [vmem:[#allocation8 + $0x1618] sm:$0xff] (!%p5439_p12) }
 0x1bb   : > { %5870 = vmatprep.subr.bf16.mxu1 (!%p5439_p12), %v5869_v58  ;;  %v961_v58 = vld [vmem:[#allocation8 + $0x500] sm:$0xff] (!%p5439_p12)  ;;  %v5917_v36 = vpack.c.bf16 (!%p5439_p12), %v1508_v28, %v1430_v27 }
 0x26e   : > { %v628_v6 = vpop.f32.mrb[4].mxu0 }
 0x26f   : > { %v632_v7 = vadd.f32 %v628_v6, %v464_v4  ;;  %v5638_v8 = vpop.f32.mrb[5].mxu0  ;;  %v5875_v4 = vpack.c.bf16 (!%p5439_p12), %v1037_v3, %v959_v2  ;;  %v5855_v6 = vpack.c.bf16 (!%p5439_p12), %v1503_v57, %v1425_v56  ;;  %v5891_v56 = vpack.c.bf16 (!%p5439_p12), %v1661_v49, %v1583_v48  ;;  %v1118_v2 = vld [vmem:[#allocation8 + $0x9e8] sm:$0xff] (!%p5439_p12)  ;;  %v1196_v3 = vld [vmem:[#allocation8 + $0xc58] sm:$0xff] (!%p5439_p12)  ;;  %v1663_v49 = vld [vmem:[#allocation8 + $0x1af0] sm:$0xff] (!%p5439_p12) }
 0x270   : > { %v1194_v8 = vld [vmem:[#allocation8 + $0xc48] sm:$0xff] (!%p5439_p12) }
 0x271   : > { %7171 = vtanh.f32 %v632_v7  ;;  %v1116_v7 = vld [vmem:[#allocation8 + $0x9d8] sm:$0xff] (!%p5439_p12) }
 0x27b   : > { %v7172_v10 = vpop.eup %7171 }
 0x27c   : > { %v639_v11 = vsel %vm638_vm2, %v7172_v10, %v561_v1  ;;  %v5873_v1 = vpack.c.bf16 (!%p5439_p12), %v1038_v63, %v960_v62  ;;  %v5857_v10 = vpack.c.bf16 (!%p5439_p12), %v1660_v0, %v1582_v61  ;;  %v1817_v61 = vld [vmem:[#allocation8 + $0x1fc0] sm:$0xff] (!%p5439_p12)  ;;  %v1039_v63 = vld [vmem:[#allocation8 + $0x770] sm:$0xff] (!%p5439_p12)  ;;  %v1896_v0 = vld [vmem:[#allocation8 + $0x2238] sm:$0xff] (!%p5439_p12) }
 0x27d   : > { %5672 = vmatmul.mubr.f32.vlgmr.msra.gmra.mrb[2].mxu1 %v639_v11 }
 0x27e   : > { %2594 = vmatprep.mubr.f32.mxu1 (!%p5439_p12), %v7366_v32  ;;  %5872 = vmatpush1.bf16.msra.mxu1 (!%p5439_p12), %v5871_v59  ;;  %v5893_v59 = vpack.c.bf16 (!%p5439_p12), %v1818_v53, %v1740_v52  ;;  %v1742_v52 = vld [vmem:[#allocation8 + $0x1d68] sm:$0xff] (!%p5439_p12)  ;;  %v1820_v53 = vld [vmem:[#allocation8 + $0x1fd8] sm:$0xff] (!%p5439_p12) }
 0x27f   : > { %5874 = vmatprep.subr.bf16.mxu1 (!%p5439_p12), %v5873_v1  ;;  %v1974_v1 = vld [vmem:[#allocation8 + $0x24a8] sm:$0xff] (!%p5439_p12) }
 0x282   : > { %5876 = vmatpush1.bf16.msra.mxu1 (!%p5439_p12), %v5875_v4 }
 0x350   : > { %v706_v12 = vpop.f32.mrb[2].mxu1 }
 0x351   : > { %v710_v13 = vadd.f32 %v706_v12, %v465_v5  ;;  %v5673_v14 = vpop.f32.mrb[3].mxu1  ;;  %v1659_v5 = vld [vmem:[#allocation8 + $0x1ad0] sm:$0xff] (!%p5439_p12)  ;;  %v5877_v12 = vpack.c.bf16 (!%p5439_p12), %v1194_v8, %v1116_v7  ;;  %v1117_v7 = vld [vmem:[#allocation8 + $0x9e0] sm:$0xff] (!%p5439_p12)  ;;  %v5897_v8 = vpack.c.bf16 (!%p5439_p12), %v1974_v1, %v1896_v0  ;;  %v1898_v0 = vld [vmem:[#allocation8 + $0x2248] sm:$0xff] (!%p5439_p12) }
 0x352   : > { %v1738_v14 = vld [vmem:[#allocation8 + $0x1d48] sm:$0xff] (!%p5439_p12)  ;;  %v1976_v1 = vld [vmem:[#allocation8 + $0x24b8] sm:$0xff] (!%p5439_p12) }
 0x353   : > { %7173 = vtanh.f32 %v710_v13  ;;  %v1193_v13 = vld [vmem:[#allocation8 + $0xc40] sm:$0xff] (!%p5439_p12)  ;;  %5878 = vmatprep.subr.bf16.mxu1 (!%p5439_p12), %v5877_v12  ;;  %v5861_v25 = vpack.c.bf16 (!%p5439_p12), %v1816_v15, %v1738_v14  ;;  %v808_v12 = vld [vmem:[#allocation8 + $0x38] sm:$0xff] (!%p5439_p12)  ;;  %v1274_v14 = vld [vmem:[#allocation8 + $0xec8] sm:$0xff] (!%p5439_p12) }
 0x354   : > { %v1352_v15 = vld [vmem:[#allocation8 + $0x1138] sm:$0xff] (!%p5439_p12) }
 0x35d   : > { %v7174_v16 = vpop.eup %7173 }
 0x35e   : > { %v717_v17 = vsel %vm716_vm3, %v7174_v16, %v639_v11  ;;  %v1581_v11 = vld [vmem:[#allocation8 + $0x1860] sm:$0xff] (!%p5439_p12)  ;;  %v1272_v16 = vld [vmem:[#allocation8 + $0xeb8] sm:$0xff] (!%p5439_p12) }
 0x35f   : > { %5707 = vmatmul.mubr.f32.vlgmr.msra.gmra.mrb[6].mxu0 %v717_v17 }
 0x360   : > { %2523 = vmatprep.mubr.f32.mxu0 (!%p5439_p12), %v7366_v32  ;;  %5840 = vmatpush1.bf16.msra.mxu0 (!%p5439_p12), %v5839_v33 }
 0x361   : > { %5842 = vmatprep.subr.bf16.mxu0 (!%p5439_p12), %v5841_v34  ;;  %v1893_v34 = vld [vmem:[#allocation8 + $0x2220] sm:$0xff] (!%p5439_p12) }
 0x364   : > { %5844 = vmatpush1.bf16.msra.mxu0 (!%p5439_p12), %v5843_v39  ;;  %v1971_v39 = vld [vmem:[#allocation8 + $0x2490] sm:$0xff] (!%p5439_p12) }
 0x365   : > { %5846 = vmatprep.subr.bf16.mxu0 (!%p5439_p12), %v5845_v40  ;;  %v1584_v40 = vld [vmem:[#allocation8 + $0x1878] sm:$0xff] (!%p5439_p12) }
 0x366   : > { %v5889_v47 = vpack.c.bf16 (!%p5439_p12), %v1662_v41, %v1584_v40  ;;  %v1586_v40 = vld [vmem:[#allocation8 + $0x1888] sm:$0xff] (!%p5439_p12)  ;;  %v1664_v41 = vld [vmem:[#allocation8 + $0x1af8] sm:$0xff] (!%p5439_p12) }
 0x367   : > { %v5921_v48 = vpack.c.bf16 (!%p5439_p12), %v1664_v41, %v1586_v40 }
 0x368   : > { %5848 = vmatpush1.bf16.msra.mxu0 (!%p5439_p12), %v5847_v45  ;;  %v5867_v45 = vpack.c.bf16 (!%p5439_p12), %v1971_v39, %v1893_v34  ;;  %v963_v34 = vld [vmem:[#allocation8 + $0x510] sm:$0xff] (!%p5439_p12)  ;;  %v1198_v39 = vld [vmem:[#allocation8 + $0xc68] sm:$0xff] (!%p5439_p12) }
 0x369   : > { %5850 = vmatprep.subr.bf16.mxu0 (!%p5439_p12), %v5849_v46  ;;  %v805_v46 = vld [vmem:[#allocation8 + $0x20] sm:$0xff] (!%p5439_p12) }
 0x36a   : > { %v5903_v57 = vpack.c.bf16 (!%p5439_p12), %v883_v51, %v805_v46  ;;  %v1119_v46 = vld [vmem:[#allocation8 + $0x9f0] sm:$0xff] (!%p5439_p12)  ;;  %v1354_v51 = vld [vmem:[#allocation8 + $0x1148] sm:$0xff] (!%p5439_p12) }
 0x36c   : > { %5852 = vmatpush1.bf16.msra.mxu0 (!%p5439_p12), %v5851_v55  ;;  %v1040_v55 = vld [vmem:[#allocation8 + $0x778] sm:$0xff] (!%p5439_p12) }
 0x36d   : > { %5854 = vmatprep.subr.bf16.mxu0 (!%p5439_p12), %v5853_v60  ;;  %v1739_v60 = vld [vmem:[#allocation8 + $0x1d50] sm:$0xff] (!%p5439_p12)  ;;  %v5905_v62 = vpack.c.bf16 (!%p5439_p12), %v1040_v55, %v962_v54 }
 0x36e   : > { %v5895_v4 = vpack.c.bf16 (!%p5439_p12), %v1817_v61, %v1739_v60  ;;  %v5925_v60 = vpack.c.bf16 (!%p5439_p12), %v1820_v53, %v1742_v52  ;;  %v1819_v61 = vld [vmem:[#allocation8 + $0x1fd0] sm:$0xff] (!%p5439_p12) }
 0x370   : > { %5856 = vmatpush1.bf16.msra.mxu0 (!%p5439_p12), %v5855_v6  ;;  %v5907_v6 = vpack.c.bf16 (!%p5439_p12), %v1039_v63, %v961_v58  ;;  %v1275_v58 = vld [vmem:[#allocation8 + $0xed0] sm:$0xff] (!%p5439_p12)  ;;  %v1510_v63 = vld [vmem:[#allocation8 + $0x1628] sm:$0xff] (!%p5439_p12) }
 0x371   : > { %5858 = vmatprep.subr.bf16.mxu0 (!%p5439_p12), %v5857_v10  ;;  %v1973_v10 = vld [vmem:[#allocation8 + $0x24a0] sm:$0xff] (!%p5439_p12) }
 0x432   : > { %v784_v19 = vpop.f32.mrb[6].mxu0 }
 0x433   : > { %v788_v20 = vadd.f32 %v784_v19, %v466_v18  ;;  %v5708_v21 = vpop.f32.mrb[7].mxu0  ;;  %v1350_v18 = vld [vmem:[#allocation8 + $0x1128] sm:$0xff] (!%p5439_p12)  ;;  %v5859_v19 = vpack.c.bf16 (!%p5439_p12), %v1659_v5, %v1581_v11  ;;  %v5909_v11 = vpack.c.bf16 (!%p5439_p12), %v1196_v3, %v1118_v2  ;;  %v1195_v5 = vld [vmem:[#allocation8 + $0xc50] sm:$0xff] (!%p5439_p12) }
 0x434   : > { %v5881_v21 = vpack.c.bf16 (!%p5439_p12), %v1350_v18, %v1272_v16  ;;  %v1273_v18 = vld [vmem:[#allocation8 + $0xec0] sm:$0xff] (!%p5439_p12) }
 0x435   : > { %7175 = vtanh.f32 %v788_v20  ;;  %v1737_v20 = vld [vmem:[#allocation8 + $0x1d40] sm:$0xff] (!%p5439_p12)  ;;  %5860 = vmatpush1.bf16.msra.mxu0 (!%p5439_p12), %v5859_v19 }
 0x436   : > { %v5863_v33 = vpack.c.bf16 (!%p5439_p12), %v1815_v26, %v1737_v20  ;;  %5862 = vmatprep.subr.bf16.mxu0 (!%p5439_p12), %v5861_v25  ;;  %v807_v20 = vld [vmem:[#allocation8 + $0x30] sm:$0xff] (!%p5439_p12)  ;;  %v964_v25 = vld [vmem:[#allocation8 + $0x518] sm:$0xff] (!%p5439_p12)  ;;  %v1042_v26 = vld [vmem:[#allocation8 + $0x788] sm:$0xff] (!%p5439_p12) }
 0x439   : > { %5864 = vmatpush1.bf16.msra.mxu0 (!%p5439_p12), %v5863_v33  ;;  %v5937_v33 = vpack.c.bf16 (!%p5439_p12), %v1042_v26, %v964_v25  ;;  %v966_v25 = vld [vmem:[#allocation8 + $0x528] sm:$0xff] (!%p5439_p12)  ;;  %v1044_v26 = vld [vmem:[#allocation8 + $0x798] sm:$0xff] (!%p5439_p12) }
 0x43a   : > { %5866 = vmatprep.subr.bf16.mxu0 (!%p5439_p12), %v5865_v38  ;;  %v1120_v38 = vld [vmem:[#allocation8 + $0x9f8] sm:$0xff] (!%p5439_p12) }
 0x43b   : > { %800 = sbr.rel (%p5439_p12) target bundleno = 1914 (0x77a), region = 72 }
 0x43d   : > { %5868 = vmatpush1.bf16.msra.mxu0 (!%p5439_p12), %v5867_v45  ;;  %v5941_v45 = vpack.c.bf16 (!%p5439_p12), %v1198_v39, %v1120_v38  ;;  %v1122_v38 = vld [vmem:[#allocation8 + $0xa08] sm:$0xff] (!%p5439_p12)  ;;  %v1200_v39 = vld [vmem:[#allocation8 + $0xc78] sm:$0xff] (!%p5439_p12) }
 0x43e   : > { %5902 = vmatprep.subr.bf16.mxu0 (!%p5439_p12), %v5901_v50  ;;  %v1276_v50 = vld [vmem:[#allocation8 + $0xed8] sm:$0xff] (!%p5439_p12) }
 0x43f   : > { %v7176_v23 = vpop.eup %7175 }
 0x440   : > { %v7669_v24 = vsel %vm794_vm4, %v7176_v23, %v717_v17  ;;  %v5879_v17 = vpack.c.bf16 (!%p5439_p12), %v1193_v13, %v1115_v9  ;;  %v1349_v23 = vld [vmem:[#allocation8 + $0x1120] sm:$0xff] (!%p5439_p12)  ;;  %v1895_v9 = vld [vmem:[#allocation8 + $0x2230] sm:$0xff] (!%p5439_p12)  ;;  %v886_v13 = vld [vmem:[#allocation8 + $0x2a8] sm:$0xff] (!%p5439_p12) }
 0x441   : > { %796 = vst [vmem:[#allocation2] sm:$0xff] %v7669_v24  ;;  %v5883_v31 = vpack.c.bf16 (!%p5439_p12), %v1349_v23, %v1271_v22  ;;  %2524 = vmatmul.mubr.f32.vlgmr.msra.gmra.mrb[0].mxu0 (!%p5439_p12), %v7669_v24  ;;  %v5899_v16 = vpack.c.bf16 (!%p5439_p12), %v1973_v10, %v1895_v9  ;;  %v5933_v19 = vpack.c.bf16 (!%p5439_p12), %v886_v13, %v808_v12  ;;  %v1351_v23 = vld [vmem:[#allocation8 + $0x1130] sm:$0xff] (!%p5439_p12)  ;;  %v810_v12 = vld [vmem:[#allocation8 + $0x48] sm:$0xff] (!%p5439_p12)  ;;  %v888_v13 = vld [vmem:[#allocation8 + $0x2b8] sm:$0xff] (!%p5439_p12) }
 0x442   : > { %5880 = vmatpush1.bf16.msra.mxu1 %v5879_v17  ;;  %5904 = vmatpush1.bf16.msra.mxu0 %v5903_v57  ;;  %v5911_v17 = vpack.c.bf16 %v1195_v5, %v1117_v7  ;;  %v5913_v22 = vpack.c.bf16 %v1352_v15, %v1274_v14  ;;  %v5915_v30 = vpack.c.bf16 %v1351_v23, %v1273_v18  ;;  %v1431_v7 = vld [vmem:[#allocation8 + $0x13b0] sm:$0xff]  ;;  %v1666_v5 = vld [vmem:[#allocation8 + $0x1b08] sm:$0xff] }
 0x443   : > { %5882 = vmatprep.subr.bf16.mxu1 %v5881_v21  ;;  %5906 = vmatprep.subr.bf16.mxu0 %v5905_v62  ;;  %v885_v21 = vld [vmem:[#allocation8 + $0x2a0] sm:$0xff]  ;;  %v5945_v57 = vpack.c.bf16 %v1354_v51, %v1276_v50  ;;  %v1432_v62 = vld [vmem:[#allocation8 + $0x13b8] sm:$0xff]  ;;  %v5929_v9 = vpack.c.bf16 %v1976_v1, %v1898_v0  ;;  %v1975_v10 = vld [vmem:[#allocation8 + $0x24b0] sm:$0xff] }
 0x444   : > { %2665 = vmatprep.mubr.f32.mxu0 %v7366_v32  ;;  %v5935_v29 = vpack.c.bf16 %v885_v21, %v807_v20  ;;  %v1587_v18 = vld [vmem:[#allocation8 + $0x1890] sm:$0xff]  ;;  %v5965_v20 = vpack.c.bf16 %v888_v13, %v810_v12  ;;  %v1822_v23 = vld [vmem:[#allocation8 + $0x1fe8] sm:$0xff]  ;;  %v1356_v51 = vld [vmem:[#allocation8 + $0x1158] sm:$0xff] }
 0x445   : > { %v887_v21 = vld [vmem:[#allocation8 + $0x2b0] sm:$0xff]  ;;  %v1278_v50 = vld [vmem:[#allocation8 + $0xee8] sm:$0xff] }
 0x446   : > { %5884 = vmatpush1.bf16.msra.mxu1 %v5883_v31  ;;  %5908 = vmatpush1.bf16.msra.mxu0 %v5907_v6  ;;  %v1429_v31 = vld [vmem:[#allocation8 + $0x13a0] sm:$0xff]  ;;  %v5949_v6 = vpack.c.bf16 %v1510_v63, %v1432_v62  ;;  %v1434_v62 = vld [vmem:[#allocation8 + $0x13c8] sm:$0xff]  ;;  %v1512_v63 = vld [vmem:[#allocation8 + $0x1638] sm:$0xff] }
 0x447   : > { %5886 = vmatprep.subr.bf16.mxu1 %v5885_v35  ;;  %5910 = vmatprep.subr.bf16.mxu0 %v5909_v11  ;;  %v1041_v35 = vld [vmem:[#allocation8 + $0x780] sm:$0xff]  ;;  %v5919_v43 = vpack.c.bf16 %v1507_v37, %v1429_v31  ;;  %v1588_v11 = vld [vmem:[#allocation8 + $0x1898] sm:$0xff]  ;;  %v1743_v31 = vld [vmem:[#allocation8 + $0x1d70] sm:$0xff] }
 0x448   : > { %v5939_v42 = vpack.c.bf16 %v1041_v35, %v963_v34  ;;  %v5969_v34 = vpack.c.bf16 %v1044_v26, %v966_v25  ;;  %v1043_v35 = vld [vmem:[#allocation8 + $0x790] sm:$0xff]  ;;  %v1978_v37 = vld [vmem:[#allocation8 + $0x24c8] sm:$0xff] }
 0x44a   : > { %5888 = vmatpush1.bf16.msra.mxu1 %v5887_v44  ;;  %5912 = vmatpush1.bf16.msra.mxu0 %v5911_v17  ;;  %v1585_v44 = vld [vmem:[#allocation8 + $0x1880] sm:$0xff]  ;;  %v5953_v17 = vpack.c.bf16 %v1666_v5, %v1588_v11  ;;  %v1590_v11 = vld [vmem:[#allocation8 + $0x18a8] sm:$0xff]  ;;  %v1668_v5 = vld [vmem:[#allocation8 + $0x1b18] sm:$0xff] }
 0x44b   : > { %5890 = vmatprep.subr.bf16.mxu1 %v5889_v47  ;;  %5914 = vmatprep.subr.bf16.mxu0 %v5913_v22  ;;  %v1197_v47 = vld [vmem:[#allocation8 + $0xc60] sm:$0xff]  ;;  %v5923_v55 = vpack.c.bf16 %v1663_v49, %v1585_v44  ;;  %v1744_v22 = vld [vmem:[#allocation8 + $0x1d78] sm:$0xff]  ;;  %v1899_v44 = vld [vmem:[#allocation8 + $0x2250] sm:$0xff] }
 0x44c   : > { %v5943_v54 = vpack.c.bf16 %v1197_v47, %v1119_v46  ;;  %v5973_v46 = vpack.c.bf16 %v1200_v39, %v1122_v38  ;;  %v1199_v47 = vld [vmem:[#allocation8 + $0xc70] sm:$0xff]  ;;  %v890_v49 = vld [vmem:[#allocation8 + $0x2c8] sm:$0xff] }
 0x44e   : > { %5892 = vmatpush1.bf16.msra.mxu1 %v5891_v56  ;;  %5916 = vmatpush1.bf16.msra.mxu0 %v5915_v30  ;;  %v1741_v56 = vld [vmem:[#allocation8 + $0x1d60] sm:$0xff]  ;;  %v5957_v30 = vpack.c.bf16 %v1822_v23, %v1744_v22  ;;  %v1746_v22 = vld [vmem:[#allocation8 + $0x1d88] sm:$0xff]  ;;  %v1824_v23 = vld [vmem:[#allocation8 + $0x1ff8] sm:$0xff] }
 0x44f   : > { %5894 = vmatprep.subr.bf16.mxu1 %v5893_v59  ;;  %5918 = vmatprep.subr.bf16.mxu0 %v5917_v36  ;;  %v1353_v59 = vld [vmem:[#allocation8 + $0x1140] sm:$0xff]  ;;  %v5927_v3 = vpack.c.bf16 %v1819_v61, %v1741_v56  ;;  %v1900_v36 = vld [vmem:[#allocation8 + $0x2258] sm:$0xff]  ;;  %v811_v56 = vld [vmem:[#allocation8 + $0x50] sm:$0xff] }
 0x450   : > { %v5947_v2 = vpack.c.bf16 %v1353_v59, %v1275_v58  ;;  %v5977_v58 = vpack.c.bf16 %v1356_v51, %v1278_v50  ;;  %v1355_v59 = vld [vmem:[#allocation8 + $0x1150] sm:$0xff]  ;;  %v1046_v61 = vld [vmem:[#allocation8 + $0x7a8] sm:$0xff] }
 0x452   : > { %5896 = vmatpush1.bf16.msra.mxu1 %v5895_v4  ;;  %5920 = vmatpush1.bf16.msra.mxu0 %v5919_v43  ;;  %v1897_v4 = vld [vmem:[#allocation8 + $0x2240] sm:$0xff]  ;;  %v5961_v43 = vpack.c.bf16 %v1978_v37, %v1900_v36  ;;  %v1902_v36 = vld [vmem:[#allocation8 + $0x2268] sm:$0xff]  ;;  %v1980_v37 = vld [vmem:[#allocation8 + $0x24d8] sm:$0xff] }
 0x453   : > { %5898 = vmatprep.subr.bf16.mxu1 %v5897_v8  ;;  %5922 = vmatprep.subr.bf16.mxu0 %v5921_v48  ;;  %v1509_v8 = vld [vmem:[#allocation8 + $0x1620] sm:$0xff]  ;;  %v5931_v15 = vpack.c.bf16 %v1975_v10, %v1897_v4  ;;  %v812_v48 = vld [vmem:[#allocation8 + $0x58] sm:$0xff]  ;;  %v967_v4 = vld [vmem:[#allocation8 + $0x530] sm:$0xff] }
 0x454   : > { %v5951_v14 = vpack.c.bf16 %v1509_v8, %v1431_v7  ;;  %v5981_v7 = vpack.c.bf16 %v1512_v63, %v1434_v62  ;;  %v1511_v8 = vld [vmem:[#allocation8 + $0x1630] sm:$0xff]  ;;  %v1202_v10 = vld [vmem:[#allocation8 + $0xc88] sm:$0xff] }
 0x456   : > { %5900 = vmatpush1.bf16.msra.mxu1 %v5899_v16  ;;  %5924 = vmatpush1.bf16.msra.mxu0 %v5923_v55  ;;  %v809_v16 = vld [vmem:[#allocation8 + $0x40] sm:$0xff]  ;;  %v5997_v55 = vpack.c.bf16 %v890_v49, %v812_v48  ;;  %v814_v48 = vld [vmem:[#allocation8 + $0x68] sm:$0xff]  ;;  %v892_v49 = vld [vmem:[#allocation8 + $0x2d8] sm:$0xff] }
 0x457   : > { %5934 = vmatprep.subr.bf16.mxu1 %v5933_v19  ;;  %5926 = vmatprep.subr.bf16.mxu0 %v5925_v60  ;;  %v1665_v19 = vld [vmem:[#allocation8 + $0x1b00] sm:$0xff]  ;;  %v5967_v28 = vpack.c.bf16 %v887_v21, %v809_v16  ;;  %v968_v60 = vld [vmem:[#allocation8 + $0x538] sm:$0xff]  ;;  %v1123_v16 = vld [vmem:[#allocation8 + $0xa10] sm:$0xff] }
 0x458   : > { %v5955_v27 = vpack.c.bf16 %v1665_v19, %v1587_v18  ;;  %v5985_v18 = vpack.c.bf16 %v1668_v5, %v1590_v11  ;;  %v1667_v19 = vld [vmem:[#allocation8 + $0x1b10] sm:$0xff]  ;;  %v1358_v21 = vld [vmem:[#allocation8 + $0x1168] sm:$0xff] }
 0x459   : > { %2595 = vmatmul.mubr.f32.vlgmr.msra.gmra.mrb[0].mxu1 %v7669_v24 }
 0x45a   : > { %5936 = vmatpush1.bf16.msra.mxu1 %v5935_v29  ;;  %2736 = vmatprep.mubr.f32.mxu1 %v7366_v32  ;;  %v965_v29 = vld [vmem:[#allocation8 + $0x520] sm:$0xff] }
 0x45b   : > { %5938 = vmatprep.subr.bf16.mxu1 %v5937_v33  ;;  %5928 = vmatpush1.bf16.msra.mxu0 %v5927_v3  ;;  %v1821_v33 = vld [vmem:[#allocation8 + $0x1fe0] sm:$0xff]  ;;  %v5971_v41 = vpack.c.bf16 %v1043_v35, %v965_v29  ;;  %v6001_v3 = vpack.c.bf16 %v1046_v61, %v968_v60  ;;  %v1279_v29 = vld [vmem:[#allocation8 + $0xef0] sm:$0xff]  ;;  %v1514_v35 = vld [vmem:[#allocation8 + $0x1648] sm:$0xff] }
 0x45c   : > { %5930 = vmatprep.subr.bf16.mxu0 %v5929_v9  ;;  %v5959_v40 = vpack.c.bf16 %v1821_v33, %v1743_v31  ;;  %v1124_v9 = vld [vmem:[#allocation8 + $0xa18] sm:$0xff]  ;;  %v5989_v31 = vpack.c.bf16 %v1824_v23, %v1746_v22  ;;  %v1823_v33 = vld [vmem:[#allocation8 + $0x1ff0] sm:$0xff]  ;;  %v970_v60 = vld [vmem:[#allocation8 + $0x548] sm:$0xff] }
 0x45d   : > { %v1048_v61 = vld [vmem:[#allocation8 + $0x7b8] sm:$0xff] }
 0x45e   : > { %5940 = vmatpush1.bf16.msra.mxu1 %v5939_v42  ;;  %v1121_v42 = vld [vmem:[#allocation8 + $0xa00] sm:$0xff] }
 0x45f   : > { %5942 = vmatprep.subr.bf16.mxu1 %v5941_v45  ;;  %5932 = vmatpush1.bf16.msra.mxu0 %v5931_v15  ;;  %v1977_v45 = vld [vmem:[#allocation8 + $0x24c0] sm:$0xff]  ;;  %v5975_v53 = vpack.c.bf16 %v1199_v47, %v1121_v42  ;;  %v6005_v15 = vpack.c.bf16 %v1202_v10, %v1124_v9  ;;  %v1435_v42 = vld [vmem:[#allocation8 + $0x13d0] sm:$0xff]  ;;  %v1670_v47 = vld [vmem:[#allocation8 + $0x1b28] sm:$0xff] }
 0x460   : > { %5966 = vmatprep.subr.bf16.mxu0 %v5965_v20  ;;  %v5963_v52 = vpack.c.bf16 %v1977_v45, %v1899_v44  ;;  %v1280_v20 = vld [vmem:[#allocation8 + $0xef8] sm:$0xff]  ;;  %v5993_v44 = vpack.c.bf16 %v1980_v37, %v1902_v36  ;;  %v1979_v45 = vld [vmem:[#allocation8 + $0x24d0] sm:$0xff]  ;;  %v1126_v9 = vld [vmem:[#allocation8 + $0xa28] sm:$0xff] }
 0x461   : > { %v1204_v10 = vld [vmem:[#allocation8 + $0xc98] sm:$0xff] }
 0x462   : > { %5944 = vmatpush1.bf16.msra.mxu1 %v5943_v54  ;;  %2666 = vmatmul.mubr.f32.vlgmr.msra.gmra.mrb[2].mxu0 %v7669_v24  ;;  %v1277_v54 = vld [vmem:[#allocation8 + $0xee0] sm:$0xff] }
 0x463   : > { %5946 = vmatprep.subr.bf16.mxu1 %v5945_v57  ;;  %5968 = vmatpush1.bf16.msra.mxu0 %v5967_v28  ;;  %v889_v57 = vld [vmem:[#allocation8 + $0x2c0] sm:$0xff]  ;;  %v5979_v1 = vpack.c.bf16 %v1355_v59, %v1277_v54  ;;  %v6009_v28 = vpack.c.bf16 %v1358_v21, %v1280_v20  ;;  %v1591_v54 = vld [vmem:[#allocation8 + $0x18b0] sm:$0xff]  ;;  %v1826_v59 = vld [vmem:[#allocation8 + $0x2008] sm:$0xff] }
 0x464   : > { %5970 = vmatprep.subr.bf16.mxu0 %v5969_v34  ;;  %2807 = vmatprep.mubr.f32.mxu0 %v7366_v32  ;;  %v5999_v0 = vpack.c.bf16 %v889_v57, %v811_v56  ;;  %v1436_v34 = vld [vmem:[#allocation8 + $0x13d8] sm:$0xff]  ;;  %v6029_v56 = vpack.c.bf16 %v892_v49, %v814_v48  ;;  %v891_v57 = vld [vmem:[#allocation8 + $0x2d0] sm:$0xff]  ;;  %v1282_v20 = vld [vmem:[#allocation8 + $0xf08] sm:$0xff] }
 0x465   : > { %v1360_v21 = vld [vmem:[#allocation8 + $0x1178] sm:$0xff] }
 0x466   : > { %5948 = vmatpush1.bf16.msra.mxu1 %v5947_v2  ;;  %v1433_v2 = vld [vmem:[#allocation8 + $0x13c0] sm:$0xff] }
 0x467   : > { %5950 = vmatprep.subr.bf16.mxu1 %v5949_v6  ;;  %5972 = vmatpush1.bf16.msra.mxu0 %v5971_v41  ;;  %v1045_v6 = vld [vmem:[#allocation8 + $0x7a0] sm:$0xff]  ;;  %v5983_v13 = vpack.c.bf16 %v1511_v8, %v1433_v2  ;;  %v6013_v41 = vpack.c.bf16 %v1514_v35, %v1436_v34  ;;  %v1747_v2 = vld [vmem:[#allocation8 + $0x1d90] sm:$0xff]  ;;  %v1982_v8 = vld [vmem:[#allocation8 + $0x24e8] sm:$0xff] }
 0x468   : > { %5974 = vmatprep.subr.bf16.mxu0 %v5973_v46  ;;  %v6003_v12 = vpack.c.bf16 %v1045_v6, %v967_v4  ;;  %v1592_v46 = vld [vmem:[#allocation8 + $0x18b8] sm:$0xff]  ;;  %v6033_v4 = vpack.c.bf16 %v1048_v61, %v970_v60  ;;  %v1047_v6 = vld [vmem:[#allocation8 + $0x7b0] sm:$0xff]  ;;  %v1438_v34 = vld [vmem:[#allocation8 + $0x13e8] sm:$0xff] }
 0x469   : > { %v1516_v35 = vld [vmem:[#allocation8 + $0x1658] sm:$0xff] }
 0x46a   : > { %5952 = vmatpush1.bf16.msra.mxu1 %v5951_v14  ;;  %v1589_v14 = vld [vmem:[#allocation8 + $0x18a0] sm:$0xff] }
 0x46b   : > { %5954 = vmatprep.subr.bf16.mxu1 %v5953_v17  ;;  %5976 = vmatpush1.bf16.msra.mxu0 %v5975_v53  ;;  %v1201_v17 = vld [vmem:[#allocation8 + $0xc80] sm:$0xff]  ;;  %v5987_v26 = vpack.c.bf16 %v1667_v19, %v1589_v14  ;;  %v6017_v53 = vpack.c.bf16 %v1670_v47, %v1592_v46  ;;  %v1903_v14 = vld [vmem:[#allocation8 + $0x2270] sm:$0xff]  ;;  %v894_v19 = vld [vmem:[#allocation8 + $0x2e8] sm:$0xff] }
 0x46c   : > { %5978 = vmatprep.subr.bf16.mxu0 %v5977_v58  ;;  %v6007_v25 = vpack.c.bf16 %v1201_v17, %v1123_v16  ;;  %v1748_v58 = vld [vmem:[#allocation8 + $0x1d98] sm:$0xff]  ;;  %v6037_v16 = vpack.c.bf16 %v1204_v10, %v1126_v9  ;;  %v1203_v17 = vld [vmem:[#allocation8 + $0xc90] sm:$0xff]  ;;  %v1594_v46 = vld [vmem:[#allocation8 + $0x18c8] sm:$0xff] }
 0x46d   : > { %v1672_v47 = vld [vmem:[#allocation8 + $0x1b38] sm:$0xff] }
 0x46e   : > { %5956 = vmatpush1.bf16.msra.mxu1 %v5955_v27  ;;  %v1745_v27 = vld [vmem:[#allocation8 + $0x1d80] sm:$0xff] }
 0x46f   : > { %5958 = vmatprep.subr.bf16.mxu1 %v5957_v30  ;;  %5980 = vmatpush1.bf16.msra.mxu0 %v5979_v1  ;;  %v1357_v30 = vld [vmem:[#allocation8 + $0x1160] sm:$0xff]  ;;  %v5991_v39 = vpack.c.bf16 %v1823_v33, %v1745_v27  ;;  %v6021_v1 = vpack.c.bf16 %v1826_v59, %v1748_v58  ;;  %v815_v27 = vld [vmem:[#allocation8 + $0x70] sm:$0xff]  ;;  %v1050_v33 = vld [vmem:[#allocation8 + $0x7c8] sm:$0xff] }
 0x470   : > { %5982 = vmatprep.subr.bf16.mxu0 %v5981_v7  ;;  %v6011_v38 = vpack.c.bf16 %v1357_v30, %v1279_v29  ;;  %v1904_v7 = vld [vmem:[#allocation8 + $0x2278] sm:$0xff]  ;;  %v6041_v29 = vpack.c.bf16 %v1360_v21, %v1282_v20  ;;  %v1359_v30 = vld [vmem:[#allocation8 + $0x1170] sm:$0xff]  ;;  %v1750_v58 = vld [vmem:[#allocation8 + $0x1da8] sm:$0xff] }
 0x471   : > { %v1828_v59 = vld [vmem:[#allocation8 + $0x2018] sm:$0xff] }
 0x472   : > { %5960 = vmatpush1.bf16.msra.mxu1 %v5959_v40  ;;  %v1901_v40 = vld [vmem:[#allocation8 + $0x2260] sm:$0xff] }
 0x473   : > { %5962 = vmatprep.subr.bf16.mxu1 %v5961_v43  ;;  %5984 = vmatpush1.bf16.msra.mxu0 %v5983_v13  ;;  %v1513_v43 = vld [vmem:[#allocation8 + $0x1640] sm:$0xff]  ;;  %v5995_v51 = vpack.c.bf16 %v1979_v45, %v1901_v40  ;;  %v6025_v13 = vpack.c.bf16 %v1982_v8, %v1904_v7  ;;  %v971_v40 = vld [vmem:[#allocation8 + $0x550] sm:$0xff]  ;;  %v1206_v45 = vld [vmem:[#allocation8 + $0xca8] sm:$0xff] }
 0x474   : > { %5986 = vmatprep.subr.bf16.mxu0 %v5985_v18  ;;  %v6015_v50 = vpack.c.bf16 %v1513_v43, %v1435_v42  ;;  %v816_v18 = vld [vmem:[#allocation8 + $0x78] sm:$0xff]  ;;  %v6045_v42 = vpack.c.bf16 %v1516_v35, %v1438_v34  ;;  %v1515_v43 = vld [vmem:[#allocation8 + $0x1650] sm:$0xff]  ;;  %v1906_v7 = vld [vmem:[#allocation8 + $0x2288] sm:$0xff] }
 0x475   : > { %v1984_v8 = vld [vmem:[#allocation8 + $0x24f8] sm:$0xff] }
 0x476   : > { %5964 = vmatpush1.bf16.msra.mxu1 %v5963_v52  ;;  %v813_v52 = vld [vmem:[#allocation8 + $0x60] sm:$0xff] }
 0x477   : > { %5998 = vmatprep.subr.bf16.mxu1 %v5997_v55  ;;  %5988 = vmatpush1.bf16.msra.mxu0 %v5987_v26  ;;  %v1669_v55 = vld [vmem:[#allocation8 + $0x1b20] sm:$0xff]  ;;  %v6031_v63 = vpack.c.bf16 %v891_v57, %v813_v52  ;;  %v6061_v26 = vpack.c.bf16 %v894_v19, %v816_v18  ;;  %v1127_v52 = vld [vmem:[#allocation8 + $0xa30] sm:$0xff]  ;;  %v1362_v57 = vld [vmem:[#allocation8 + $0x1188] sm:$0xff] }
 0x478   : > { %5990 = vmatprep.subr.bf16.mxu0 %v5989_v31  ;;  %v6019_v62 = vpack.c.bf16 %v1669_v55, %v1591_v54  ;;  %v972_v31 = vld [vmem:[#allocation8 + $0x558] sm:$0xff]  ;;  %v6049_v54 = vpack.c.bf16 %v1672_v47, %v1594_v46  ;;  %v1671_v55 = vld [vmem:[#allocation8 + $0x1b30] sm:$0xff]  ;;  %v818_v18 = vld [vmem:[#allocation8 + $0x88] sm:$0xff] }
 0x479   : > { %2737 = vmatmul.mubr.f32.vlgmr.msra.gmra.mrb[2].mxu1 %v7669_v24  ;;  %v896_v19 = vld [vmem:[#allocation8 + $0x2f8] sm:$0xff] }
 0x47a   : > { %6000 = vmatpush1.bf16.msra.mxu1 %v5999_v0  ;;  %2878 = vmatprep.mubr.f32.mxu1 %v7366_v32  ;;  %v969_v0 = vld [vmem:[#allocation8 + $0x540] sm:$0xff] }
 0x47b   : > { %6002 = vmatprep.subr.bf16.mxu1 %v6001_v3  ;;  %5992 = vmatpush1.bf16.msra.mxu0 %v5991_v39  ;;  %v1825_v3 = vld [vmem:[#allocation8 + $0x2000] sm:$0xff]  ;;  %v6035_v5 = vpack.c.bf16 %v1047_v6, %v969_v0  ;;  %v6065_v39 = vpack.c.bf16 %v1050_v33, %v972_v31  ;;  %v1283_v0 = vld [vmem:[#allocation8 + $0xf10] sm:$0xff]  ;;  %v1518_v6 = vld [vmem:[#allocation8 + $0x1668] sm:$0xff] }
 0x47c   : > { %5994 = vmatprep.subr.bf16.mxu0 %v5993_v44  ;;  %v6023_v11 = vpack.c.bf16 %v1825_v3, %v1747_v2  ;;  %v1128_v44 = vld [vmem:[#allocation8 + $0xa38] sm:$0xff]  ;;  %v6053_v2 = vpack.c.bf16 %v1828_v59, %v1750_v58  ;;  %v1827_v3 = vld [vmem:[#allocation8 + $0x2010] sm:$0xff]  ;;  %v974_v31 = vld [vmem:[#allocation8 + $0x568] sm:$0xff] }
 0x47d   : > { %v1052_v33 = vld [vmem:[#allocation8 + $0x7d8] sm:$0xff] }
 0x47e   : > { %6004 = vmatpush1.bf16.msra.mxu1 %v6003_v12  ;;  %v1125_v12 = vld [vmem:[#allocation8 + $0xa20] sm:$0xff] }
 0x47f   : > { %6006 = vmatprep.subr.bf16.mxu1 %v6005_v15  ;;  %5996 = vmatpush1.bf16.msra.mxu0 %v5995_v51  ;;  %v1981_v15 = vld [vmem:[#allocation8 + $0x24e0] sm:$0xff]  ;;  %v6039_v23 = vpack.c.bf16 %v1203_v17, %v1125_v12  ;;  %v6069_v51 = vpack.c.bf16 %v1206_v45, %v1128_v44  ;;  %v1439_v12 = vld [vmem:[#allocation8 + $0x13f0] sm:$0xff]  ;;  %v1674_v17 = vld [vmem:[#allocation8 + $0x1b48] sm:$0xff] }
 0x480   : > { %6030 = vmatprep.subr.bf16.mxu0 %v6029_v56  ;;  %v6027_v22 = vpack.c.bf16 %v1981_v15, %v1903_v14  ;;  %v1284_v56 = vld [vmem:[#allocation8 + $0xf18] sm:$0xff]  ;;  %v6057_v14 = vpack.c.bf16 %v1984_v8, %v1906_v7  ;;  %v1983_v15 = vld [vmem:[#allocation8 + $0x24f0] sm:$0xff]  ;;  %v1130_v44 = vld [vmem:[#allocation8 + $0xa48] sm:$0xff] }
 0x481   : > { %v1208_v45 = vld [vmem:[#allocation8 + $0xcb8] sm:$0xff] }
 0x482   : > { %6008 = vmatpush1.bf16.msra.mxu1 %v6007_v25  ;;  %2808 = vmatmul.mubr.f32.vlgmr.msra.gmra.mrb[4].mxu0 %v7669_v24  ;;  %v1281_v25 = vld [vmem:[#allocation8 + $0xf00] sm:$0xff] }
 0x483   : > { %6010 = vmatprep.subr.bf16.mxu1 %v6009_v28  ;;  %6032 = vmatpush1.bf16.msra.mxu0 %v6031_v63  ;;  %v893_v28 = vld [vmem:[#allocation8 + $0x2e0] sm:$0xff]  ;;  %v6043_v37 = vpack.c.bf16 %v1359_v30, %v1281_v25  ;;  %v6073_v63 = vpack.c.bf16 %v1362_v57, %v1284_v56  ;;  %v1595_v25 = vld [vmem:[#allocation8 + $0x18d0] sm:$0xff]  ;;  %v1830_v30 = vld [vmem:[#allocation8 + $0x2028] sm:$0xff] }
 0x484   : > { %6034 = vmatprep.subr.bf16.mxu0 %v6033_v4  ;;  %2949 = vmatprep.mubr.f32.mxu0 %v7366_v32  ;;  %v6063_v36 = vpack.c.bf16 %v893_v28, %v815_v27  ;;  %v1440_v4 = vld [vmem:[#allocation8 + $0x13f8] sm:$0xff]  ;;  %v6093_v27 = vpack.c.bf16 %v896_v19, %v818_v18  ;;  %v895_v28 = vld [vmem:[#allocation8 + $0x2f0] sm:$0xff]  ;;  %v1286_v56 = vld [vmem:[#allocation8 + $0xf28] sm:$0xff] }
 0x485   : > { %v1364_v57 = vld [vmem:[#allocation8 + $0x1198] sm:$0xff] }
 0x486   : > { %6012 = vmatpush1.bf16.msra.mxu1 %v6011_v38  ;;  %v1437_v38 = vld [vmem:[#allocation8 + $0x13e0] sm:$0xff] }
 0x487   : > { %6014 = vmatprep.subr.bf16.mxu1 %v6013_v41  ;;  %6036 = vmatpush1.bf16.msra.mxu0 %v6035_v5  ;;  %v1049_v41 = vld [vmem:[#allocation8 + $0x7c0] sm:$0xff]  ;;  %v6047_v49 = vpack.c.bf16 %v1515_v43, %v1437_v38  ;;  %v6077_v5 = vpack.c.bf16 %v1518_v6, %v1440_v4  ;;  %v1751_v38 = vld [vmem:[#allocation8 + $0x1db0] sm:$0xff]  ;;  %v1986_v43 = vld [vmem:[#allocation8 + $0x2508] sm:$0xff] }
 0x488   : > { %6038 = vmatprep.subr.bf16.mxu0 %v6037_v16  ;;  %v6067_v48 = vpack.c.bf16 %v1049_v41, %v971_v40  ;;  %v1596_v16 = vld [vmem:[#allocation8 + $0x18d8] sm:$0xff]  ;;  %v6097_v40 = vpack.c.bf16 %v1052_v33, %v974_v31  ;;  %v1051_v41 = vld [vmem:[#allocation8 + $0x7d0] sm:$0xff]  ;;  %v1442_v4 = vld [vmem:[#allocation8 + $0x1408] sm:$0xff] }
 0x489   : > { %v1520_v6 = vld [vmem:[#allocation8 + $0x1678] sm:$0xff] }
 0x48a   : > { %6016 = vmatpush1.bf16.msra.mxu1 %v6015_v50  ;;  %v1593_v50 = vld [vmem:[#allocation8 + $0x18c0] sm:$0xff] }
 0x48b   : > { %6018 = vmatprep.subr.bf16.mxu1 %v6017_v53  ;;  %6040 = vmatpush1.bf16.msra.mxu0 %v6039_v23  ;;  %v1205_v53 = vld [vmem:[#allocation8 + $0xca0] sm:$0xff]  ;;  %v6051_v61 = vpack.c.bf16 %v1671_v55, %v1593_v50  ;;  %v6081_v23 = vpack.c.bf16 %v1674_v17, %v1596_v16  ;;  %v1907_v50 = vld [vmem:[#allocation8 + $0x2290] sm:$0xff]  ;;  %v898_v55 = vld [vmem:[#allocation8 + $0x308] sm:$0xff] }
 0x48c   : > { %6042 = vmatprep.subr.bf16.mxu0 %v6041_v29  ;;  %v6071_v60 = vpack.c.bf16 %v1205_v53, %v1127_v52  ;;  %v1752_v29 = vld [vmem:[#allocation8 + $0x1db8] sm:$0xff]  ;;  %v6101_v52 = vpack.c.bf16 %v1208_v45, %v1130_v44  ;;  %v1207_v53 = vld [vmem:[#allocation8 + $0xcb0] sm:$0xff]  ;;  %v1598_v16 = vld [vmem:[#allocation8 + $0x18e8] sm:$0xff] }
 0x48d   : > { %v1676_v17 = vld [vmem:[#allocation8 + $0x1b58] sm:$0xff] }
 0x48e   : > { %6020 = vmatpush1.bf16.msra.mxu1 %v6019_v62  ;;  %v1749_v62 = vld [vmem:[#allocation8 + $0x1da0] sm:$0xff] }
 0x48f   : > { %6022 = vmatprep.subr.bf16.mxu1 %v6021_v1  ;;  %6044 = vmatpush1.bf16.msra.mxu0 %v6043_v37  ;;  %v1361_v1 = vld [vmem:[#allocation8 + $0x1180] sm:$0xff]  ;;  %v6055_v10 = vpack.c.bf16 %v1827_v3, %v1749_v62  ;;  %v6085_v37 = vpack.c.bf16 %v1830_v30, %v1752_v29  ;;  %v819_v62 = vld [vmem:[#allocation8 + $0x90] sm:$0xff]  ;;  %v1054_v3 = vld [vmem:[#allocation8 + $0x7e8] sm:$0xff] }
 0x490   : > { %6046 = vmatprep.subr.bf16.mxu0 %v6045_v42  ;;  %v6075_v9 = vpack.c.bf16 %v1361_v1, %v1283_v0  ;;  %v1908_v42 = vld [vmem:[#allocation8 + $0x2298] sm:$0xff]  ;;  %v6105_v0 = vpack.c.bf16 %v1364_v57, %v1286_v56  ;;  %v1363_v1 = vld [vmem:[#allocation8 + $0x1190] sm:$0xff]  ;;  %v1754_v29 = vld [vmem:[#allocation8 + $0x1dc8] sm:$0xff] }
 0x491   : > { %v1832_v30 = vld [vmem:[#allocation8 + $0x2038] sm:$0xff] }
 0x492   : > { %6024 = vmatpush1.bf16.msra.mxu1 %v6023_v11  ;;  %v1905_v11 = vld [vmem:[#allocation8 + $0x2280] sm:$0xff] }
 0x493   : > { %6026 = vmatprep.subr.bf16.mxu1 %v6025_v13  ;;  %6048 = vmatpush1.bf16.msra.mxu0 %v6047_v49  ;;  %v1517_v13 = vld [vmem:[#allocation8 + $0x1660] sm:$0xff]  ;;  %v6059_v21 = vpack.c.bf16 %v1983_v15, %v1905_v11  ;;  %v6089_v49 = vpack.c.bf16 %v1986_v43, %v1908_v42  ;;  %v975_v11 = vld [vmem:[#allocation8 + $0x570] sm:$0xff]  ;;  %v1210_v15 = vld [vmem:[#allocation8 + $0xcc8] sm:$0xff] }
 0x494   : > { %6050 = vmatprep.subr.bf16.mxu0 %v6049_v54  ;;  %v6079_v20 = vpack.c.bf16 %v1517_v13, %v1439_v12  ;;  %v820_v54 = vld [vmem:[#allocation8 + $0x98] sm:$0xff]  ;;  %v6109_v12 = vpack.c.bf16 %v1520_v6, %v1442_v4  ;;  %v1519_v13 = vld [vmem:[#allocation8 + $0x1670] sm:$0xff]  ;;  %v1910_v42 = vld [vmem:[#allocation8 + $0x22a8] sm:$0xff] }
 0x495   : > { %v1988_v43 = vld [vmem:[#allocation8 + $0x2518] sm:$0xff] }
 0x496   : > { %6028 = vmatpush1.bf16.msra.mxu1 %v6027_v22  ;;  %v817_v22 = vld [vmem:[#allocation8 + $0x80] sm:$0xff] }
 0x497   : > { %6062 = vmatprep.subr.bf16.mxu1 %v6061_v26  ;;  %6052 = vmatpush1.bf16.msra.mxu0 %v6051_v61  ;;  %v1673_v26 = vld [vmem:[#allocation8 + $0x1b40] sm:$0xff]  ;;  %v6095_v35 = vpack.c.bf16 %v895_v28, %v817_v22  ;;  %v6125_v61 = vpack.c.bf16 %v898_v55, %v820_v54  ;;  %v1131_v22 = vld [vmem:[#allocation8 + $0xa50] sm:$0xff]  ;;  %v1366_v28 = vld [vmem:[#allocation8 + $0x11a8] sm:$0xff] }
 0x498   : > { %6054 = vmatprep.subr.bf16.mxu0 %v6053_v2  ;;  %v6083_v34 = vpack.c.bf16 %v1673_v26, %v1595_v25  ;;  %v976_v2 = vld [vmem:[#allocation8 + $0x578] sm:$0xff]  ;;  %v6113_v25 = vpack.c.bf16 %v1676_v17, %v1598_v16  ;;  %v1675_v26 = vld [vmem:[#allocation8 + $0x1b50] sm:$0xff]  ;;  %v822_v54 = vld [vmem:[#allocation8 + $0xa8] sm:$0xff] }
 0x499   : > { %2879 = vmatmul.mubr.f32.vlgmr.msra.gmra.mrb[4].mxu1 %v7669_v24  ;;  %v900_v55 = vld [vmem:[#allocation8 + $0x318] sm:$0xff] }
 0x49a   : > { %6064 = vmatpush1.bf16.msra.mxu1 %v6063_v36  ;;  %3020 = vmatprep.mubr.f32.mxu1 %v7366_v32  ;;  %v973_v36 = vld [vmem:[#allocation8 + $0x560] sm:$0xff] }
 0x49b   : > { %6066 = vmatprep.subr.bf16.mxu1 %v6065_v39  ;;  %6056 = vmatpush1.bf16.msra.mxu0 %v6055_v10  ;;  %v1829_v39 = vld [vmem:[#allocation8 + $0x2020] sm:$0xff]  ;;  %v6099_v47 = vpack.c.bf16 %v1051_v41, %v973_v36  ;;  %v6129_v10 = vpack.c.bf16 %v1054_v3, %v976_v2  ;;  %v1287_v36 = vld [vmem:[#allocation8 + $0xf30] sm:$0xff]  ;;  %v1522_v41 = vld [vmem:[#allocation8 + $0x1688] sm:$0xff] }
 0x49c   : > { %6058 = vmatprep.subr.bf16.mxu0 %v6057_v14  ;;  %v6087_v46 = vpack.c.bf16 %v1829_v39, %v1751_v38  ;;  %v1132_v14 = vld [vmem:[#allocation8 + $0xa58] sm:$0xff]  ;;  %v6117_v38 = vpack.c.bf16 %v1832_v30, %v1754_v29  ;;  %v1831_v39 = vld [vmem:[#allocation8 + $0x2030] sm:$0xff]  ;;  %v978_v2 = vld [vmem:[#allocation8 + $0x588] sm:$0xff] }
 0x49d   : > { %v1056_v3 = vld [vmem:[#allocation8 + $0x7f8] sm:$0xff] }
 0x49e   : > { %6068 = vmatpush1.bf16.msra.mxu1 %v6067_v48  ;;  %v1129_v48 = vld [vmem:[#allocation8 + $0xa40] sm:$0xff] }
 0x49f   : > { %6070 = vmatprep.subr.bf16.mxu1 %v6069_v51  ;;  %6060 = vmatpush1.bf16.msra.mxu0 %v6059_v21  ;;  %v1985_v51 = vld [vmem:[#allocation8 + $0x2500] sm:$0xff]  ;;  %v6103_v59 = vpack.c.bf16 %v1207_v53, %v1129_v48  ;;  %v6133_v21 = vpack.c.bf16 %v1210_v15, %v1132_v14  ;;  %v1443_v48 = vld [vmem:[#allocation8 + $0x1410] sm:$0xff]  ;;  %v1678_v53 = vld [vmem:[#allocation8 + $0x1b68] sm:$0xff] }
 0x4a0   : > { %6094 = vmatprep.subr.bf16.mxu0 %v6093_v27  ;;  %v6091_v58 = vpack.c.bf16 %v1985_v51, %v1907_v50  ;;  %v1288_v27 = vld [vmem:[#allocation8 + $0xf38] sm:$0xff]  ;;  %v6121_v50 = vpack.c.bf16 %v1988_v43, %v1910_v42  ;;  %v1987_v51 = vld [vmem:[#allocation8 + $0x2510] sm:$0xff]  ;;  %v1134_v14 = vld [vmem:[#allocation8 + $0xa68] sm:$0xff] }
 0x4a1   : > { %v1212_v15 = vld [vmem:[#allocation8 + $0xcd8] sm:$0xff] }
 0x4a2   : > { %6072 = vmatpush1.bf16.msra.mxu1 %v6071_v60  ;;  %2950 = vmatmul.mubr.f32.vlgmr.msra.gmra.mrb[6].mxu0 %v7669_v24  ;;  %v1285_v60 = vld [vmem:[#allocation8 + $0xf20] sm:$0xff] }
 0x4a3   : > { %6074 = vmatprep.subr.bf16.mxu1 %v6073_v63  ;;  %6096 = vmatpush1.bf16.msra.mxu0 %v6095_v35  ;;  %v897_v63 = vld [vmem:[#allocation8 + $0x300] sm:$0xff]  ;;  %v6107_v8 = vpack.c.bf16 %v1363_v1, %v1285_v60  ;;  %v6137_v35 = vpack.c.bf16 %v1366_v28, %v1288_v27  ;;  %v1599_v60 = vld [vmem:[#allocation8 + $0x18f0] sm:$0xff]  ;;  %v1834_v1 = vld [vmem:[#allocation8 + $0x2048] sm:$0xff] }
 0x4a4   : > { %6098 = vmatprep.subr.bf16.mxu0 %v6097_v40  ;;  %3091 = vmatprep.mubr.f32.mxu0 %v7366_v32  ;;  %v6127_v7 = vpack.c.bf16 %v897_v63, %v819_v62  ;;  %v1444_v40 = vld [vmem:[#allocation8 + $0x1418] sm:$0xff]  ;;  %v6157_v62 = vpack.c.bf16 %v900_v55, %v822_v54  ;;  %v899_v63 = vld [vmem:[#allocation8 + $0x310] sm:$0xff]  ;;  %v1290_v27 = vld [vmem:[#allocation8 + $0xf48] sm:$0xff] }
 0x4a5   : > { %v1368_v28 = vld [vmem:[#allocation8 + $0x11b8] sm:$0xff] }
 0x4a6   : > { %6076 = vmatpush1.bf16.msra.mxu1 %v6075_v9  ;;  %v1441_v9 = vld [vmem:[#allocation8 + $0x1400] sm:$0xff] }
 0x4a7   : > { %6078 = vmatprep.subr.bf16.mxu1 %v6077_v5  ;;  %6100 = vmatpush1.bf16.msra.mxu0 %v6099_v47  ;;  %v1053_v5 = vld [vmem:[#allocation8 + $0x7e0] sm:$0xff]  ;;  %v6111_v19 = vpack.c.bf16 %v1519_v13, %v1441_v9  ;;  %v6141_v47 = vpack.c.bf16 %v1522_v41, %v1444_v40  ;;  %v1755_v9 = vld [vmem:[#allocation8 + $0x1dd0] sm:$0xff]  ;;  %v1990_v13 = vld [vmem:[#allocation8 + $0x2528] sm:$0xff] }
 0x4a8   : > { %6102 = vmatprep.subr.bf16.mxu0 %v6101_v52  ;;  %v6131_v18 = vpack.c.bf16 %v1053_v5, %v975_v11  ;;  %v1600_v52 = vld [vmem:[#allocation8 + $0x18f8] sm:$0xff]  ;;  %v6161_v11 = vpack.c.bf16 %v1056_v3, %v978_v2  ;;  %v1055_v5 = vld [vmem:[#allocation8 + $0x7f0] sm:$0xff]  ;;  %v1446_v40 = vld [vmem:[#allocation8 + $0x1428] sm:$0xff] }
 0x4a9   : > { %v1524_v41 = vld [vmem:[#allocation8 + $0x1698] sm:$0xff] }
 0x4aa   : > { %6080 = vmatpush1.bf16.msra.mxu1 %v6079_v20  ;;  %v1597_v20 = vld [vmem:[#allocation8 + $0x18e0] sm:$0xff] }
 0x4ab   : > { %6082 = vmatprep.subr.bf16.mxu1 %v6081_v23  ;;  %6104 = vmatpush1.bf16.msra.mxu0 %v6103_v59  ;;  %v1209_v23 = vld [vmem:[#allocation8 + $0xcc0] sm:$0xff]  ;;  %v6115_v33 = vpack.c.bf16 %v1675_v26, %v1597_v20  ;;  %v6145_v59 = vpack.c.bf16 %v1678_v53, %v1600_v52  ;;  %v1911_v20 = vld [vmem:[#allocation8 + $0x22b0] sm:$0xff]  ;;  %v902_v26 = vld [vmem:[#allocation8 + $0x328] sm:$0xff] }
 0x4ac   : > { %6106 = vmatprep.subr.bf16.mxu0 %v6105_v0  ;;  %v6135_v31 = vpack.c.bf16 %v1209_v23, %v1131_v22  ;;  %v1756_v0 = vld [vmem:[#allocation8 + $0x1dd8] sm:$0xff]  ;;  %v6165_v22 = vpack.c.bf16 %v1212_v15, %v1134_v14  ;;  %v1211_v23 = vld [vmem:[#allocation8 + $0xcd0] sm:$0xff]  ;;  %v1602_v52 = vld [vmem:[#allocation8 + $0x1908] sm:$0xff] }
 0x4ad   : > { %v1680_v53 = vld [vmem:[#allocation8 + $0x1b78] sm:$0xff] }
 0x4ae   : > { %6084 = vmatpush1.bf16.msra.mxu1 %v6083_v34  ;;  %v1753_v34 = vld [vmem:[#allocation8 + $0x1dc0] sm:$0xff] }
 0x4af   : > { %6086 = vmatprep.subr.bf16.mxu1 %v6085_v37  ;;  %6108 = vmatpush1.bf16.msra.mxu0 %v6107_v8  ;;  %v1365_v37 = vld [vmem:[#allocation8 + $0x11a0] sm:$0xff]  ;;  %v6119_v45 = vpack.c.bf16 %v1831_v39, %v1753_v34  ;;  %v6149_v8 = vpack.c.bf16 %v1834_v1, %v1756_v0  ;;  %v823_v34 = vld [vmem:[#allocation8 + $0xb0] sm:$0xff]  ;;  %v1058_v39 = vld [vmem:[#allocation8 + $0x808] sm:$0xff] }
 0x4b0   : > { %6110 = vmatprep.subr.bf16.mxu0 %v6109_v12  ;;  %v6139_v44 = vpack.c.bf16 %v1365_v37, %v1287_v36  ;;  %v1912_v12 = vld [vmem:[#allocation8 + $0x22b8] sm:$0xff]  ;;  %v6169_v36 = vpack.c.bf16 %v1368_v28, %v1290_v27  ;;  %v1367_v37 = vld [vmem:[#allocation8 + $0x11b0] sm:$0xff]  ;;  %v1758_v0 = vld [vmem:[#allocation8 + $0x1de8] sm:$0xff] }
 0x4b1   : > { %v1836_v1 = vld [vmem:[#allocation8 + $0x2058] sm:$0xff] }
 0x4b2   : > { %6088 = vmatpush1.bf16.msra.mxu1 %v6087_v46  ;;  %v1909_v46 = vld [vmem:[#allocation8 + $0x22a0] sm:$0xff] }
 0x4b3   : > { %6090 = vmatprep.subr.bf16.mxu1 %v6089_v49  ;;  %6112 = vmatpush1.bf16.msra.mxu0 %v6111_v19  ;;  %v1521_v49 = vld [vmem:[#allocation8 + $0x1680] sm:$0xff]  ;;  %v6123_v57 = vpack.c.bf16 %v1987_v51, %v1909_v46  ;;  %v6153_v19 = vpack.c.bf16 %v1990_v13, %v1912_v12  ;;  %v979_v46 = vld [vmem:[#allocation8 + $0x590] sm:$0xff]  ;;  %v1214_v51 = vld [vmem:[#allocation8 + $0xce8] sm:$0xff] }
 0x4b4   : > { %6114 = vmatprep.subr.bf16.mxu0 %v6113_v25  ;;  %v6143_v56 = vpack.c.bf16 %v1521_v49, %v1443_v48  ;;  %v824_v25 = vld [vmem:[#allocation8 + $0xb8] sm:$0xff]  ;;  %v6173_v48 = vpack.c.bf16 %v1524_v41, %v1446_v40  ;;  %v1523_v49 = vld [vmem:[#allocation8 + $0x1690] sm:$0xff]  ;;  %v1914_v12 = vld [vmem:[#allocation8 + $0x22c8] sm:$0xff] }
 0x4b5   : > { %v1992_v13 = vld [vmem:[#allocation8 + $0x2538] sm:$0xff] }
 0x4b6   : > { %6092 = vmatpush1.bf16.msra.mxu1 %v6091_v58  ;;  %v821_v58 = vld [vmem:[#allocation8 + $0xa0] sm:$0xff] }
 0x4b7   : > { %6126 = vmatprep.subr.bf16.mxu1 %v6125_v61  ;;  %6116 = vmatpush1.bf16.msra.mxu0 %v6115_v33  ;;  %v1677_v61 = vld [vmem:[#allocation8 + $0x1b60] sm:$0xff]  ;;  %v6159_v6 = vpack.c.bf16 %v899_v63, %v821_v58  ;;  %v6189_v33 = vpack.c.bf16 %v902_v26, %v824_v25  ;;  %v1135_v58 = vld [vmem:[#allocation8 + $0xa70] sm:$0xff]  ;;  %v1370_v63 = vld [vmem:[#allocation8 + $0x11c8] sm:$0xff] }
 0x4b8   : > { %6118 = vmatprep.subr.bf16.mxu0 %v6117_v38  ;;  %v6147_v4 = vpack.c.bf16 %v1677_v61, %v1599_v60  ;;  %v980_v38 = vld [vmem:[#allocation8 + $0x598] sm:$0xff]  ;;  %v6177_v60 = vpack.c.bf16 %v1680_v53, %v1602_v52  ;;  %v1679_v61 = vld [vmem:[#allocation8 + $0x1b70] sm:$0xff]  ;;  %v826_v25 = vld [vmem:[#allocation8 + $0xc8] sm:$0xff] }
 0x4b9   : > { %3021 = vmatmul.mubr.f32.vlgmr.msra.gmra.mrb[6].mxu1 %v7669_v24  ;;  %v904_v26 = vld [vmem:[#allocation8 + $0x338] sm:$0xff] }
 0x4ba   : > { %6128 = vmatpush1.bf16.msra.mxu1 %v6127_v7  ;;  %3162 = vmatprep.mubr.f32.mxu1 %v7366_v32  ;;  %v977_v7 = vld [vmem:[#allocation8 + $0x580] sm:$0xff] }
 0x4bb   : > { %6130 = vmatprep.subr.bf16.mxu1 %v6129_v10  ;;  %6120 = vmatpush1.bf16.msra.mxu0 %v6119_v45  ;;  %v1833_v10 = vld [vmem:[#allocation8 + $0x2040] sm:$0xff]  ;;  %v6163_v17 = vpack.c.bf16 %v1055_v5, %v977_v7  ;;  %v6193_v45 = vpack.c.bf16 %v1058_v39, %v980_v38  ;;  %v1291_v7 = vld [vmem:[#allocation8 + $0xf50] sm:$0xff]  ;;  %v1526_v5 = vld [vmem:[#allocation8 + $0x16a8] sm:$0xff] }
 0x4bc   : > { %6122 = vmatprep.subr.bf16.mxu0 %v6121_v50  ;;  %v6151_v16 = vpack.c.bf16 %v1833_v10, %v1755_v9  ;;  %v1136_v50 = vld [vmem:[#allocation8 + $0xa78] sm:$0xff]  ;;  %v6181_v9 = vpack.c.bf16 %v1836_v1, %v1758_v0  ;;  %v1835_v10 = vld [vmem:[#allocation8 + $0x2050] sm:$0xff]  ;;  %v982_v38 = vld [vmem:[#allocation8 + $0x5a8] sm:$0xff] }
 0x4bd   : > { %v1060_v39 = vld [vmem:[#allocation8 + $0x818] sm:$0xff] }
 0x4be   : > { %6132 = vmatpush1.bf16.msra.mxu1 %v6131_v18  ;;  %v1133_v18 = vld [vmem:[#allocation8 + $0xa60] sm:$0xff] }
 0x4bf   : > { %6134 = vmatprep.subr.bf16.mxu1 %v6133_v21  ;;  %6124 = vmatpush1.bf16.msra.mxu0 %v6123_v57  ;;  %v1989_v21 = vld [vmem:[#allocation8 + $0x2520] sm:$0xff]  ;;  %v6167_v30 = vpack.c.bf16 %v1211_v23, %v1133_v18  ;;  %v6197_v57 = vpack.c.bf16 %v1214_v51, %v1136_v50  ;;  %v1447_v18 = vld [vmem:[#allocation8 + $0x1430] sm:$0xff]  ;;  %v1682_v23 = vld [vmem:[#allocation8 + $0x1b88] sm:$0xff] }
 0x4c0   : > { %6158 = vmatprep.subr.bf16.mxu0 %v6157_v62  ;;  %v6155_v29 = vpack.c.bf16 %v1989_v21, %v1911_v20  ;;  %v1292_v62 = vld [vmem:[#allocation8 + $0xf58] sm:$0xff]  ;;  %v6185_v20 = vpack.c.bf16 %v1992_v13, %v1914_v12  ;;  %v1991_v21 = vld [vmem:[#allocation8 + $0x2530] sm:$0xff]  ;;  %v1138_v50 = vld [vmem:[#allocation8 + $0xa88] sm:$0xff] }
 0x4c1   : > { %v1216_v51 = vld [vmem:[#allocation8 + $0xcf8] sm:$0xff] }
 0x4c2   : > { %6136 = vmatpush1.bf16.msra.mxu1 %v6135_v31  ;;  %3092 = vmatmul.mubr.f32.vlgmr.msra.gmra.mrb[8].mxu0 %v7669_v24  ;;  %v1289_v31 = vld [vmem:[#allocation8 + $0xf40] sm:$0xff] }
 0x4c3   : > { %6138 = vmatprep.subr.bf16.mxu1 %v6137_v35  ;;  %6160 = vmatpush1.bf16.msra.mxu0 %v6159_v6  ;;  %v901_v35 = vld [vmem:[#allocation8 + $0x320] sm:$0xff]  ;;  %v6171_v43 = vpack.c.bf16 %v1367_v37, %v1289_v31  ;;  %v6201_v6 = vpack.c.bf16 %v1370_v63, %v1292_v62  ;;  %v1603_v31 = vld [vmem:[#allocation8 + $0x1910] sm:$0xff]  ;;  %v1838_v37 = vld [vmem:[#allocation8 + $0x2068] sm:$0xff] }
 0x4c4   : > { %6162 = vmatprep.subr.bf16.mxu0 %v6161_v11  ;;  %3233 = vmatprep.mubr.f32.mxu0 %v7366_v32  ;;  %v6191_v42 = vpack.c.bf16 %v901_v35, %v823_v34  ;;  %v1448_v11 = vld [vmem:[#allocation8 + $0x1438] sm:$0xff]  ;;  %v6221_v34 = vpack.c.bf16 %v904_v26, %v826_v25  ;;  %v903_v35 = vld [vmem:[#allocation8 + $0x330] sm:$0xff]  ;;  %v1294_v62 = vld [vmem:[#allocation8 + $0xf68] sm:$0xff] }
 0x4c5   : > { %v1372_v63 = vld [vmem:[#allocation8 + $0x11d8] sm:$0xff] }
 0x4c6   : > { %6140 = vmatpush1.bf16.msra.mxu1 %v6139_v44  ;;  %v1445_v44 = vld [vmem:[#allocation8 + $0x1420] sm:$0xff] }
 0x4c7   : > { %6142 = vmatprep.subr.bf16.mxu1 %v6141_v47  ;;  %6164 = vmatpush1.bf16.msra.mxu0 %v6163_v17  ;;  %v1057_v47 = vld [vmem:[#allocation8 + $0x800] sm:$0xff]  ;;  %v6175_v55 = vpack.c.bf16 %v1523_v49, %v1445_v44  ;;  %v6205_v17 = vpack.c.bf16 %v1526_v5, %v1448_v11  ;;  %v1759_v44 = vld [vmem:[#allocation8 + $0x1df0] sm:$0xff]  ;;  %v1994_v49 = vld [vmem:[#allocation8 + $0x2548] sm:$0xff] }
 0x4c8   : > { %6166 = vmatprep.subr.bf16.mxu0 %v6165_v22  ;;  %v6195_v54 = vpack.c.bf16 %v1057_v47, %v979_v46  ;;  %v1604_v22 = vld [vmem:[#allocation8 + $0x1918] sm:$0xff]  ;;  %v6225_v46 = vpack.c.bf16 %v1060_v39, %v982_v38  ;;  %v1059_v47 = vld [vmem:[#allocation8 + $0x810] sm:$0xff]  ;;  %v1450_v11 = vld [vmem:[#allocation8 + $0x1448] sm:$0xff] }
 0x4c9   : > { %v1528_v5 = vld [vmem:[#allocation8 + $0x16b8] sm:$0xff] }
 0x4ca   : > { %6144 = vmatpush1.bf16.msra.mxu1 %v6143_v56  ;;  %v1601_v56 = vld [vmem:[#allocation8 + $0x1900] sm:$0xff] }
 0x4cb   : > { %6146 = vmatprep.subr.bf16.mxu1 %v6145_v59  ;;  %6168 = vmatpush1.bf16.msra.mxu0 %v6167_v30  ;;  %v1213_v59 = vld [vmem:[#allocation8 + $0xce0] sm:$0xff]  ;;  %v6179_v3 = vpack.c.bf16 %v1679_v61, %v1601_v56  ;;  %v6209_v30 = vpack.c.bf16 %v1682_v23, %v1604_v22  ;;  %v1915_v56 = vld [vmem:[#allocation8 + $0x22d0] sm:$0xff]  ;;  %v906_v61 = vld [vmem:[#allocation8 + $0x348] sm:$0xff] }
 0x4cc   : > { %6170 = vmatprep.subr.bf16.mxu0 %v6169_v36  ;;  %v6199_v2 = vpack.c.bf16 %v1213_v59, %v1135_v58  ;;  %v1760_v36 = vld [vmem:[#allocation8 + $0x1df8] sm:$0xff]  ;;  %v6229_v58 = vpack.c.bf16 %v1216_v51, %v1138_v50  ;;  %v1215_v59 = vld [vmem:[#allocation8 + $0xcf0] sm:$0xff]  ;;  %v1606_v22 = vld [vmem:[#allocation8 + $0x1928] sm:$0xff] }
 0x4cd   : > { %v1684_v23 = vld [vmem:[#allocation8 + $0x1b98] sm:$0xff] }
 0x4ce   : > { %6148 = vmatpush1.bf16.msra.mxu1 %v6147_v4  ;;  %v1757_v4 = vld [vmem:[#allocation8 + $0x1de0] sm:$0xff] }
 0x4cf   : > { %6150 = vmatprep.subr.bf16.mxu1 %v6149_v8  ;;  %6172 = vmatpush1.bf16.msra.mxu0 %v6171_v43  ;;  %v1369_v8 = vld [vmem:[#allocation8 + $0x11c0] sm:$0xff]  ;;  %v6183_v15 = vpack.c.bf16 %v1835_v10, %v1757_v4  ;;  %v6213_v43 = vpack.c.bf16 %v1838_v37, %v1760_v36  ;;  %v827_v4 = vld [vmem:[#allocation8 + $0xd0] sm:$0xff]  ;;  %v1062_v10 = vld [vmem:[#allocation8 + $0x828] sm:$0xff] }
 0x4d0   : > { %6174 = vmatprep.subr.bf16.mxu0 %v6173_v48  ;;  %v6203_v14 = vpack.c.bf16 %v1369_v8, %v1291_v7  ;;  %v1916_v48 = vld [vmem:[#allocation8 + $0x22d8] sm:$0xff]  ;;  %v6233_v7 = vpack.c.bf16 %v1372_v63, %v1294_v62  ;;  %v1371_v8 = vld [vmem:[#allocation8 + $0x11d0] sm:$0xff]  ;;  %v1762_v36 = vld [vmem:[#allocation8 + $0x1e08] sm:$0xff] }
 0x4d1   : > { %v1840_v37 = vld [vmem:[#allocation8 + $0x2078] sm:$0xff] }
 0x4d2   : > { %6152 = vmatpush1.bf16.msra.mxu1 %v6151_v16  ;;  %v1913_v16 = vld [vmem:[#allocation8 + $0x22c0] sm:$0xff] }
 0x4d3   : > { %6154 = vmatprep.subr.bf16.mxu1 %v6153_v19  ;;  %6176 = vmatpush1.bf16.msra.mxu0 %v6175_v55  ;;  %v1525_v19 = vld [vmem:[#allocation8 + $0x16a0] sm:$0xff]  ;;  %v6187_v28 = vpack.c.bf16 %v1991_v21, %v1913_v16  ;;  %v6217_v55 = vpack.c.bf16 %v1994_v49, %v1916_v48  ;;  %v983_v16 = vld [vmem:[#allocation8 + $0x5b0] sm:$0xff]  ;;  %v1218_v21 = vld [vmem:[#allocation8 + $0xd08] sm:$0xff] }
 0x4d4   : > { %6178 = vmatprep.subr.bf16.mxu0 %v6177_v60  ;;  %v6207_v27 = vpack.c.bf16 %v1525_v19, %v1447_v18  ;;  %v828_v60 = vld [vmem:[#allocation8 + $0xd8] sm:$0xff]  ;;  %v6237_v18 = vpack.c.bf16 %v1528_v5, %v1450_v11  ;;  %v1527_v19 = vld [vmem:[#allocation8 + $0x16b0] sm:$0xff]  ;;  %v1918_v48 = vld [vmem:[#allocation8 + $0x22e8] sm:$0xff] }
 0x4d5   : > { %v1996_v49 = vld [vmem:[#allocation8 + $0x2558] sm:$0xff] }
 0x4d6   : > { %6156 = vmatpush1.bf16.msra.mxu1 %v6155_v29  ;;  %v825_v29 = vld [vmem:[#allocation8 + $0xc0] sm:$0xff] }
 0x4d7   : > { %6190 = vmatprep.subr.bf16.mxu1 %v6189_v33  ;;  %6180 = vmatpush1.bf16.msra.mxu0 %v6179_v3  ;;  %v1681_v33 = vld [vmem:[#allocation8 + $0x1b80] sm:$0xff]  ;;  %v6223_v41 = vpack.c.bf16 %v903_v35, %v825_v29  ;;  %v6253_v3 = vpack.c.bf16 %v906_v61, %v828_v60  ;;  %v1139_v29 = vld [vmem:[#allocation8 + $0xa90] sm:$0xff]  ;;  %v1374_v35 = vld [vmem:[#allocation8 + $0x11e8] sm:$0xff] }
 0x4d8   : > { %6182 = vmatprep.subr.bf16.mxu0 %v6181_v9  ;;  %v6211_v40 = vpack.c.bf16 %v1681_v33, %v1603_v31  ;;  %v984_v9 = vld [vmem:[#allocation8 + $0x5b8] sm:$0xff]  ;;  %v6241_v31 = vpack.c.bf16 %v1684_v23, %v1606_v22  ;;  %v1683_v33 = vld [vmem:[#allocation8 + $0x1b90] sm:$0xff]  ;;  %v830_v60 = vld [vmem:[#allocation8 + $0xe8] sm:$0xff] }
 0x4d9   : > { %3163 = vmatmul.mubr.f32.vlgmr.msra.gmra.mrb[8].mxu1 %v7669_v24  ;;  %v908_v61 = vld [vmem:[#allocation8 + $0x358] sm:$0xff] }
 0x4da   : > { %6192 = vmatpush1.bf16.msra.mxu1 %v6191_v42  ;;  %3304 = vmatprep.mubr.f32.mxu1 %v7366_v32  ;;  %v981_v42 = vld [vmem:[#allocation8 + $0x5a0] sm:$0xff] }
 0x4db   : > { %6194 = vmatprep.subr.bf16.mxu1 %v6193_v45  ;;  %6184 = vmatpush1.bf16.msra.mxu0 %v6183_v15  ;;  %v1837_v45 = vld [vmem:[#allocation8 + $0x2060] sm:$0xff]  ;;  %v6227_v53 = vpack.c.bf16 %v1059_v47, %v981_v42  ;;  %v6257_v15 = vpack.c.bf16 %v1062_v10, %v984_v9  ;;  %v1295_v42 = vld [vmem:[#allocation8 + $0xf70] sm:$0xff]  ;;  %v1530_v47 = vld [vmem:[#allocation8 + $0x16c8] sm:$0xff] }
 0x4dc   : > { %6186 = vmatprep.subr.bf16.mxu0 %v6185_v20  ;;  %v6215_v52 = vpack.c.bf16 %v1837_v45, %v1759_v44  ;;  %v1140_v20 = vld [vmem:[#allocation8 + $0xa98] sm:$0xff]  ;;  %v6245_v44 = vpack.c.bf16 %v1840_v37, %v1762_v36  ;;  %v1839_v45 = vld [vmem:[#allocation8 + $0x2070] sm:$0xff]  ;;  %v986_v9 = vld [vmem:[#allocation8 + $0x5c8] sm:$0xff]  ;;  %v2069_v36 = vlaneseq }
 0x4dd   : > { %v1064_v10 = vld [vmem:[#allocation8 + $0x838] sm:$0xff] }
 0x4de   : > { %6196 = vmatpush1.bf16.msra.mxu1 %v6195_v54  ;;  %v1137_v54 = vld [vmem:[#allocation8 + $0xa80] sm:$0xff] }
 0x4df   : > { %6198 = vmatprep.subr.bf16.mxu1 %v6197_v57  ;;  %6188 = vmatpush1.bf16.msra.mxu0 %v6187_v28  ;;  %v1993_v57 = vld [vmem:[#allocation8 + $0x2540] sm:$0xff]  ;;  %v6231_v1 = vpack.c.bf16 %v1215_v59, %v1137_v54  ;;  %v6261_v28 = vpack.c.bf16 %v1218_v21, %v1140_v20  ;;  %v1451_v54 = vld [vmem:[#allocation8 + $0x1450] sm:$0xff]  ;;  %v1686_v59 = vld [vmem:[#allocation8 + $0x1ba8] sm:$0xff] }
 0x4e0   : > { %6222 = vmatprep.subr.bf16.mxu0 %v6221_v34  ;;  %v6219_v0 = vpack.c.bf16 %v1993_v57, %v1915_v56  ;;  %v1296_v34 = vld [vmem:[#allocation8 + $0xf78] sm:$0xff]  ;;  %v6249_v56 = vpack.c.bf16 %v1996_v49, %v1918_v48  ;;  %v1995_v57 = vld [vmem:[#allocation8 + $0x2550] sm:$0xff]  ;;  %v1142_v20 = vld [vmem:[#allocation8 + $0xaa8] sm:$0xff]  ;;  %v7701_v49 = vshrl.u32 %v2069_v36, 7 }
 0x4e1   : > { %v1220_v21 = vld [vmem:[#allocation8 + $0xd18] sm:$0xff] }
 0x4e2   : > { %6200 = vmatpush1.bf16.msra.mxu1 %v6199_v2  ;;  %3234 = vmatmul.mubr.f32.vlgmr.msra.gmra.mrb[10].mxu0 %v7669_v24  ;;  %v1293_v2 = vld [vmem:[#allocation8 + $0xf60] sm:$0xff]  ;;  %v1532_v48 = vld [vmem:[#allocation8 + $0x16d8] sm:$0xff] }
 0x4e3   : > { %6202 = vmatprep.subr.bf16.mxu1 %v6201_v6  ;;  %6224 = vmatpush1.bf16.msra.mxu0 %v6223_v41  ;;  %v905_v6 = vld [vmem:[#allocation8 + $0x340] sm:$0xff]  ;;  %v6235_v13 = vpack.c.bf16 %v1371_v8, %v1293_v2  ;;  %v6265_v41 = vpack.c.bf16 %v1374_v35, %v1296_v34  ;;  %v1607_v2 = vld [vmem:[#allocation8 + $0x1930] sm:$0xff]  ;;  %v1842_v8 = vld [vmem:[#allocation8 + $0x2088] sm:$0xff] }
 0x4e4   : > { %6226 = vmatprep.subr.bf16.mxu0 %v6225_v46  ;;  %3375 = vmatprep.mubr.f32.mxu0 %v7366_v32  ;;  %v6255_v12 = vpack.c.bf16 %v905_v6, %v827_v4  ;;  %v1452_v46 = vld [vmem:[#allocation8 + $0x1458] sm:$0xff]  ;;  %v6285_v4 = vpack.c.bf16 %v908_v61, %v830_v60  ;;  %v907_v6 = vld [vmem:[#allocation8 + $0x350] sm:$0xff]  ;;  %v1298_v34 = vld [vmem:[#allocation8 + $0xf88] sm:$0xff] }
 0x4e5   : > { %v1376_v35 = vld [vmem:[#allocation8 + $0x11f8] sm:$0xff]  ;;  %v1610_v60 = vld [vmem:[#allocation8 + $0x1948] sm:$0xff] }
 0x4e6   : > { %6204 = vmatpush1.bf16.msra.mxu1 %v6203_v14  ;;  %v1449_v14 = vld [vmem:[#allocation8 + $0x1440] sm:$0xff]  ;;  %v1688_v61 = vld [vmem:[#allocation8 + $0x1bb8] sm:$0xff] }
 0x4e7   : > { %6206 = vmatprep.subr.bf16.mxu1 %v6205_v17  ;;  %6228 = vmatpush1.bf16.msra.mxu0 %v6227_v53  ;;  %v1061_v17 = vld [vmem:[#allocation8 + $0x820] sm:$0xff]  ;;  %v6239_v26 = vpack.c.bf16 %v1527_v19, %v1449_v14  ;;  %v6269_v53 = vpack.c.bf16 %v1530_v47, %v1452_v46  ;;  %v1763_v14 = vld [vmem:[#allocation8 + $0x1e10] sm:$0xff]  ;;  %v1998_v19 = vld [vmem:[#allocation8 + $0x2568] sm:$0xff] }
 0x4e8   : > { %6230 = vmatprep.subr.bf16.mxu0 %v6229_v58  ;;  %v6259_v25 = vpack.c.bf16 %v1061_v17, %v983_v16  ;;  %v1608_v58 = vld [vmem:[#allocation8 + $0x1938] sm:$0xff]  ;;  %v6289_v16 = vpack.c.bf16 %v1064_v10, %v986_v9  ;;  %v1063_v17 = vld [vmem:[#allocation8 + $0x830] sm:$0xff]  ;;  %v1066_v46 = vld [vmem:[#allocation8 + $0x848] sm:$0xff] }
 0x4e9   : > { %v1454_v47 = vld [vmem:[#allocation8 + $0x1468] sm:$0xff]  ;;  %v1687_v9 = vld [vmem:[#allocation8 + $0x1bb0] sm:$0xff]  ;;  %v1300_v10 = vld [vmem:[#allocation8 + $0xf98] sm:$0xff] }
 0x4ea   : > { %6208 = vmatpush1.bf16.msra.mxu1 %v6207_v27  ;;  %v1605_v27 = vld [vmem:[#allocation8 + $0x1920] sm:$0xff] }
 0x4eb   : > { %6210 = vmatprep.subr.bf16.mxu1 %v6209_v30  ;;  %6232 = vmatpush1.bf16.msra.mxu0 %v6231_v1  ;;  %v1217_v30 = vld [vmem:[#allocation8 + $0xd00] sm:$0xff]  ;;  %v6243_v39 = vpack.c.bf16 %v1683_v33, %v1605_v27  ;;  %v6273_v1 = vpack.c.bf16 %v1686_v59, %v1608_v58  ;;  %v1919_v27 = vld [vmem:[#allocation8 + $0x22f0] sm:$0xff]  ;;  %v910_v33 = vld [vmem:[#allocation8 + $0x368] sm:$0xff] }
 0x4ec   : > { %6234 = vmatprep.subr.bf16.mxu0 %v6233_v7  ;;  %v6263_v38 = vpack.c.bf16 %v1217_v30, %v1139_v29  ;;  %v1764_v7 = vld [vmem:[#allocation8 + $0x1e18] sm:$0xff]  ;;  %v6293_v29 = vpack.c.bf16 %v1220_v21, %v1142_v20  ;;  %v1219_v30 = vld [vmem:[#allocation8 + $0xd10] sm:$0xff]  ;;  %v1222_v59 = vld [vmem:[#allocation8 + $0xd28] sm:$0xff] }
 0x4ed   : > { %v1144_v58 = vld [vmem:[#allocation8 + $0xab8] sm:$0xff]  ;;  %v1377_v20 = vld [vmem:[#allocation8 + $0x1200] sm:$0xff] }
 0x4ee   : > { %6212 = vmatpush1.bf16.msra.mxu1 %v6211_v40  ;;  %v1761_v40 = vld [vmem:[#allocation8 + $0x1e00] sm:$0xff] }
 0x4ef   : > { %6214 = vmatprep.subr.bf16.mxu1 %v6213_v43  ;;  %6236 = vmatpush1.bf16.msra.mxu0 %v6235_v13  ;;  %v1373_v43 = vld [vmem:[#allocation8 + $0x11e0] sm:$0xff]  ;;  %v6247_v51 = vpack.c.bf16 %v1839_v45, %v1761_v40  ;;  %v6277_v13 = vpack.c.bf16 %v1842_v8, %v1764_v7  ;;  %v988_v45 = vld [vmem:[#allocation8 + $0x5d8] sm:$0xff]  ;;  %v6305_v8 = vpack.c.bf16 %v1688_v61, %v1610_v60 }
 0x4f0   : > { %6238 = vmatprep.subr.bf16.mxu0 %v6237_v18  ;;  %v6267_v50 = vpack.c.bf16 %v1373_v43, %v1295_v42  ;;  %v1920_v18 = vld [vmem:[#allocation8 + $0x22f8] sm:$0xff]  ;;  %v909_v42 = vld [vmem:[#allocation8 + $0x360] sm:$0xff]  ;;  %v6297_v43 = vpack.c.bf16 %v1376_v35, %v1298_v34 }
 0x4f1   : > { %v1221_v7 = vld [vmem:[#allocation8 + $0xd20] sm:$0xff] }
 0x4f2   : > { %6216 = vmatpush1.bf16.msra.mxu1 %v6215_v52  ;;  %v1917_v52 = vld [vmem:[#allocation8 + $0x22e0] sm:$0xff] }
 0x4f3   : > { %6218 = vmatprep.subr.bf16.mxu1 %v6217_v55  ;;  %6240 = vmatpush1.bf16.msra.mxu0 %v6239_v26  ;;  %v1529_v55 = vld [vmem:[#allocation8 + $0x16c0] sm:$0xff]  ;;  %v6251_v63 = vpack.c.bf16 %v1995_v57, %v1917_v52  ;;  %v6281_v26 = vpack.c.bf16 %v1998_v19, %v1920_v18  ;;  %v1531_v57 = vld [vmem:[#allocation8 + $0x16d0] sm:$0xff] }
 0x4f4   : > { %6242 = vmatprep.subr.bf16.mxu0 %v6241_v31  ;;  %v6271_v62 = vpack.c.bf16 %v1529_v55, %v1451_v54  ;;  %v832_v31 = vld [vmem:[#allocation8 + $0xf8] sm:$0xff]  ;;  %v1453_v52 = vld [vmem:[#allocation8 + $0x1460] sm:$0xff]  ;;  %v987_v54 = vld [vmem:[#allocation8 + $0x5d0] sm:$0xff] }
 0x4f5   : > { %v6317_v40 = vpack.c.bf16 %v910_v33, %v832_v31  ;;  %v1065_v55 = vld [vmem:[#allocation8 + $0x840] sm:$0xff]  ;;  %v1299_v19 = vld [vmem:[#allocation8 + $0xf90] sm:$0xff] }
 0x4f6   : > { %6220 = vmatpush1.bf16.msra.mxu1 %v6219_v0  ;;  %v829_v0 = vld [vmem:[#allocation8 + $0xe0] sm:$0xff]  ;;  %v6331_v31 = vpack.c.bf16 %v1377_v20, %v1299_v19 }
 0x4f7   : > { %6254 = vmatprep.subr.bf16.mxu1 %v6253_v3  ;;  %6244 = vmatpush1.bf16.msra.mxu0 %v6243_v39  ;;  %v1685_v3 = vld [vmem:[#allocation8 + $0x1ba0] sm:$0xff]  ;;  %v6287_v5 = vpack.c.bf16 %v907_v6, %v829_v0  ;;  %v6323_v0 = vpack.c.bf16 %v1065_v55, %v987_v54  ;;  %v1143_v6 = vld [vmem:[#allocation8 + $0xab0] sm:$0xff] }
 0x4f8   : > { %6246 = vmatprep.subr.bf16.mxu0 %v6245_v44  ;;  %v6275_v11 = vpack.c.bf16 %v1685_v3, %v1607_v2  ;;  %v1297_v39 = vld [vmem:[#allocation8 + $0xf80] sm:$0xff]  ;;  %v1375_v44 = vld [vmem:[#allocation8 + $0x11f0] sm:$0xff]  ;;  %v7711_v2 = vsub.s32 1, %v7701_v49 }
 0x4f9   : > { %3305 = vmatmul.mubr.f32.vlgmr.msra.gmra.mrb[10].mxu1 %v7669_v24  ;;  %v1609_v3 = vld [vmem:[#allocation8 + $0x1940] sm:$0xff]  ;;  %v911_v55 = vld [vmem:[#allocation8 + $0x370] sm:$0xff] }
 0x4fa   : > { %6256 = vmatpush1.bf16.msra.mxu1 %v6255_v12  ;;  %3446 = vmatprep.mubr.f32.mxu1 %v7366_v32  ;;  %v985_v12 = vld [vmem:[#allocation8 + $0x5c0] sm:$0xff] }
 0x4fb   : > { %6258 = vmatprep.subr.bf16.mxu1 %v6257_v15  ;;  %6248 = vmatpush1.bf16.msra.mxu0 %v6247_v51  ;;  %v1841_v15 = vld [vmem:[#allocation8 + $0x2080] sm:$0xff]  ;;  %v6291_v23 = vpack.c.bf16 %v1063_v17, %v985_v12  ;;  %v6299_v51 = vpack.c.bf16 %v1375_v44, %v1297_v39  ;;  %v1844_v12 = vld [vmem:[#allocation8 + $0x2098] sm:$0xff] }
 0x4fc   : > { %6250 = vmatprep.subr.bf16.mxu0 %v6249_v56  ;;  %v6279_v22 = vpack.c.bf16 %v1841_v15, %v1763_v14  ;;  %v6301_v56 = vpack.c.bf16 %v1532_v48, %v1454_v47  ;;  %v6327_v14 = vpack.c.bf16 %v1221_v7, %v1143_v6  ;;  %v1765_v17 = vld [vmem:[#allocation8 + $0x1e20] sm:$0xff]  ;;  %v912_v44 = vld [vmem:[#allocation8 + $0x378] sm:$0xff]  ;;  %v7727_v47 = vsub.s32 3, %v7701_v49  ;;  %v1767_v6 = vld [vmem:[#allocation8 + $0x1e30] sm:$0xff] }
 0x4fd   : > { %v1921_v35 = vld [vmem:[#allocation8 + $0x2300] sm:$0xff] }
 0x4fe   : > { %6260 = vmatpush1.bf16.msra.mxu1 %v6259_v25  ;;  %v1141_v25 = vld [vmem:[#allocation8 + $0xaa0] sm:$0xff] }
 0x4ff   : > { %6262 = vmatprep.subr.bf16.mxu1 %v6261_v28  ;;  %6252 = vmatpush1.bf16.msra.mxu0 %v6251_v63  ;;  %v1997_v28 = vld [vmem:[#allocation8 + $0x2560] sm:$0xff]  ;;  %v7707_v63 = vsub.s32 0, %v7701_v49 }
 0x500   : > { %6286 = vmatprep.subr.bf16.mxu0 %v6285_v4  ;;  %v6283_v37 = vpack.c.bf16 %v1997_v28, %v1919_v27  ;;  %v6325_v4 = vpack.c.bf16 %v1222_v59, %v1144_v58  ;;  %v1922_v27 = vld [vmem:[#allocation8 + $0x2308] sm:$0xff]  ;;  %v2000_v28 = vld [vmem:[#allocation8 + $0x2578] sm:$0xff]  ;;  %v1845_v7 = vld [vmem:[#allocation8 + $0x20a0] sm:$0xff] }
 0x501   : > { %v6313_v39 = vpack.c.bf16 %v2000_v28, %v1922_v27  ;;  %v990_v58 = vld [vmem:[#allocation8 + $0x5e8] sm:$0xff]  ;;  %v1068_v59 = vld [vmem:[#allocation8 + $0x858] sm:$0xff]  ;;  %v1145_v19 = vld [vmem:[#allocation8 + $0xac0] sm:$0xff] }
 0x502   : > { %6264 = vmatpush1.bf16.msra.mxu1 %v6263_v38  ;;  %3376 = vmatmul.mubr.f32.vlgmr.msra.gmra.mrb[12].mxu0 %v7669_v24  ;;  %v6295_v38 = vpack.c.bf16 %v1219_v30, %v1141_v25  ;;  %v1534_v25 = vld [vmem:[#allocation8 + $0x16e8] sm:$0xff] }
 0x503   : > { %6266 = vmatprep.subr.bf16.mxu1 %v6265_v41  ;;  %6288 = vmatpush1.bf16.msra.mxu0 %v6287_v5  ;;  %v831_v41 = vld [vmem:[#allocation8 + $0xf0] sm:$0xff]  ;;  %v1766_v5 = vld [vmem:[#allocation8 + $0x1e28] sm:$0xff] }
 0x504   : > { %6290 = vmatprep.subr.bf16.mxu0 %v6289_v16  ;;  %3517 = vmatprep.mubr.f32.mxu0 %v7366_v32  ;;  %v6307_v16 = vpack.c.bf16 %v1687_v9, %v1609_v3  ;;  %v6309_v21 = vpack.c.bf16 %v1844_v12, %v1766_v5  ;;  %v989_v3 = vld [vmem:[#allocation8 + $0x5e0] sm:$0xff]  ;;  %v1067_v9 = vld [vmem:[#allocation8 + $0x850] sm:$0xff]  ;;  %v2002_v5 = vld [vmem:[#allocation8 + $0x2588] sm:$0xff] }
 0x505   : > { %v1146_v12 = vld [vmem:[#allocation8 + $0xac8] sm:$0xff] }
 0x506   : > { %6268 = vmatpush1.bf16.msra.mxu1 %v6267_v50  ;;  %v6319_v50 = vpack.c.bf16 %v909_v42, %v831_v41  ;;  %v1612_v41 = vld [vmem:[#allocation8 + $0x1958] sm:$0xff]  ;;  %v1690_v42 = vld [vmem:[#allocation8 + $0x1bc8] sm:$0xff] }
 0x507   : > { %6270 = vmatprep.subr.bf16.mxu1 %v6269_v53  ;;  %6292 = vmatpush1.bf16.msra.mxu0 %v6291_v23  ;;  %v6321_v53 = vpack.c.bf16 %v1066_v46, %v988_v45  ;;  %v1456_v23 = vld [vmem:[#allocation8 + $0x1478] sm:$0xff]  ;;  %v7724_v45 = vsub.s32 2, %v7701_v49  ;;  %v914_v27 = vld [vmem:[#allocation8 + $0x388] sm:$0xff] }
 0x508   : > { %6294 = vmatprep.subr.bf16.mxu0 %v6293_v29  ;;  %v6333_v36 = vpack.c.bf16 %v1534_v25, %v1456_v23  ;;  %v1223_v25 = vld [vmem:[#allocation8 + $0xd30] sm:$0xff]  ;;  %v1302_v28 = vld [vmem:[#allocation8 + $0xfa8] sm:$0xff] }
 0x50a   : > { %6272 = vmatpush1.bf16.msra.mxu1 %v6271_v62  ;;  %v7704_v62 = vld [vmem:[#allocation10] sm:$0xff] }
 0x50b   : > { %6274 = vmatprep.subr.bf16.mxu1 %v6273_v1  ;;  %6296 = vmatpush1.bf16.msra.mxu0 %v6295_v38  ;;  %v6303_v1 = vpack.c.bf16 %v1531_v57, %v1453_v52  ;;  %v2076_v15 = vrot.slane %v7704_v62, %v7711_v2  ;;  %v1533_v38 = vld [vmem:[#allocation8 + $0x16e0] sm:$0xff]  ;;  %v1611_v52 = vld [vmem:[#allocation8 + $0x1950] sm:$0xff]  ;;  %v1846_v57 = vld [vmem:[#allocation8 + $0x20a8] sm:$0xff]  ;;  %v2080_v60 = vrot.slane %v7704_v62, %v7724_v45 }
 0x50c   : > { %6298 = vmatprep.subr.bf16.mxu0 %v6297_v43  ;;  %v834_v43 = vld [vmem:[#allocation8 + $0x108] sm:$0xff]  ;;  %v2084_v61 = vrot.slane %v7704_v62, %v7727_v47 }
 0x50d   : > { %v6349_v54 = vpack.c.bf16 %v912_v44, %v834_v43 }
 0x50e   : > { %6276 = vmatpush1.bf16.msra.mxu1 %v6275_v11  ;;  %v1378_v11 = vld [vmem:[#allocation8 + $0x1208] sm:$0xff] }
 0x50f   : > { %6278 = vmatprep.subr.bf16.mxu1 %v6277_v13  ;;  %6300 = vmatpush1.bf16.msra.mxu0 %v6299_v51  ;;  %v2072_v13 = vrot.slane %v7704_v62, %v7707_v63  ;;  %v6329_v18 = vpack.c.bf16 %v1378_v11, %v1300_v10  ;;  %v6337_v51 = vpack.c.bf16 %v1690_v42, %v1612_v41  ;;  %v1924_v11 = vld [vmem:[#allocation8 + $0x2318] sm:$0xff]  ;;  %v1458_v41 = vld [vmem:[#allocation8 + $0x1488] sm:$0xff] }
 0x510   : > { %6302 = vmatprep.subr.bf16.mxu0 %v6301_v56  ;;  %v1768_v56 = vld [vmem:[#allocation8 + $0x1e38] sm:$0xff]  ;;  %v6345_v20 = vpack.c.bf16 %v2002_v5, %v1924_v11 }
 0x511   : > { %v1536_v42 = vld [vmem:[#allocation8 + $0x16f8] sm:$0xff] }
 0x512   : > { %6280 = vmatpush1.bf16.msra.mxu1 %v6279_v22  ;;  %v1843_v22 = vld [vmem:[#allocation8 + $0x2090] sm:$0xff]  ;;  %v1848_v11 = vld [vmem:[#allocation8 + $0x20b8] sm:$0xff] }
 0x513   : > { %6282 = vmatprep.subr.bf16.mxu1 %v6281_v26  ;;  %6304 = vmatpush1.bf16.msra.mxu0 %v6303_v1  ;;  %v6311_v34 = vpack.c.bf16 %v1843_v22, %v1765_v17  ;;  %v6343_v17 = vpack.c.bf16 %v1845_v7, %v1767_v6  ;;  %v2001_v22 = vld [vmem:[#allocation8 + $0x2580] sm:$0xff]  ;;  %v1691_v7 = vld [vmem:[#allocation8 + $0x1bd0] sm:$0xff] }
 0x514   : > { %6306 = vmatprep.subr.bf16.mxu0 %v6305_v8  ;;  %v2525_v26 = vpop.f32.mrb[0].mxu0  ;;  %v6353_v8 = vpack.c.bf16 %v1068_v59, %v990_v58  ;;  %v7743_v58 = vsub.s32 4, %v7701_v49 }
 0x515   : > { %v2526_v29 = vadd.f32 %v2525_v26, %v2072_v13  ;;  %v2527_v30 = vpop.f32.mrb[1].mxu0  ;;  %v1224_v13 = vld [vmem:[#allocation8 + $0xd38] sm:$0xff] }
 0x516   : > { %6284 = vmatpush1.bf16.msra.mxu1 %v6283_v37  ;;  %v2528_v33 = vadd.f32 %v2527_v30, %v2076_v15  ;;  %v1455_v37 = vld [vmem:[#allocation8 + $0x1470] sm:$0xff]  ;;  %v6357_v23 = vpack.c.bf16 %v1224_v13, %v1146_v12  ;;  %v836_v26 = vld [vmem:[#allocation8 + $0x118] sm:$0xff]  ;;  %v2088_v5 = vrot.slane %v7704_v62, %v7743_v58 }
 0x517   : > { %6318 = vmatprep.subr.bf16.mxu1 %v6317_v40  ;;  %6308 = vmatpush1.bf16.msra.mxu0 %v6307_v16  ;;  %5228 = vst [vmem:[%s8164_s6] sm:$0xff] %v2526_v29  ;;  %v1999_v40 = vld [vmem:[#allocation8 + $0x2570] sm:$0xff]  ;;  %v6335_v46 = vpack.c.bf16 %v1533_v38, %v1455_v37  ;;  %v1380_v29 = vld [vmem:[#allocation8 + $0x1218] sm:$0xff] }
 0x518   : > { %6310 = vmatprep.subr.bf16.mxu0 %v6309_v21  ;;  %5229 = vst [vmem:[%s8164_s6 + $0x8] sm:$0xff] %v2528_v33  ;;  %v6315_v48 = vpack.c.bf16 %v1999_v40, %v1921_v35  ;;  %v1923_v21 = vld [vmem:[#allocation8 + $0x2310] sm:$0xff]  ;;  %v1301_v33 = vld [vmem:[#allocation8 + $0xfa0] sm:$0xff]  ;;  %v6361_v37 = vpack.c.bf16 %v1380_v29, %v1302_v28  ;;  %v1070_v40 = vld [vmem:[#allocation8 + $0x868] sm:$0xff] }
 0x519   : > { %3447 = vmatmul.mubr.f32.vlgmr.msra.gmra.mrb[12].mxu1 %v7669_v24  ;;  %v6347_v30 = vpack.c.bf16 %v2001_v22, %v1923_v21  ;;  %v835_v35 = vld [vmem:[#allocation8 + $0x110] sm:$0xff]  ;;  %v1460_v21 = vld [vmem:[#allocation8 + $0x1498] sm:$0xff]  ;;  %v1538_v22 = vld [vmem:[#allocation8 + $0x1708] sm:$0xff] }
 0x51a   : > { %6320 = vmatpush1.bf16.msra.mxu1 %v6319_v50  ;;  %3588 = vmatprep.mubr.f32.mxu1 %v7366_v32  ;;  %v833_v50 = vld [vmem:[#allocation8 + $0x100] sm:$0xff]  ;;  %v1379_v38 = vld [vmem:[#allocation8 + $0x1210] sm:$0xff] }
 0x51b   : > { %6322 = vmatprep.subr.bf16.mxu1 %v6321_v53  ;;  %6312 = vmatpush1.bf16.msra.mxu0 %v6311_v34  ;;  %v1689_v53 = vld [vmem:[#allocation8 + $0x1bc0] sm:$0xff]  ;;  %v6351_v1 = vpack.c.bf16 %v911_v55, %v833_v50  ;;  %v6381_v34 = vpack.c.bf16 %v914_v27, %v836_v26  ;;  %v6363_v44 = vpack.c.bf16 %v1379_v38, %v1301_v33  ;;  %v991_v50 = vld [vmem:[#allocation8 + $0x5f0] sm:$0xff]  ;;  %v1226_v55 = vld [vmem:[#allocation8 + $0xd48] sm:$0xff] }
 0x51c   : > { %6314 = vmatprep.subr.bf16.mxu0 %v6313_v39  ;;  %v992_v39 = vld [vmem:[#allocation8 + $0x5f8] sm:$0xff]  ;;  %v1925_v33 = vld [vmem:[#allocation8 + $0x2320] sm:$0xff]  ;;  %v2003_v38 = vld [vmem:[#allocation8 + $0x2590] sm:$0xff] }
 0x51d   : > { %v2004_v26 = vld [vmem:[#allocation8 + $0x2598] sm:$0xff] }
 0x51e   : > { %6324 = vmatpush1.bf16.msra.mxu1 %v6323_v0  ;;  %v6339_v0 = vpack.c.bf16 %v1689_v53, %v1611_v52  ;;  %v6365_v52 = vpack.c.bf16 %v1536_v42, %v1458_v41  ;;  %v1535_v53 = vld [vmem:[#allocation8 + $0x16f0] sm:$0xff]  ;;  %v838_v41 = vld [vmem:[#allocation8 + $0x128] sm:$0xff]  ;;  %v916_v42 = vld [vmem:[#allocation8 + $0x398] sm:$0xff] }
 0x51f   : > { %6326 = vmatprep.subr.bf16.mxu1 %v6325_v4  ;;  %6316 = vmatpush1.bf16.msra.mxu0 %v6315_v48  ;;  %v6341_v4 = vpack.c.bf16 %v1846_v57, %v1768_v56  ;;  %v6385_v48 = vpack.c.bf16 %v1070_v40, %v992_v39  ;;  %v1614_v56 = vld [vmem:[#allocation8 + $0x1968] sm:$0xff]  ;;  %v1692_v57 = vld [vmem:[#allocation8 + $0x1bd8] sm:$0xff] }
 0x520   : > { %6350 = vmatprep.subr.bf16.mxu0 %v6349_v54  ;;  %v1148_v54 = vld [vmem:[#allocation8 + $0xad8] sm:$0xff]  ;;  %v6369_v6 = vpack.c.bf16 %v1692_v57, %v1614_v56  ;;  %v1694_v40 = vld [vmem:[#allocation8 + $0x1be8] sm:$0xff] }
 0x521   : > { %v1616_v39 = vld [vmem:[#allocation8 + $0x1978] sm:$0xff]  ;;  %v1850_v57 = vld [vmem:[#allocation8 + $0x20c8] sm:$0xff] }
 0x522   : > { %6328 = vmatpush1.bf16.msra.mxu1 %v6327_v14  ;;  %3518 = vmatmul.mubr.f32.vlgmr.msra.gmra.mrb[14].mxu0 %v7669_v24  ;;  %v1772_v56 = vld [vmem:[#allocation8 + $0x1e58] sm:$0xff] }
 0x523   : > { %6330 = vmatprep.subr.bf16.mxu1 %v6329_v18  ;;  %6352 = vmatpush1.bf16.msra.mxu0 %v6351_v1  ;;  %v6355_v18 = vpack.c.bf16 %v1067_v9, %v989_v3  ;;  %v6389_v1 = vpack.c.bf16 %v1226_v55, %v1148_v54  ;;  %v1147_v3 = vld [vmem:[#allocation8 + $0xad0] sm:$0xff]  ;;  %v1382_v9 = vld [vmem:[#allocation8 + $0x1228] sm:$0xff]  ;;  %v6413_v54 = vpack.c.bf16 %v916_v42, %v838_v41  ;;  %v1540_v42 = vld [vmem:[#allocation8 + $0x1718] sm:$0xff] }
 0x524   : > { %6354 = vmatprep.subr.bf16.mxu0 %v6353_v8  ;;  %3659 = vmatprep.mubr.f32.mxu0 %v7366_v32  ;;  %v1304_v8 = vld [vmem:[#allocation8 + $0xfb8] sm:$0xff]  ;;  %v915_v55 = vld [vmem:[#allocation8 + $0x390] sm:$0xff]  ;;  %v1462_v41 = vld [vmem:[#allocation8 + $0x14a8] sm:$0xff] }
 0x526   : > { %6332 = vmatpush1.bf16.msra.mxu1 %v6331_v31  ;;  %v6359_v31 = vpack.c.bf16 %v1223_v25, %v1145_v19  ;;  %v1926_v25 = vld [vmem:[#allocation8 + $0x2328] sm:$0xff] }
 0x527   : > { %6334 = vmatprep.subr.bf16.mxu1 %v6333_v36  ;;  %6356 = vmatpush1.bf16.msra.mxu0 %v6355_v18  ;;  %v913_v36 = vld [vmem:[#allocation8 + $0x380] sm:$0xff] }
 0x528   : > { %6358 = vmatprep.subr.bf16.mxu0 %v6357_v23  ;;  %v6383_v43 = vpack.c.bf16 %v913_v36, %v835_v35  ;;  %v1381_v18 = vld [vmem:[#allocation8 + $0x1220] sm:$0xff]  ;;  %v1459_v35 = vld [vmem:[#allocation8 + $0x1490] sm:$0xff] }
 0x529   : > { %v1537_v36 = vld [vmem:[#allocation8 + $0x1700] sm:$0xff] }
 0x52a   : > { %6336 = vmatpush1.bf16.msra.mxu1 %v6335_v46  ;;  %v1457_v46 = vld [vmem:[#allocation8 + $0x1480] sm:$0xff] }
 0x52b   : > { %6338 = vmatprep.subr.bf16.mxu1 %v6337_v51  ;;  %6360 = vmatpush1.bf16.msra.mxu0 %v6359_v31  ;;  %v1069_v51 = vld [vmem:[#allocation8 + $0x860] sm:$0xff] }
 0x52c   : > { %v2596_v10 = vpop.f32.mrb[0].mxu1  ;;  %6362 = vmatprep.subr.bf16.mxu0 %v6361_v37  ;;  %v6387_v59 = vpack.c.bf16 %v1069_v51, %v991_v50  ;;  %v6377_v37 = vpack.c.bf16 %v2004_v26, %v1926_v25  ;;  %v837_v50 = vld [vmem:[#allocation8 + $0x120] sm:$0xff]  ;;  %v6401_v51 = vpack.c.bf16 %v1694_v40, %v1616_v39  ;;  %v1227_v25 = vld [vmem:[#allocation8 + $0xd50] sm:$0xff]  ;;  %v840_v26 = vld [vmem:[#allocation8 + $0x138] sm:$0xff] }
 0x52d   : > { %v2597_v14 = vadd.f32 %v2596_v10, %v2080_v60  ;;  %v2598_v15 = vpop.f32.mrb[1].mxu1  ;;  %v6367_v60 = vpack.c.bf16 %v1535_v53, %v1457_v46  ;;  %v1770_v10 = vld [vmem:[#allocation8 + $0x1e48] sm:$0xff]  ;;  %v7763_v46 = vsub.s32 7, %v7701_v49  ;;  %v1693_v53 = vld [vmem:[#allocation8 + $0x1be0] sm:$0xff]  ;;  %v996_v39 = vld [vmem:[#allocation8 + $0x618] sm:$0xff] }
 0x52e   : > { %v2599_v16 = vadd.f32 %v2598_v15, %v2084_v61  ;;  %6340 = vmatpush1.bf16.msra.mxu1 %v6339_v0  ;;  %v7747_v61 = vsub.s32 5, %v7701_v49  ;;  %v1613_v0 = vld [vmem:[#allocation8 + $0x1960] sm:$0xff]  ;;  %v6373_v19 = vpack.c.bf16 %v1848_v11, %v1770_v10  ;;  %v1071_v10 = vld [vmem:[#allocation8 + $0x870] sm:$0xff]  ;;  %v1074_v40 = vld [vmem:[#allocation8 + $0x888] sm:$0xff] }
 0x52f   : > { %5230 = vst [vmem:[%s8164_s6 + $0x10] sm:$0xff] %v2597_v14  ;;  %6342 = vmatprep.subr.bf16.mxu1 %v6341_v4  ;;  %6364 = vmatpush1.bf16.msra.mxu0 %v6363_v44  ;;  %v1225_v4 = vld [vmem:[#allocation8 + $0xd40] sm:$0xff]  ;;  %v6371_v14 = vpack.c.bf16 %v1691_v7, %v1613_v0  ;;  %v6399_v44 = vpack.c.bf16 %v1537_v36, %v1459_v35  ;;  %v1771_v7 = vld [vmem:[#allocation8 + $0x1e50] sm:$0xff] }
 0x530   : > { %5231 = vst [vmem:[%s8164_s6 + $0x18] sm:$0xff] %v2599_v16  ;;  %6366 = vmatprep.subr.bf16.mxu0 %v6365_v52  ;;  %v6391_v12 = vpack.c.bf16 %v1225_v4, %v1147_v3  ;;  %v2092_v13 = vrot.slane %v7704_v62, %v7747_v61  ;;  %v1769_v15 = vld [vmem:[#allocation8 + $0x1e40] sm:$0xff]  ;;  %v6393_v16 = vpack.c.bf16 %v1382_v9, %v1304_v8  ;;  %v1615_v52 = vld [vmem:[#allocation8 + $0x1970] sm:$0xff] }
 0x531   : > { %v6415_v3 = vpack.c.bf16 %v915_v55, %v837_v50  ;;  %v993_v4 = vld [vmem:[#allocation8 + $0x600] sm:$0xff]  ;;  %v839_v35 = vld [vmem:[#allocation8 + $0x130] sm:$0xff] }
 0x532   : > { %6344 = vmatpush1.bf16.msra.mxu1 %v6343_v17  ;;  %v1303_v17 = vld [vmem:[#allocation8 + $0xfb0] sm:$0xff]  ;;  %v1849_v8 = vld [vmem:[#allocation8 + $0x20c0] sm:$0xff] }
 0x533   : > { %6346 = vmatprep.subr.bf16.mxu1 %v6345_v20  ;;  %6368 = vmatpush1.bf16.msra.mxu0 %v6367_v60  ;;  %v1847_v20 = vld [vmem:[#allocation8 + $0x20b0] sm:$0xff]  ;;  %v6395_v29 = vpack.c.bf16 %v1381_v18, %v1303_v17  ;;  %v1072_v60 = vld [vmem:[#allocation8 + $0x878] sm:$0xff]  ;;  %v6407_v17 = vpack.c.bf16 %v1849_v8, %v1771_v7  ;;  %v6419_v18 = vpack.c.bf16 %v1071_v10, %v993_v4  ;;  %v917_v36 = vld [vmem:[#allocation8 + $0x3a0] sm:$0xff] }
 0x534   : > { %6370 = vmatprep.subr.bf16.mxu0 %v6369_v6  ;;  %v6375_v31 = vpack.c.bf16 %v1847_v20, %v1769_v15  ;;  %v6405_v6 = vpack.c.bf16 %v1850_v57, %v1772_v56  ;;  %v1461_v50 = vld [vmem:[#allocation8 + $0x14a0] sm:$0xff]  ;;  %v1539_v55 = vld [vmem:[#allocation8 + $0x1710] sm:$0xff]  ;;  %v1152_v56 = vld [vmem:[#allocation8 + $0xaf8] sm:$0xff] }
 0x535   : > { %v2667_v23 = vpop.f32.mrb[2].mxu0  ;;  %v1230_v57 = vld [vmem:[#allocation8 + $0xd68] sm:$0xff]  ;;  %v1229_v7 = vld [vmem:[#allocation8 + $0xd60] sm:$0xff]  ;;  %v1308_v10 = vld [vmem:[#allocation8 + $0xfd8] sm:$0xff] }
 0x536   : > { %6348 = vmatpush1.bf16.msra.mxu1 %v6347_v30  ;;  %v2668_v27 = vadd.f32 %v2667_v23, %v2088_v5  ;;  %v2669_v28 = vpop.f32.mrb[3].mxu0  ;;  %v1928_v5 = vld [vmem:[#allocation8 + $0x2338] sm:$0xff]  ;;  %v6453_v4 = vpack.c.bf16 %v1230_v57, %v1152_v56  ;;  %v919_v56 = vld [vmem:[#allocation8 + $0x3b0] sm:$0xff] }
 0x537   : > { %6382 = vmatprep.subr.bf16.mxu1 %v6381_v34  ;;  %v2670_v30 = vadd.f32 %v2669_v28, %v2092_v13  ;;  %6372 = vmatpush1.bf16.msra.mxu0 %v6371_v14  ;;  %v6397_v34 = vpack.c.bf16 %v1538_v22, %v1460_v21  ;;  %v1150_v13 = vld [vmem:[#allocation8 + $0xae8] sm:$0xff]  ;;  %v1228_v14 = vld [vmem:[#allocation8 + $0xd58] sm:$0xff]  ;;  %v1927_v21 = vld [vmem:[#allocation8 + $0x2330] sm:$0xff] }
 0x538   : > { %5232 = vst [vmem:[%s8164_s6 + $0x20] sm:$0xff] %v2668_v27  ;;  %6374 = vmatprep.subr.bf16.mxu0 %v6373_v19  ;;  %v1149_v19 = vld [vmem:[#allocation8 + $0xae0] sm:$0xff]  ;;  %v6421_v23 = vpack.c.bf16 %v1228_v14, %v1150_v13  ;;  %v918_v27 = vld [vmem:[#allocation8 + $0x3a8] sm:$0xff]  ;;  %v1776_v57 = vld [vmem:[#allocation8 + $0x1e78] sm:$0xff] }
 0x539   : > { %3589 = vmatmul.mubr.f32.vlgmr.msra.gmra.mrb[14].mxu1 %v7669_v24  ;;  %5233 = vst [vmem:[%s8164_s6 + $0x28] sm:$0xff] %v2670_v30  ;;  %v2005_v22 = vld [vmem:[#allocation8 + $0x25a0] sm:$0xff]  ;;  %v1306_v28 = vld [vmem:[#allocation8 + $0xfc8] sm:$0xff] }
 0x53a   : > { %6384 = vmatpush1.bf16.msra.mxu1 %v6383_v43  ;;  %3730 = vmatprep.mubr.f32.mxu1 %v7366_v32  ;;  %v7760_v43 = vsub.s32 6, %v7701_v49  ;;  %v2100_v49 = vrot.slane %v7704_v62, %v7763_v46  ;;  %v6411_v30 = vpack.c.bf16 %v2005_v22, %v1927_v21  ;;  %v1851_v21 = vld [vmem:[#allocation8 + $0x20d0] sm:$0xff]  ;;  %v1464_v22 = vld [vmem:[#allocation8 + $0x14b8] sm:$0xff] }
 0x53b   : > { %6386 = vmatprep.subr.bf16.mxu1 %v6385_v48  ;;  %6376 = vmatpush1.bf16.msra.mxu0 %v6375_v31  ;;  %v6379_v48 = vpack.c.bf16 %v2003_v38, %v1925_v33  ;;  %v6423_v31 = vpack.c.bf16 %v1227_v25, %v1149_v19  ;;  %v1305_v33 = vld [vmem:[#allocation8 + $0xfc0] sm:$0xff]  ;;  %v1383_v38 = vld [vmem:[#allocation8 + $0x1230] sm:$0xff] }
 0x53c   : > { %6378 = vmatprep.subr.bf16.mxu0 %v6377_v37  ;;  %v2096_v0 = vrot.slane %v7704_v62, %v7760_v43  ;;  %v1385_v19 = vld [vmem:[#allocation8 + $0x1240] sm:$0xff] }
 0x53e   : > { %6388 = vmatpush1.bf16.msra.mxu1 %v6387_v59  ;;  %v994_v59 = vld [vmem:[#allocation8 + $0x608] sm:$0xff] }
 0x53f   : > { %6390 = vmatprep.subr.bf16.mxu1 %v6389_v1  ;;  %v6403_v1 = vpack.c.bf16 %v1693_v53, %v1615_v52  ;;  %6380 = vmatpush1.bf16.msra.mxu0 %v6379_v48  ;;  %v6417_v9 = vpack.c.bf16 %v1072_v60, %v994_v59  ;;  %v6427_v48 = vpack.c.bf16 %v1383_v38, %v1305_v33  ;;  %v995_v52 = vld [vmem:[#allocation8 + $0x610] sm:$0xff]  ;;  %v1073_v53 = vld [vmem:[#allocation8 + $0x880] sm:$0xff]  ;;  %v1618_v59 = vld [vmem:[#allocation8 + $0x1988] sm:$0xff] }
 0x540   : > { %6414 = vmatprep.subr.bf16.mxu0 %v6413_v54  ;;  %v6429_v54 = vpack.c.bf16 %v1540_v42, %v1462_v41  ;;  %v1696_v60 = vld [vmem:[#allocation8 + $0x1bf8] sm:$0xff]  ;;  %v1698_v41 = vld [vmem:[#allocation8 + $0x1c08] sm:$0xff] }
 0x541   : > { %v6433_v8 = vpack.c.bf16 %v1696_v60, %v1618_v59  ;;  %v842_v42 = vld [vmem:[#allocation8 + $0x148] sm:$0xff] }
 0x542   : > { %6392 = vmatpush1.bf16.msra.mxu1 %v6391_v12  ;;  %v2006_v12 = vld [vmem:[#allocation8 + $0x25a8] sm:$0xff]  ;;  %3660 = vmatmul.mubr.f32.vlgmr.msra.gmra.mrb[16].mxu0 %v7669_v24 }
 0x543   : > { %6394 = vmatprep.subr.bf16.mxu1 %v6393_v16  ;;  %6416 = vmatpush1.bf16.msra.mxu0 %v6415_v3  ;;  %v6409_v20 = vpack.c.bf16 %v2006_v12, %v1928_v5  ;;  %v1617_v3 = vld [vmem:[#allocation8 + $0x1980] sm:$0xff]  ;;  %v1774_v5 = vld [vmem:[#allocation8 + $0x1e68] sm:$0xff]  ;;  %v1852_v12 = vld [vmem:[#allocation8 + $0x20d8] sm:$0xff] }
 0x544   : > { %6418 = vmatprep.subr.bf16.mxu0 %v6417_v9  ;;  %3801 = vmatprep.mubr.f32.mxu0 %v7366_v32  ;;  %v1695_v9 = vld [vmem:[#allocation8 + $0x1bf0] sm:$0xff]  ;;  %v1854_v59 = vld [vmem:[#allocation8 + $0x20e8] sm:$0xff] }
 0x545   : > { %v998_v60 = vld [vmem:[#allocation8 + $0x628] sm:$0xff] }
 0x546   : > { %6396 = vmatpush1.bf16.msra.mxu1 %v6395_v29  ;;  %v1384_v29 = vld [vmem:[#allocation8 + $0x1238] sm:$0xff] }
 0x547   : > { %6398 = vmatprep.subr.bf16.mxu1 %v6397_v34  ;;  %6420 = vmatpush1.bf16.msra.mxu0 %v6419_v18  ;;  %v6445_v34 = vpack.c.bf16 %v918_v27, %v840_v26  ;;  %v6425_v37 = vpack.c.bf16 %v1384_v29, %v1306_v28  ;;  %v1307_v18 = vld [vmem:[#allocation8 + $0xfd0] sm:$0xff]  ;;  %v1930_v26 = vld [vmem:[#allocation8 + $0x2348] sm:$0xff]  ;;  %v2008_v27 = vld [vmem:[#allocation8 + $0x25b8] sm:$0xff] }
 0x548   : > { %6422 = vmatprep.subr.bf16.mxu0 %v6421_v23  ;;  %v1542_v23 = vld [vmem:[#allocation8 + $0x1728] sm:$0xff]  ;;  %v6441_v38 = vpack.c.bf16 %v2008_v27, %v1930_v26  ;;  %v1231_v27 = vld [vmem:[#allocation8 + $0xd70] sm:$0xff] }
 0x54a   : > { %6400 = vmatpush1.bf16.msra.mxu1 %v6399_v44  ;;  %v6447_v44 = vpack.c.bf16 %v917_v36, %v839_v35  ;;  %v6461_v35 = vpack.c.bf16 %v1542_v23, %v1464_v22  ;;  %v1463_v36 = vld [vmem:[#allocation8 + $0x14b0] sm:$0xff] }
 0x54b   : > { %6402 = vmatprep.subr.bf16.mxu1 %v6401_v51  ;;  %6424 = vmatpush1.bf16.msra.mxu0 %v6423_v31  ;;  %v6449_v51 = vpack.c.bf16 %v1074_v40, %v996_v39  ;;  %v2007_v39 = vld [vmem:[#allocation8 + $0x25b0] sm:$0xff]  ;;  %v1620_v40 = vld [vmem:[#allocation8 + $0x1998] sm:$0xff] }
 0x54c   : > { %v2738_v11 = vpop.f32.mrb[2].mxu1  ;;  %6426 = vmatprep.subr.bf16.mxu0 %v6425_v37  ;;  %v1541_v37 = vld [vmem:[#allocation8 + $0x1720] sm:$0xff]  ;;  %v1931_v23 = vld [vmem:[#allocation8 + $0x2350] sm:$0xff] }
 0x54d   : > { %v2739_v15 = vadd.f32 %v2738_v11, %v2096_v0  ;;  %v2740_v16 = vpop.f32.mrb[3].mxu1  ;;  %v7778_v0 = vld [vmem:[#allocation10 + $0x8] sm:$0xff] }
 0x54e   : > { %v2741_v62 = vadd.f32 %v2740_v16, %v2100_v49  ;;  %6404 = vmatpush1.bf16.msra.mxu1 %v6403_v1  ;;  %v6451_v49 = vpack.c.bf16 %v1073_v53, %v995_v52  ;;  %v6431_v1 = vpack.c.bf16 %v1539_v55, %v1461_v50  ;;  %v1386_v11 = vld [vmem:[#allocation8 + $0x1248] sm:$0xff]  ;;  %v2104_v13 = vrot.slane %v7778_v0, %v7707_v63  ;;  %v1619_v53 = vld [vmem:[#allocation8 + $0x1990] sm:$0xff] }
 0x54f   : > { %5234 = vst [vmem:[%s8164_s6 + $0x30] sm:$0xff] %v2739_v15  ;;  %6406 = vmatprep.subr.bf16.mxu1 %v6405_v6  ;;  %6428 = vmatpush1.bf16.msra.mxu0 %v6427_v48  ;;  %v1151_v6 = vld [vmem:[#allocation8 + $0xaf0] sm:$0xff]  ;;  %v2108_v15 = vrot.slane %v7778_v0, %v7711_v2  ;;  %v6435_v16 = vpack.c.bf16 %v1695_v9, %v1617_v3 }
 0x550   : > { %5235 = vst [vmem:[%s8164_s6 + $0x38] sm:$0xff] %v2741_v62  ;;  %6430 = vmatprep.subr.bf16.mxu0 %v6429_v54  ;;  %v6455_v14 = vpack.c.bf16 %v1229_v7, %v1151_v6  ;;  %v1773_v62 = vld [vmem:[#allocation8 + $0x1e60] sm:$0xff]  ;;  %v6463_v48 = vpack.c.bf16 %v1541_v37, %v1463_v36  ;;  %v6465_v52 = vpack.c.bf16 %v1698_v41, %v1620_v40  ;;  %v1775_v9 = vld [vmem:[#allocation8 + $0x1e70] sm:$0xff]  ;;  %v1000_v41 = vld [vmem:[#allocation8 + $0x638] sm:$0xff] }
 0x551   : > { %v6439_v33 = vpack.c.bf16 %v1851_v21, %v1773_v62  ;;  %v1697_v54 = vld [vmem:[#allocation8 + $0x1c00] sm:$0xff]  ;;  %v2116_v3 = vrot.slane %v7778_v0, %v7727_v47  ;;  %v843_v37 = vld [vmem:[#allocation8 + $0x150] sm:$0xff] }
 0x552   : > { %6408 = vmatpush1.bf16.msra.mxu1 %v6407_v17  ;;  %v6457_v17 = vpack.c.bf16 %v1386_v11, %v1308_v10  ;;  %v997_v7 = vld [vmem:[#allocation8 + $0x620] sm:$0xff]  ;;  %v1387_v40 = vld [vmem:[#allocation8 + $0x1250] sm:$0xff] }
 0x553   : > { %6410 = vmatprep.subr.bf16.mxu1 %v6409_v20  ;;  %6432 = vmatpush1.bf16.msra.mxu0 %v6431_v1  ;;  %v6437_v20 = vpack.c.bf16 %v1852_v12, %v1774_v5  ;;  %v2112_v1 = vrot.slane %v7778_v0, %v7724_v45  ;;  %v1853_v10 = vld [vmem:[#allocation8 + $0x20e0] sm:$0xff]  ;;  %v1075_v5 = vld [vmem:[#allocation8 + $0x890] sm:$0xff] }
 0x554   : > { %6434 = vmatprep.subr.bf16.mxu0 %v6433_v8  ;;  %v6469_v8 = vpack.c.bf16 %v1854_v59, %v1776_v57  ;;  %v1153_v21 = vld [vmem:[#allocation8 + $0xb00] sm:$0xff]  ;;  %v1543_v57 = vld [vmem:[#allocation8 + $0x1730] sm:$0xff]  ;;  %v1156_v59 = vld [vmem:[#allocation8 + $0xb18] sm:$0xff] }
 0x555   : > { %v2809_v25 = vpop.f32.mrb[4].mxu0 }
 0x556   : > { %6412 = vmatpush1.bf16.msra.mxu1 %v6411_v30  ;;  %v2810_v28 = vadd.f32 %v2809_v25, %v2104_v13  ;;  %v2811_v29 = vpop.f32.mrb[5].mxu0  ;;  %v6459_v30 = vpack.c.bf16 %v1385_v19, %v1307_v18  ;;  %v1932_v13 = vld [vmem:[#allocation8 + $0x2358] sm:$0xff]  ;;  %v6471_v19 = vpack.c.bf16 %v1853_v10, %v1775_v9  ;;  %v2009_v25 = vld [vmem:[#allocation8 + $0x25c0] sm:$0xff] }
 0x557   : > { %6446 = vmatprep.subr.bf16.mxu1 %v6445_v34  ;;  %v2812_v31 = vadd.f32 %v2811_v29, %v2108_v15  ;;  %6436 = vmatpush1.bf16.msra.mxu0 %v6435_v16  ;;  %v1929_v34 = vld [vmem:[#allocation8 + $0x2340] sm:$0xff]  ;;  %v1154_v15 = vld [vmem:[#allocation8 + $0xb08] sm:$0xff]  ;;  %v1232_v16 = vld [vmem:[#allocation8 + $0xd78] sm:$0xff] }
 0x558   : > { %5236 = vst [vmem:[%s8164_s6 + $0x40] sm:$0xff] %v2810_v28  ;;  %6438 = vmatprep.subr.bf16.mxu0 %v6437_v20  ;;  %v6443_v50 = vpack.c.bf16 %v2007_v39, %v1929_v34  ;;  %v6483_v20 = vpack.c.bf16 %v1075_v5, %v997_v7  ;;  %v6485_v26 = vpack.c.bf16 %v1232_v16, %v1154_v15  ;;  %v844_v28 = vld [vmem:[#allocation8 + $0x158] sm:$0xff]  ;;  %v922_v29 = vld [vmem:[#allocation8 + $0x3c8] sm:$0xff]  ;;  %v1233_v9 = vld [vmem:[#allocation8 + $0xd80] sm:$0xff] }
 0x559   : > { %3731 = vmatmul.mubr.f32.vlgmr.msra.gmra.mrb[16].mxu1 %v7669_v24  ;;  %5237 = vst [vmem:[%s8164_s6 + $0x48] sm:$0xff] %v2812_v31  ;;  %v1388_v31 = vld [vmem:[#allocation8 + $0x1258] sm:$0xff]  ;;  %v6487_v34 = vpack.c.bf16 %v1231_v27, %v1153_v21  ;;  %v6509_v36 = vpack.c.bf16 %v922_v29, %v844_v28  ;;  %v2120_v15 = vrot.slane %v7778_v0, %v7743_v58  ;;  %v1389_v21 = vld [vmem:[#allocation8 + $0x1260] sm:$0xff]  ;;  %v1934_v28 = vld [vmem:[#allocation8 + $0x2368] sm:$0xff] }
 0x55a   : > { %6448 = vmatpush1.bf16.msra.mxu1 %v6447_v44  ;;  %3872 = vmatprep.mubr.f32.mxu1 %v7366_v32  ;;  %v920_v44 = vld [vmem:[#allocation8 + $0x3b8] sm:$0xff] }
 0x55b   : > { %6450 = vmatprep.subr.bf16.mxu1 %v6449_v51  ;;  %6440 = vmatpush1.bf16.msra.mxu0 %v6439_v33  ;;  %v841_v51 = vld [vmem:[#allocation8 + $0x140] sm:$0xff]  ;;  %v6477_v55 = vpack.c.bf16 %v920_v44, %v842_v42  ;;  %v6475_v33 = vpack.c.bf16 %v2009_v25, %v1931_v23  ;;  %v1078_v42 = vld [vmem:[#allocation8 + $0x8a8] sm:$0xff]  ;;  %v1312_v5 = vld [vmem:[#allocation8 + $0xff8] sm:$0xff] }
 0x55c   : > { %6442 = vmatprep.subr.bf16.mxu0 %v6441_v38  ;;  %v6479_v6 = vpack.c.bf16 %v919_v56, %v841_v51  ;;  %v921_v38 = vld [vmem:[#allocation8 + $0x3c0] sm:$0xff]  ;;  %v1466_v44 = vld [vmem:[#allocation8 + $0x14c8] sm:$0xff]  ;;  %v1855_v23 = vld [vmem:[#allocation8 + $0x20f0] sm:$0xff] }
 0x55d   : > { %v1468_v25 = vld [vmem:[#allocation8 + $0x14d8] sm:$0xff] }
 0x55e   : > { %6452 = vmatpush1.bf16.msra.mxu1 %v6451_v49  ;;  %v1076_v49 = vld [vmem:[#allocation8 + $0x898] sm:$0xff] }
 0x55f   : > { %6454 = vmatprep.subr.bf16.mxu1 %v6453_v4  ;;  %v6467_v4 = vpack.c.bf16 %v1697_v54, %v1619_v53  ;;  %6444 = vmatpush1.bf16.msra.mxu0 %v6443_v50  ;;  %v6481_v11 = vpack.c.bf16 %v1076_v49, %v998_v60  ;;  %v6511_v50 = vpack.c.bf16 %v921_v38, %v843_v37  ;;  %v999_v54 = vld [vmem:[#allocation8 + $0x630] sm:$0xff]  ;;  %v1234_v60 = vld [vmem:[#allocation8 + $0xd88] sm:$0xff]  ;;  %v2012_v29 = vld [vmem:[#allocation8 + $0x25d8] sm:$0xff] }
 0x560   : > { %6478 = vmatprep.subr.bf16.mxu0 %v6477_v55  ;;  %v6513_v53 = vpack.c.bf16 %v1078_v42, %v1000_v41  ;;  %v1077_v55 = vld [vmem:[#allocation8 + $0x8a0] sm:$0xff]  ;;  %v1622_v49 = vld [vmem:[#allocation8 + $0x19a8] sm:$0xff]  ;;  %v6517_v7 = vpack.c.bf16 %v1234_v60, %v1156_v59  ;;  %v1467_v38 = vld [vmem:[#allocation8 + $0x14d0] sm:$0xff] }
 0x561   : > { %v2011_v41 = vld [vmem:[#allocation8 + $0x25d0] sm:$0xff]  ;;  %v1624_v42 = vld [vmem:[#allocation8 + $0x19b8] sm:$0xff] }
 0x562   : > { %6456 = vmatpush1.bf16.msra.mxu1 %v6455_v14  ;;  %v2010_v14 = vld [vmem:[#allocation8 + $0x25c8] sm:$0xff]  ;;  %3802 = vmatmul.mubr.f32.vlgmr.msra.gmra.mrb[18].mxu0 %v7669_v24  ;;  %v923_v59 = vld [vmem:[#allocation8 + $0x3d0] sm:$0xff]  ;;  %v1780_v60 = vld [vmem:[#allocation8 + $0x1e98] sm:$0xff] }
 0x563   : > { %6458 = vmatprep.subr.bf16.mxu1 %v6457_v17  ;;  %6480 = vmatpush1.bf16.msra.mxu0 %v6479_v6  ;;  %v6473_v22 = vpack.c.bf16 %v2010_v14, %v1932_v13  ;;  %v1621_v6 = vld [vmem:[#allocation8 + $0x19a0] sm:$0xff]  ;;  %v1778_v13 = vld [vmem:[#allocation8 + $0x1e88] sm:$0xff]  ;;  %v1856_v14 = vld [vmem:[#allocation8 + $0x20f8] sm:$0xff] }
 0x564   : > { %6482 = vmatprep.subr.bf16.mxu0 %v6481_v11  ;;  %3943 = vmatprep.mubr.f32.mxu0 %v7366_v32  ;;  %v1699_v11 = vld [vmem:[#allocation8 + $0x1c10] sm:$0xff] }
 0x566   : > { %6460 = vmatpush1.bf16.msra.mxu1 %v6459_v30  ;;  %v1310_v30 = vld [vmem:[#allocation8 + $0xfe8] sm:$0xff] }
 0x567   : > { %6462 = vmatprep.subr.bf16.mxu1 %v6461_v35  ;;  %6484 = vmatpush1.bf16.msra.mxu0 %v6483_v20  ;;  %v1309_v35 = vld [vmem:[#allocation8 + $0xfe0] sm:$0xff]  ;;  %v6489_v39 = vpack.c.bf16 %v1388_v31, %v1310_v30  ;;  %v1311_v20 = vld [vmem:[#allocation8 + $0xff0] sm:$0xff] }
 0x568   : > { %6486 = vmatprep.subr.bf16.mxu0 %v6485_v26  ;;  %v6491_v51 = vpack.c.bf16 %v1387_v40, %v1309_v35  ;;  %v1546_v26 = vld [vmem:[#allocation8 + $0x1748] sm:$0xff]  ;;  %v6505_v40 = vpack.c.bf16 %v2012_v29, %v1934_v28  ;;  %v1235_v28 = vld [vmem:[#allocation8 + $0xd90] sm:$0xff]  ;;  %v848_v29 = vld [vmem:[#allocation8 + $0x178] sm:$0xff] }
 0x569   : > { %v6525_v37 = vpack.c.bf16 %v1546_v26, %v1468_v25  ;;  %v1935_v25 = vld [vmem:[#allocation8 + $0x2370] sm:$0xff]  ;;  %v2013_v26 = vld [vmem:[#allocation8 + $0x25e0] sm:$0xff] }
 0x56a   : > { %6464 = vmatpush1.bf16.msra.mxu1 %v6463_v48  ;;  %v1544_v48 = vld [vmem:[#allocation8 + $0x1738] sm:$0xff] }
 0x56b   : > { %6466 = vmatprep.subr.bf16.mxu1 %v6465_v52  ;;  %6488 = vmatpush1.bf16.msra.mxu0 %v6487_v34  ;;  %v1465_v52 = vld [vmem:[#allocation8 + $0x14c0] sm:$0xff]  ;;  %v6493_v56 = vpack.c.bf16 %v1544_v48, %v1466_v44  ;;  %v1702_v44 = vld [vmem:[#allocation8 + $0x1c28] sm:$0xff] }
 0x56c   : > { %v2880_v12 = vpop.f32.mrb[4].mxu1  ;;  %6490 = vmatprep.subr.bf16.mxu0 %v6489_v39  ;;  %v1545_v39 = vld [vmem:[#allocation8 + $0x1740] sm:$0xff]  ;;  %v846_v48 = vld [vmem:[#allocation8 + $0x168] sm:$0xff] }
 0x56d   : > { %v2881_v62 = vadd.f32 %v2880_v12, %v2112_v1  ;;  %v2882_v17 = vpop.f32.mrb[5].mxu1  ;;  %v1700_v1 = vld [vmem:[#allocation8 + $0x1c18] sm:$0xff]  ;;  %v1390_v12 = vld [vmem:[#allocation8 + $0x1268] sm:$0xff] }
 0x56e   : > { %v2883_v18 = vadd.f32 %v2882_v17, %v2116_v3  ;;  %6468 = vmatpush1.bf16.msra.mxu1 %v6467_v4  ;;  %v6515_v3 = vpack.c.bf16 %v1077_v55, %v999_v54  ;;  %v6495_v4 = vpack.c.bf16 %v1543_v57, %v1465_v52  ;;  %v6497_v10 = vpack.c.bf16 %v1700_v1, %v1622_v49  ;;  %v1623_v55 = vld [vmem:[#allocation8 + $0x19b0] sm:$0xff]  ;;  %v1858_v49 = vld [vmem:[#allocation8 + $0x2108] sm:$0xff] }
 0x56f   : > { %5238 = vst [vmem:[%s8164_s6 + $0x50] sm:$0xff] %v2881_v62  ;;  %6470 = vmatprep.subr.bf16.mxu1 %v6469_v8  ;;  %6492 = vmatpush1.bf16.msra.mxu0 %v6491_v51  ;;  %v1155_v8 = vld [vmem:[#allocation8 + $0xb10] sm:$0xff]  ;;  %v2124_v62 = vrot.slane %v7778_v0, %v7747_v61  ;;  %v6499_v17 = vpack.c.bf16 %v1699_v11, %v1621_v6  ;;  %v1002_v1 = vld [vmem:[#allocation8 + $0x648] sm:$0xff] }
 0x570   : > { %5239 = vst [vmem:[%s8164_s6 + $0x58] sm:$0xff] %v2883_v18  ;;  %6494 = vmatprep.subr.bf16.mxu0 %v6493_v56  ;;  %v6519_v16 = vpack.c.bf16 %v1233_v9, %v1155_v8  ;;  %v1777_v18 = vld [vmem:[#allocation8 + $0x1e80] sm:$0xff]  ;;  %v6527_v51 = vpack.c.bf16 %v1545_v39, %v1467_v38  ;;  %v6529_v54 = vpack.c.bf16 %v1702_v44, %v1624_v42  ;;  %v1779_v11 = vld [vmem:[#allocation8 + $0x1e90] sm:$0xff]  ;;  %v1004_v42 = vld [vmem:[#allocation8 + $0x658] sm:$0xff] }
 0x571   : > { %v6503_v35 = vpack.c.bf16 %v1855_v23, %v1777_v18  ;;  %v1701_v56 = vld [vmem:[#allocation8 + $0x1c20] sm:$0xff]  ;;  %v2132_v6 = vrot.slane %v7778_v0, %v7763_v46  ;;  %v847_v38 = vld [vmem:[#allocation8 + $0x170] sm:$0xff]  ;;  %v1082_v44 = vld [vmem:[#allocation8 + $0x8c8] sm:$0xff] }
 0x572   : > { %6472 = vmatpush1.bf16.msra.mxu1 %v6471_v19  ;;  %v6521_v19 = vpack.c.bf16 %v1390_v12, %v1312_v5  ;;  %v1001_v9 = vld [vmem:[#allocation8 + $0x640] sm:$0xff] }
 0x573   : > { %6474 = vmatprep.subr.bf16.mxu1 %v6473_v22  ;;  %6496 = vmatpush1.bf16.msra.mxu0 %v6495_v4  ;;  %v6501_v22 = vpack.c.bf16 %v1856_v14, %v1778_v13  ;;  %v2128_v4 = vrot.slane %v7778_v0, %v7760_v43  ;;  %v1857_v5 = vld [vmem:[#allocation8 + $0x2100] sm:$0xff]  ;;  %v1079_v13 = vld [vmem:[#allocation8 + $0x8b0] sm:$0xff] }
 0x574   : > { %6498 = vmatprep.subr.bf16.mxu0 %v6497_v10  ;;  %v6533_v10 = vpack.c.bf16 %v1858_v49, %v1780_v60  ;;  %v925_v39 = vld [vmem:[#allocation8 + $0x3e0] sm:$0xff]  ;;  %v1160_v60 = vld [vmem:[#allocation8 + $0xb38] sm:$0xff]  ;;  %v1238_v49 = vld [vmem:[#allocation8 + $0xda8] sm:$0xff] }
 0x575   : > { %v2951_v27 = vpop.f32.mrb[6].mxu0 }
 0x576   : > { %6476 = vmatpush1.bf16.msra.mxu1 %v6475_v33  ;;  %v2952_v30 = vadd.f32 %v2951_v27, %v2120_v15  ;;  %v2953_v31 = vpop.f32.mrb[7].mxu0  ;;  %v6523_v33 = vpack.c.bf16 %v1389_v21, %v1311_v20  ;;  %v1936_v15 = vld [vmem:[#allocation8 + $0x2378] sm:$0xff]  ;;  %v6535_v20 = vpack.c.bf16 %v1857_v5, %v1779_v11  ;;  %v6547_v21 = vpack.c.bf16 %v1079_v13, %v1001_v9  ;;  %v1237_v11 = vld [vmem:[#allocation8 + $0xda0] sm:$0xff] }
 0x577   : > { %6510 = vmatprep.subr.bf16.mxu1 %v6509_v36  ;;  %v2954_v34 = vadd.f32 %v2953_v31, %v2124_v62  ;;  %6500 = vmatpush1.bf16.msra.mxu0 %v6499_v17  ;;  %v1933_v36 = vld [vmem:[#allocation8 + $0x2360] sm:$0xff]  ;;  %v1158_v62 = vld [vmem:[#allocation8 + $0xb28] sm:$0xff]  ;;  %v1236_v17 = vld [vmem:[#allocation8 + $0xd98] sm:$0xff]  ;;  %v6581_v9 = vpack.c.bf16 %v1238_v49, %v1160_v60 }
 0x578   : > { %5240 = vst [vmem:[%s8164_s6 + $0x60] sm:$0xff] %v2952_v30  ;;  %6502 = vmatprep.subr.bf16.mxu0 %v6501_v22  ;;  %v6507_v52 = vpack.c.bf16 %v2011_v41, %v1933_v36  ;;  %v1157_v22 = vld [vmem:[#allocation8 + $0xb20] sm:$0xff]  ;;  %v6549_v27 = vpack.c.bf16 %v1236_v17, %v1158_v62  ;;  %v926_v30 = vld [vmem:[#allocation8 + $0x3e8] sm:$0xff]  ;;  %v1391_v41 = vld [vmem:[#allocation8 + $0x1270] sm:$0xff] }
 0x579   : > { %3873 = vmatmul.mubr.f32.vlgmr.msra.gmra.mrb[18].mxu1 %v7669_v24  ;;  %5241 = vst [vmem:[%s8164_s6 + $0x68] sm:$0xff] %v2954_v34  ;;  %v1314_v31 = vld [vmem:[#allocation8 + $0x1008] sm:$0xff]  ;;  %v6539_v34 = vpack.c.bf16 %v2013_v26, %v1935_v25  ;;  %v1313_v36 = vld [vmem:[#allocation8 + $0x1000] sm:$0xff]  ;;  %v1316_v13 = vld [vmem:[#allocation8 + $0x1018] sm:$0xff] }
 0x57a   : > { %6512 = vmatpush1.bf16.msra.mxu1 %v6511_v50  ;;  %4014 = vmatprep.mubr.f32.mxu1 %v7366_v32  ;;  %v924_v50 = vld [vmem:[#allocation8 + $0x3d8] sm:$0xff]  ;;  %v1859_v25 = vld [vmem:[#allocation8 + $0x2110] sm:$0xff] }
 0x57b   : > { %6514 = vmatprep.subr.bf16.mxu1 %v6513_v53  ;;  %6504 = vmatpush1.bf16.msra.mxu0 %v6503_v35  ;;  %v845_v53 = vld [vmem:[#allocation8 + $0x160] sm:$0xff]  ;;  %v6541_v57 = vpack.c.bf16 %v924_v50, %v846_v48  ;;  %v6551_v35 = vpack.c.bf16 %v1235_v28, %v1157_v22  ;;  %v1470_v48 = vld [vmem:[#allocation8 + $0x14e8] sm:$0xff]  ;;  %v1548_v50 = vld [vmem:[#allocation8 + $0x1758] sm:$0xff] }
 0x57c   : > { %6506 = vmatprep.subr.bf16.mxu0 %v6505_v40  ;;  %v6543_v8 = vpack.c.bf16 %v923_v59, %v845_v53  ;;  %v1469_v53 = vld [vmem:[#allocation8 + $0x14e0] sm:$0xff]  ;;  %v1547_v59 = vld [vmem:[#allocation8 + $0x1750] sm:$0xff]  ;;  %v1472_v26 = vld [vmem:[#allocation8 + $0x14f8] sm:$0xff] }
 0x57d   : > { %v1393_v22 = vld [vmem:[#allocation8 + $0x1280] sm:$0xff]  ;;  %v927_v60 = vld [vmem:[#allocation8 + $0x3f0] sm:$0xff]  ;;  %v1784_v49 = vld [vmem:[#allocation8 + $0x1eb8] sm:$0xff] }
 0x57e   : > { %6516 = vmatpush1.bf16.msra.mxu1 %v6515_v3  ;;  %v1080_v3 = vld [vmem:[#allocation8 + $0x8b8] sm:$0xff] }
 0x57f   : > { %6518 = vmatprep.subr.bf16.mxu1 %v6517_v7  ;;  %v6531_v7 = vpack.c.bf16 %v1701_v56, %v1623_v55  ;;  %6508 = vmatpush1.bf16.msra.mxu0 %v6507_v52  ;;  %v6545_v12 = vpack.c.bf16 %v1080_v3, %v1002_v1  ;;  %v6555_v52 = vpack.c.bf16 %v1391_v41, %v1313_v36  ;;  %v1003_v55 = vld [vmem:[#allocation8 + $0x650] sm:$0xff]  ;;  %v1081_v56 = vld [vmem:[#allocation8 + $0x8c0] sm:$0xff]  ;;  %v1626_v1 = vld [vmem:[#allocation8 + $0x19c8] sm:$0xff] }
 0x580   : > { %6542 = vmatprep.subr.bf16.mxu0 %v6541_v57  ;;  %v6557_v57 = vpack.c.bf16 %v1548_v50, %v1470_v48  ;;  %v1704_v3 = vld [vmem:[#allocation8 + $0x1c38] sm:$0xff]  ;;  %v1706_v48 = vld [vmem:[#allocation8 + $0x1c48] sm:$0xff] }
 0x581   : > { %v6561_v5 = vpack.c.bf16 %v1704_v3, %v1626_v1  ;;  %v850_v50 = vld [vmem:[#allocation8 + $0x188] sm:$0xff] }
 0x582   : > { %6520 = vmatpush1.bf16.msra.mxu1 %v6519_v16  ;;  %v2014_v16 = vld [vmem:[#allocation8 + $0x25e8] sm:$0xff]  ;;  %3944 = vmatmul.mubr.f32.vlgmr.msra.gmra.mrb[20].mxu0 %v7669_v24 }
 0x583   : > { %6522 = vmatprep.subr.bf16.mxu1 %v6521_v19  ;;  %6544 = vmatpush1.bf16.msra.mxu0 %v6543_v8  ;;  %v6537_v23 = vpack.c.bf16 %v2014_v16, %v1936_v15  ;;  %v1625_v8 = vld [vmem:[#allocation8 + $0x19c0] sm:$0xff]  ;;  %v1782_v15 = vld [vmem:[#allocation8 + $0x1ea8] sm:$0xff]  ;;  %v1860_v16 = vld [vmem:[#allocation8 + $0x2118] sm:$0xff] }
 0x584   : > { %6546 = vmatprep.subr.bf16.mxu0 %v6545_v12  ;;  %4085 = vmatprep.mubr.f32.mxu0 %v7366_v32  ;;  %v1703_v12 = vld [vmem:[#allocation8 + $0x1c30] sm:$0xff]  ;;  %v1862_v1 = vld [vmem:[#allocation8 + $0x2128] sm:$0xff] }
 0x585   : > { %v1006_v3 = vld [vmem:[#allocation8 + $0x668] sm:$0xff] }
 0x586   : > { %6524 = vmatpush1.bf16.msra.mxu1 %v6523_v33  ;;  %v1392_v33 = vld [vmem:[#allocation8 + $0x1278] sm:$0xff] }
 0x587   : > { %6526 = vmatprep.subr.bf16.mxu1 %v6525_v37  ;;  %6548 = vmatpush1.bf16.msra.mxu0 %v6547_v21  ;;  %v6573_v37 = vpack.c.bf16 %v926_v30, %v848_v29  ;;  %v6553_v40 = vpack.c.bf16 %v1392_v33, %v1314_v31  ;;  %v1315_v21 = vld [vmem:[#allocation8 + $0x1010] sm:$0xff]  ;;  %v1938_v29 = vld [vmem:[#allocation8 + $0x2388] sm:$0xff]  ;;  %v2016_v30 = vld [vmem:[#allocation8 + $0x25f8] sm:$0xff] }
 0x588   : > { %6550 = vmatprep.subr.bf16.mxu0 %v6549_v27  ;;  %v1550_v27 = vld [vmem:[#allocation8 + $0x1768] sm:$0xff]  ;;  %v6569_v41 = vpack.c.bf16 %v2016_v30, %v1938_v29  ;;  %v1239_v30 = vld [vmem:[#allocation8 + $0xdb0] sm:$0xff] }
 0x58a   : > { %6528 = vmatpush1.bf16.msra.mxu1 %v6527_v51  ;;  %v6575_v51 = vpack.c.bf16 %v925_v39, %v847_v38  ;;  %v6589_v38 = vpack.c.bf16 %v1550_v27, %v1472_v26  ;;  %v1471_v39 = vld [vmem:[#allocation8 + $0x14f0] sm:$0xff] }
 0x58b   : > { %6530 = vmatprep.subr.bf16.mxu1 %v6529_v54  ;;  %6552 = vmatpush1.bf16.msra.mxu0 %v6551_v35  ;;  %v6577_v54 = vpack.c.bf16 %v1082_v44, %v1004_v42  ;;  %v2015_v42 = vld [vmem:[#allocation8 + $0x25f0] sm:$0xff]  ;;  %v1628_v44 = vld [vmem:[#allocation8 + $0x19d8] sm:$0xff] }
 0x58c   : > { %v3022_v14 = vpop.f32.mrb[6].mxu1  ;;  %6554 = vmatprep.subr.bf16.mxu0 %v6553_v40  ;;  %v1549_v40 = vld [vmem:[#allocation8 + $0x1760] sm:$0xff]  ;;  %v1939_v27 = vld [vmem:[#allocation8 + $0x2390] sm:$0xff] }
 0x58d   : > { %v3023_v18 = vadd.f32 %v3022_v14, %v2128_v4  ;;  %v3024_v19 = vpop.f32.mrb[7].mxu1  ;;  %v7828_v4 = vld [vmem:[#allocation10 + $0x10] sm:$0xff]  ;;  %v1394_v14 = vld [vmem:[#allocation8 + $0x1288] sm:$0xff] }
 0x58e   : > { %v3025_v0 = vadd.f32 %v3024_v19, %v2132_v6  ;;  %6532 = vmatpush1.bf16.msra.mxu1 %v6531_v7  ;;  %v6579_v6 = vpack.c.bf16 %v1081_v56, %v1003_v55  ;;  %v6559_v7 = vpack.c.bf16 %v1547_v59, %v1469_v53  ;;  %v2136_v62 = vrot.slane %v7828_v4, %v7707_v63  ;;  %v1627_v56 = vld [vmem:[#allocation8 + $0x19d0] sm:$0xff] }
 0x58f   : > { %5242 = vst [vmem:[%s8164_s6 + $0x70] sm:$0xff] %v3023_v18  ;;  %6534 = vmatprep.subr.bf16.mxu1 %v6533_v10  ;;  %6556 = vmatpush1.bf16.msra.mxu0 %v6555_v52  ;;  %v1159_v10 = vld [vmem:[#allocation8 + $0xb30] sm:$0xff]  ;;  %v2140_v18 = vrot.slane %v7828_v4, %v7711_v2  ;;  %v6563_v19 = vpack.c.bf16 %v1703_v12, %v1625_v8 }
 0x590   : > { %5243 = vst [vmem:[%s8164_s6 + $0x78] sm:$0xff] %v3025_v0  ;;  %6558 = vmatprep.subr.bf16.mxu0 %v6557_v57  ;;  %v6583_v17 = vpack.c.bf16 %v1237_v11, %v1159_v10  ;;  %v1781_v0 = vld [vmem:[#allocation8 + $0x1ea0] sm:$0xff]  ;;  %v6591_v52 = vpack.c.bf16 %v1549_v40, %v1471_v39  ;;  %v6593_v55 = vpack.c.bf16 %v1706_v48, %v1628_v44  ;;  %v1783_v12 = vld [vmem:[#allocation8 + $0x1eb0] sm:$0xff]  ;;  %v1008_v48 = vld [vmem:[#allocation8 + $0x678] sm:$0xff] }
 0x591   : > { %v6567_v36 = vpack.c.bf16 %v1859_v25, %v1781_v0  ;;  %v1705_v57 = vld [vmem:[#allocation8 + $0x1c40] sm:$0xff]  ;;  %v2148_v8 = vrot.slane %v7828_v4, %v7727_v47  ;;  %v851_v40 = vld [vmem:[#allocation8 + $0x190] sm:$0xff] }
 0x592   : > { %6536 = vmatpush1.bf16.msra.mxu1 %v6535_v20  ;;  %v6585_v20 = vpack.c.bf16 %v1394_v14, %v1316_v13  ;;  %v1005_v11 = vld [vmem:[#allocation8 + $0x660] sm:$0xff]  ;;  %v1395_v44 = vld [vmem:[#allocation8 + $0x1290] sm:$0xff] }
 0x593   : > { %6538 = vmatprep.subr.bf16.mxu1 %v6537_v23  ;;  %6560 = vmatpush1.bf16.msra.mxu0 %v6559_v7  ;;  %v6565_v23 = vpack.c.bf16 %v1860_v16, %v1782_v15  ;;  %v2144_v7 = vrot.slane %v7828_v4, %v7724_v45  ;;  %v1861_v13 = vld [vmem:[#allocation8 + $0x2120] sm:$0xff]  ;;  %v1083_v15 = vld [vmem:[#allocation8 + $0x8d0] sm:$0xff] }
 0x594   : > { %6562 = vmatprep.subr.bf16.mxu0 %v6561_v5  ;;  %v6597_v5 = vpack.c.bf16 %v1862_v1, %v1784_v49  ;;  %v1161_v25 = vld [vmem:[#allocation8 + $0xb40] sm:$0xff]  ;;  %v1551_v49 = vld [vmem:[#allocation8 + $0x1770] sm:$0xff]  ;;  %v1164_v1 = vld [vmem:[#allocation8 + $0xb58] sm:$0xff] }
 0x595   : > { %v3093_v28 = vpop.f32.mrb[8].mxu0 }
 0x596   : > { %6540 = vmatpush1.bf16.msra.mxu1 %v6539_v34  ;;  %v3094_v31 = vadd.f32 %v3093_v28, %v2136_v62  ;;  %v3095_v33 = vpop.f32.mrb[9].mxu0  ;;  %v6587_v34 = vpack.c.bf16 %v1393_v22, %v1315_v21  ;;  %v1940_v62 = vld [vmem:[#allocation8 + $0x2398] sm:$0xff]  ;;  %v6599_v22 = vpack.c.bf16 %v1861_v13, %v1783_v12  ;;  %v2017_v28 = vld [vmem:[#allocation8 + $0x2600] sm:$0xff] }
 0x597   : > { %6574 = vmatprep.subr.bf16.mxu1 %v6573_v37  ;;  %v3096_v35 = vadd.f32 %v3095_v33, %v2140_v18  ;;  %6564 = vmatpush1.bf16.msra.mxu0 %v6563_v19  ;;  %v1937_v37 = vld [vmem:[#allocation8 + $0x2380] sm:$0xff]  ;;  %v1162_v18 = vld [vmem:[#allocation8 + $0xb48] sm:$0xff]  ;;  %v1240_v19 = vld [vmem:[#allocation8 + $0xdb8] sm:$0xff] }
 0x598   : > { %5244 = vst [vmem:[%s8164_s6 + $0x80] sm:$0xff] %v3094_v31  ;;  %6566 = vmatprep.subr.bf16.mxu0 %v6565_v23  ;;  %v6571_v53 = vpack.c.bf16 %v2015_v42, %v1937_v37  ;;  %v6611_v23 = vpack.c.bf16 %v1083_v15, %v1005_v11  ;;  %v6613_v29 = vpack.c.bf16 %v1240_v19, %v1162_v18  ;;  %v852_v31 = vld [vmem:[#allocation8 + $0x198] sm:$0xff]  ;;  %v930_v33 = vld [vmem:[#allocation8 + $0x408] sm:$0xff]  ;;  %v1241_v12 = vld [vmem:[#allocation8 + $0xdc0] sm:$0xff] }
 0x599   : > { %4015 = vmatmul.mubr.f32.vlgmr.msra.gmra.mrb[20].mxu1 %v7669_v24  ;;  %5245 = vst [vmem:[%s8164_s6 + $0x88] sm:$0xff] %v3096_v35  ;;  %v1396_v35 = vld [vmem:[#allocation8 + $0x1298] sm:$0xff]  ;;  %v6615_v37 = vpack.c.bf16 %v1239_v30, %v1161_v25  ;;  %v6637_v39 = vpack.c.bf16 %v930_v33, %v852_v31  ;;  %v2152_v18 = vrot.slane %v7828_v4, %v7743_v58  ;;  %v1397_v25 = vld [vmem:[#allocation8 + $0x12a0] sm:$0xff]  ;;  %v1942_v31 = vld [vmem:[#allocation8 + $0x23a8] sm:$0xff] }
 0x59a   : > { %6576 = vmatpush1.bf16.msra.mxu1 %v6575_v51  ;;  %4156 = vmatprep.mubr.f32.mxu1 %v7366_v32  ;;  %v928_v51 = vld [vmem:[#allocation8 + $0x3f8] sm:$0xff] }
 0x59b   : > { %6578 = vmatprep.subr.bf16.mxu1 %v6577_v54  ;;  %6568 = vmatpush1.bf16.msra.mxu0 %v6567_v36  ;;  %v849_v54 = vld [vmem:[#allocation8 + $0x180] sm:$0xff]  ;;  %v6605_v59 = vpack.c.bf16 %v928_v51, %v850_v50  ;;  %v6603_v36 = vpack.c.bf16 %v2017_v28, %v1939_v27  ;;  %v1086_v50 = vld [vmem:[#allocation8 + $0x8e8] sm:$0xff]  ;;  %v1320_v15 = vld [vmem:[#allocation8 + $0x1038] sm:$0xff] }
 0x59c   : > { %6570 = vmatprep.subr.bf16.mxu0 %v6569_v41  ;;  %v6607_v10 = vpack.c.bf16 %v927_v60, %v849_v54  ;;  %v929_v41 = vld [vmem:[#allocation8 + $0x400] sm:$0xff]  ;;  %v1474_v51 = vld [vmem:[#allocation8 + $0x1508] sm:$0xff]  ;;  %v1863_v27 = vld [vmem:[#allocation8 + $0x2130] sm:$0xff] }
 0x59d   : > { %v1476_v28 = vld [vmem:[#allocation8 + $0x1518] sm:$0xff] }
 0x59e   : > { %6580 = vmatpush1.bf16.msra.mxu1 %v6579_v6  ;;  %v1084_v6 = vld [vmem:[#allocation8 + $0x8d8] sm:$0xff] }
 0x59f   : > { %6582 = vmatprep.subr.bf16.mxu1 %v6581_v9  ;;  %v6595_v9 = vpack.c.bf16 %v1705_v57, %v1627_v56  ;;  %6572 = vmatpush1.bf16.msra.mxu0 %v6571_v53  ;;  %v6609_v14 = vpack.c.bf16 %v1084_v6, %v1006_v3  ;;  %v6639_v53 = vpack.c.bf16 %v929_v41, %v851_v40  ;;  %v1007_v57 = vld [vmem:[#allocation8 + $0x670] sm:$0xff]  ;;  %v1242_v3 = vld [vmem:[#allocation8 + $0xdc8] sm:$0xff]  ;;  %v2020_v33 = vld [vmem:[#allocation8 + $0x2618] sm:$0xff] }
 0x5a0   : > { %6606 = vmatprep.subr.bf16.mxu0 %v6605_v59  ;;  %v6641_v56 = vpack.c.bf16 %v1086_v50, %v1008_v48  ;;  %v1085_v59 = vld [vmem:[#allocation8 + $0x8e0] sm:$0xff]  ;;  %v1630_v6 = vld [vmem:[#allocation8 + $0x19e8] sm:$0xff]  ;;  %v6645_v11 = vpack.c.bf16 %v1242_v3, %v1164_v1  ;;  %v1475_v41 = vld [vmem:[#allocation8 + $0x1510] sm:$0xff] }
 0x5a1   : > { %v2019_v48 = vld [vmem:[#allocation8 + $0x2610] sm:$0xff]  ;;  %v1632_v50 = vld [vmem:[#allocation8 + $0x19f8] sm:$0xff] }
 0x5a2   : > { %6584 = vmatpush1.bf16.msra.mxu1 %v6583_v17  ;;  %v2018_v17 = vld [vmem:[#allocation8 + $0x2608] sm:$0xff]  ;;  %4086 = vmatmul.mubr.f32.vlgmr.msra.gmra.mrb[22].mxu0 %v7669_v24  ;;  %v931_v1 = vld [vmem:[#allocation8 + $0x410] sm:$0xff]  ;;  %v1788_v3 = vld [vmem:[#allocation8 + $0x1ed8] sm:$0xff] }
 0x5a3   : > { %6586 = vmatprep.subr.bf16.mxu1 %v6585_v20  ;;  %6608 = vmatpush1.bf16.msra.mxu0 %v6607_v10  ;;  %v6601_v26 = vpack.c.bf16 %v2018_v17, %v1940_v62  ;;  %v1629_v10 = vld [vmem:[#allocation8 + $0x19e0] sm:$0xff]  ;;  %v1786_v62 = vld [vmem:[#allocation8 + $0x1ec8] sm:$0xff]  ;;  %v1864_v17 = vld [vmem:[#allocation8 + $0x2138] sm:$0xff] }
 0x5a4   : > { %6610 = vmatprep.subr.bf16.mxu0 %v6609_v14  ;;  %4227 = vmatprep.mubr.f32.mxu0 %v7366_v32  ;;  %v1707_v14 = vld [vmem:[#allocation8 + $0x1c50] sm:$0xff] }
 0x5a6   : > { %6588 = vmatpush1.bf16.msra.mxu1 %v6587_v34  ;;  %v1318_v34 = vld [vmem:[#allocation8 + $0x1028] sm:$0xff] }
 0x5a7   : > { %6590 = vmatprep.subr.bf16.mxu1 %v6589_v38  ;;  %6612 = vmatpush1.bf16.msra.mxu0 %v6611_v23  ;;  %v1317_v38 = vld [vmem:[#allocation8 + $0x1020] sm:$0xff]  ;;  %v6617_v42 = vpack.c.bf16 %v1396_v35, %v1318_v34  ;;  %v1319_v23 = vld [vmem:[#allocation8 + $0x1030] sm:$0xff] }
 0x5a8   : > { %6614 = vmatprep.subr.bf16.mxu0 %v6613_v29  ;;  %v6619_v54 = vpack.c.bf16 %v1395_v44, %v1317_v38  ;;  %v1554_v29 = vld [vmem:[#allocation8 + $0x1788] sm:$0xff]  ;;  %v6633_v44 = vpack.c.bf16 %v2020_v33, %v1942_v31  ;;  %v1243_v31 = vld [vmem:[#allocation8 + $0xdd0] sm:$0xff]  ;;  %v856_v33 = vld [vmem:[#allocation8 + $0x1b8] sm:$0xff] }
 0x5a9   : > { %v6653_v40 = vpack.c.bf16 %v1554_v29, %v1476_v28  ;;  %v1943_v28 = vld [vmem:[#allocation8 + $0x23b0] sm:$0xff]  ;;  %v2021_v29 = vld [vmem:[#allocation8 + $0x2620] sm:$0xff] }
 0x5aa   : > { %6592 = vmatpush1.bf16.msra.mxu1 %v6591_v52  ;;  %v1552_v52 = vld [vmem:[#allocation8 + $0x1778] sm:$0xff] }
 0x5ab   : > { %6594 = vmatprep.subr.bf16.mxu1 %v6593_v55  ;;  %6616 = vmatpush1.bf16.msra.mxu0 %v6615_v37  ;;  %v1473_v55 = vld [vmem:[#allocation8 + $0x1500] sm:$0xff]  ;;  %v6621_v60 = vpack.c.bf16 %v1552_v52, %v1474_v51  ;;  %v1710_v51 = vld [vmem:[#allocation8 + $0x1c68] sm:$0xff] }
 0x5ac   : > { %v3164_v16 = vpop.f32.mrb[8].mxu1  ;;  %6618 = vmatprep.subr.bf16.mxu0 %v6617_v42  ;;  %v1553_v42 = vld [vmem:[#allocation8 + $0x1780] sm:$0xff]  ;;  %v854_v52 = vld [vmem:[#allocation8 + $0x1a8] sm:$0xff] }
 0x5ad   : > { %v3165_v0 = vadd.f32 %v3164_v16, %v2144_v7  ;;  %v3166_v20 = vpop.f32.mrb[9].mxu1  ;;  %v1708_v7 = vld [vmem:[#allocation8 + $0x1c58] sm:$0xff]  ;;  %v1398_v16 = vld [vmem:[#allocation8 + $0x12a8] sm:$0xff] }
 0x5ae   : > { %v3167_v21 = vadd.f32 %v3166_v20, %v2148_v8  ;;  %6596 = vmatpush1.bf16.msra.mxu1 %v6595_v9  ;;  %v6643_v8 = vpack.c.bf16 %v1085_v59, %v1007_v57  ;;  %v6623_v9 = vpack.c.bf16 %v1551_v49, %v1473_v55  ;;  %v6625_v13 = vpack.c.bf16 %v1708_v7, %v1630_v6  ;;  %v1631_v59 = vld [vmem:[#allocation8 + $0x19f0] sm:$0xff]  ;;  %v1866_v6 = vld [vmem:[#allocation8 + $0x2148] sm:$0xff] }
 0x5af   : > { %5246 = vst [vmem:[%s8164_s6 + $0x90] sm:$0xff] %v3165_v0  ;;  %6598 = vmatprep.subr.bf16.mxu1 %v6597_v5  ;;  %6620 = vmatpush1.bf16.msra.mxu0 %v6619_v54  ;;  %v1163_v5 = vld [vmem:[#allocation8 + $0xb50] sm:$0xff]  ;;  %v2156_v0 = vrot.slane %v7828_v4, %v7747_v61  ;;  %v6627_v20 = vpack.c.bf16 %v1707_v14, %v1629_v10  ;;  %v1010_v7 = vld [vmem:[#allocation8 + $0x688] sm:$0xff] }
 0x5b0   : > { %5247 = vst [vmem:[%s8164_s6 + $0x98] sm:$0xff] %v3167_v21  ;;  %6622 = vmatprep.subr.bf16.mxu0 %v6621_v60  ;;  %v6647_v19 = vpack.c.bf16 %v1241_v12, %v1163_v5  ;;  %v1785_v21 = vld [vmem:[#allocation8 + $0x1ec0] sm:$0xff]  ;;  %v6655_v54 = vpack.c.bf16 %v1553_v42, %v1475_v41  ;;  %v6657_v57 = vpack.c.bf16 %v1710_v51, %v1632_v50  ;;  %v1787_v14 = vld [vmem:[#allocation8 + $0x1ed0] sm:$0xff]  ;;  %v1012_v50 = vld [vmem:[#allocation8 + $0x698] sm:$0xff] }
 0x5b1   : > { %v6631_v38 = vpack.c.bf16 %v1863_v27, %v1785_v21  ;;  %v1709_v60 = vld [vmem:[#allocation8 + $0x1c60] sm:$0xff]  ;;  %v2164_v10 = vrot.slane %v7828_v4, %v7763_v46  ;;  %v855_v41 = vld [vmem:[#allocation8 + $0x1b0] sm:$0xff]  ;;  %v1090_v51 = vld [vmem:[#allocation8 + $0x908] sm:$0xff] }
 0x5b2   : > { %6600 = vmatpush1.bf16.msra.mxu1 %v6599_v22  ;;  %v6649_v22 = vpack.c.bf16 %v1398_v16, %v1320_v15  ;;  %v1009_v12 = vld [vmem:[#allocation8 + $0x680] sm:$0xff] }
 0x5b3   : > { %6602 = vmatprep.subr.bf16.mxu1 %v6601_v26  ;;  %6624 = vmatpush1.bf16.msra.mxu0 %v6623_v9  ;;  %v6629_v26 = vpack.c.bf16 %v1864_v17, %v1786_v62  ;;  %v2160_v9 = vrot.slane %v7828_v4, %v7760_v43  ;;  %v1865_v15 = vld [vmem:[#allocation8 + $0x2140] sm:$0xff]  ;;  %v1087_v62 = vld [vmem:[#allocation8 + $0x8f0] sm:$0xff] }
 0x5b4   : > { %6626 = vmatprep.subr.bf16.mxu0 %v6625_v13  ;;  %v6661_v13 = vpack.c.bf16 %v1866_v6, %v1788_v3  ;;  %v933_v42 = vld [vmem:[#allocation8 + $0x420] sm:$0xff]  ;;  %v1168_v3 = vld [vmem:[#allocation8 + $0xb78] sm:$0xff]  ;;  %v1246_v6 = vld [vmem:[#allocation8 + $0xde8] sm:$0xff] }
 0x5b5   : > { %v3235_v30 = vpop.f32.mrb[10].mxu0 }
 0x5b6   : > { %6604 = vmatpush1.bf16.msra.mxu1 %v6603_v36  ;;  %v3236_v34 = vadd.f32 %v3235_v30, %v2152_v18  ;;  %v3237_v35 = vpop.f32.mrb[11].mxu0  ;;  %v6651_v36 = vpack.c.bf16 %v1397_v25, %v1319_v23  ;;  %v1944_v18 = vld [vmem:[#allocation8 + $0x23b8] sm:$0xff]  ;;  %v6663_v23 = vpack.c.bf16 %v1865_v15, %v1787_v14  ;;  %v6675_v25 = vpack.c.bf16 %v1087_v62, %v1009_v12  ;;  %v1245_v14 = vld [vmem:[#allocation8 + $0xde0] sm:$0xff] }
 0x5b7   : > { %6638 = vmatprep.subr.bf16.mxu1 %v6637_v39  ;;  %v3238_v37 = vadd.f32 %v3237_v35, %v2156_v0  ;;  %6628 = vmatpush1.bf16.msra.mxu0 %v6627_v20  ;;  %v1941_v39 = vld [vmem:[#allocation8 + $0x23a0] sm:$0xff]  ;;  %v1166_v0 = vld [vmem:[#allocation8 + $0xb68] sm:$0xff]  ;;  %v1244_v20 = vld [vmem:[#allocation8 + $0xdd8] sm:$0xff]  ;;  %v6709_v12 = vpack.c.bf16 %v1246_v6, %v1168_v3 }
 0x5b8   : > { %5248 = vst [vmem:[%s8164_s6 + $0xa0] sm:$0xff] %v3236_v34  ;;  %6630 = vmatprep.subr.bf16.mxu0 %v6629_v26  ;;  %v6635_v55 = vpack.c.bf16 %v2019_v48, %v1941_v39  ;;  %v1165_v26 = vld [vmem:[#allocation8 + $0xb60] sm:$0xff]  ;;  %v6677_v30 = vpack.c.bf16 %v1244_v20, %v1166_v0  ;;  %v934_v34 = vld [vmem:[#allocation8 + $0x428] sm:$0xff]  ;;  %v1399_v48 = vld [vmem:[#allocation8 + $0x12b0] sm:$0xff] }
 0x5b9   : > { %4157 = vmatmul.mubr.f32.vlgmr.msra.gmra.mrb[22].mxu1 %v7669_v24  ;;  %5249 = vst [vmem:[%s8164_s6 + $0xa8] sm:$0xff] %v3238_v37  ;;  %v1322_v35 = vld [vmem:[#allocation8 + $0x1048] sm:$0xff]  ;;  %v6667_v37 = vpack.c.bf16 %v2021_v29, %v1943_v28  ;;  %v1321_v39 = vld [vmem:[#allocation8 + $0x1040] sm:$0xff]  ;;  %v1324_v62 = vld [vmem:[#allocation8 + $0x1058] sm:$0xff] }
 0x5ba   : > { %6640 = vmatpush1.bf16.msra.mxu1 %v6639_v53  ;;  %4298 = vmatprep.mubr.f32.mxu1 %v7366_v32  ;;  %v932_v53 = vld [vmem:[#allocation8 + $0x418] sm:$0xff]  ;;  %v1867_v28 = vld [vmem:[#allocation8 + $0x2150] sm:$0xff] }
 0x5bb   : > { %6642 = vmatprep.subr.bf16.mxu1 %v6641_v56  ;;  %6632 = vmatpush1.bf16.msra.mxu0 %v6631_v38  ;;  %v853_v56 = vld [vmem:[#allocation8 + $0x1a0] sm:$0xff]  ;;  %v6669_v49 = vpack.c.bf16 %v932_v53, %v854_v52  ;;  %v6679_v38 = vpack.c.bf16 %v1243_v31, %v1165_v26  ;;  %v1478_v52 = vld [vmem:[#allocation8 + $0x1528] sm:$0xff]  ;;  %v1556_v53 = vld [vmem:[#allocation8 + $0x1798] sm:$0xff] }
 0x5bc   : > { %6634 = vmatprep.subr.bf16.mxu0 %v6633_v44  ;;  %v6671_v5 = vpack.c.bf16 %v931_v1, %v853_v56  ;;  %v1477_v56 = vld [vmem:[#allocation8 + $0x1520] sm:$0xff]  ;;  %v1555_v1 = vld [vmem:[#allocation8 + $0x1790] sm:$0xff]  ;;  %v1480_v29 = vld [vmem:[#allocation8 + $0x1538] sm:$0xff] }
 0x5bd   : > { %v1401_v26 = vld [vmem:[#allocation8 + $0x12c0] sm:$0xff]  ;;  %v935_v3 = vld [vmem:[#allocation8 + $0x430] sm:$0xff]  ;;  %v1792_v6 = vld [vmem:[#allocation8 + $0x1ef8] sm:$0xff] }
 0x5be   : > { %6644 = vmatpush1.bf16.msra.mxu1 %v6643_v8  ;;  %v1088_v8 = vld [vmem:[#allocation8 + $0x8f8] sm:$0xff] }
 0x5bf   : > { %6646 = vmatprep.subr.bf16.mxu1 %v6645_v11  ;;  %v6659_v11 = vpack.c.bf16 %v1709_v60, %v1631_v59  ;;  %6636 = vmatpush1.bf16.msra.mxu0 %v6635_v55  ;;  %v6673_v16 = vpack.c.bf16 %v1088_v8, %v1010_v7  ;;  %v6683_v55 = vpack.c.bf16 %v1399_v48, %v1321_v39  ;;  %v1011_v59 = vld [vmem:[#allocation8 + $0x690] sm:$0xff]  ;;  %v1089_v60 = vld [vmem:[#allocation8 + $0x900] sm:$0xff]  ;;  %v1634_v7 = vld [vmem:[#allocation8 + $0x1a08] sm:$0xff] }
 0x5c0   : > { %6670 = vmatprep.subr.bf16.mxu0 %v6669_v49  ;;  %v6685_v49 = vpack.c.bf16 %v1556_v53, %v1478_v52  ;;  %v1712_v8 = vld [vmem:[#allocation8 + $0x1c78] sm:$0xff]  ;;  %v1714_v52 = vld [vmem:[#allocation8 + $0x1c88] sm:$0xff] }
 0x5c1   : > { %v6689_v15 = vpack.c.bf16 %v1712_v8, %v1634_v7  ;;  %v858_v53 = vld [vmem:[#allocation8 + $0x1c8] sm:$0xff] }
 0x5c2   : > { %6648 = vmatpush1.bf16.msra.mxu1 %v6647_v19  ;;  %v2022_v19 = vld [vmem:[#allocation8 + $0x2628] sm:$0xff]  ;;  %4228 = vmatmul.mubr.f32.vlgmr.msra.gmra.mrb[24].mxu0 %v7669_v24 }
 0x5c3   : > { %6650 = vmatprep.subr.bf16.mxu1 %v6649_v22  ;;  %6672 = vmatpush1.bf16.msra.mxu0 %v6671_v5  ;;  %v6665_v27 = vpack.c.bf16 %v2022_v19, %v1944_v18  ;;  %v1633_v5 = vld [vmem:[#allocation8 + $0x1a00] sm:$0xff]  ;;  %v1790_v18 = vld [vmem:[#allocation8 + $0x1ee8] sm:$0xff]  ;;  %v1868_v19 = vld [vmem:[#allocation8 + $0x2158] sm:$0xff] }
 0x5c4   : > { %6674 = vmatprep.subr.bf16.mxu0 %v6673_v16  ;;  %4369 = vmatprep.mubr.f32.mxu0 %v7366_v32  ;;  %v1711_v16 = vld [vmem:[#allocation8 + $0x1c70] sm:$0xff]  ;;  %v1870_v7 = vld [vmem:[#allocation8 + $0x2168] sm:$0xff] }
 0x5c5   : > { %v1014_v8 = vld [vmem:[#allocation8 + $0x6a8] sm:$0xff] }
 0x5c6   : > { %6652 = vmatpush1.bf16.msra.mxu1 %v6651_v36  ;;  %v1400_v36 = vld [vmem:[#allocation8 + $0x12b8] sm:$0xff] }
 0x5c7   : > { %6654 = vmatprep.subr.bf16.mxu1 %v6653_v40  ;;  %6676 = vmatpush1.bf16.msra.mxu0 %v6675_v25  ;;  %v6701_v40 = vpack.c.bf16 %v934_v34, %v856_v33  ;;  %v6681_v44 = vpack.c.bf16 %v1400_v36, %v1322_v35  ;;  %v1323_v25 = vld [vmem:[#allocation8 + $0x1050] sm:$0xff]  ;;  %v1946_v33 = vld [vmem:[#allocation8 + $0x23c8] sm:$0xff]  ;;  %v2024_v34 = vld [vmem:[#allocation8 + $0x2638] sm:$0xff] }
 0x5c8   : > { %6678 = vmatprep.subr.bf16.mxu0 %v6677_v30  ;;  %v1558_v30 = vld [vmem:[#allocation8 + $0x17a8] sm:$0xff]  ;;  %v6697_v48 = vpack.c.bf16 %v2024_v34, %v1946_v33  ;;  %v1247_v34 = vld [vmem:[#allocation8 + $0xdf0] sm:$0xff] }
 0x5ca   : > { %6656 = vmatpush1.bf16.msra.mxu1 %v6655_v54  ;;  %v6703_v54 = vpack.c.bf16 %v933_v42, %v855_v41  ;;  %v6717_v41 = vpack.c.bf16 %v1558_v30, %v1480_v29  ;;  %v1479_v42 = vld [vmem:[#allocation8 + $0x1530] sm:$0xff] }
 0x5cb   : > { %6658 = vmatprep.subr.bf16.mxu1 %v6657_v57  ;;  %6680 = vmatpush1.bf16.msra.mxu0 %v6679_v38  ;;  %v6705_v57 = vpack.c.bf16 %v1090_v51, %v1012_v50  ;;  %v2023_v50 = vld [vmem:[#allocation8 + $0x2630] sm:$0xff]  ;;  %v1636_v51 = vld [vmem:[#allocation8 + $0x1a18] sm:$0xff] }
 0x5cc   : > { %v3306_v17 = vpop.f32.mrb[10].mxu1  ;;  %6682 = vmatprep.subr.bf16.mxu0 %v6681_v44  ;;  %v1557_v44 = vld [vmem:[#allocation8 + $0x17a0] sm:$0xff]  ;;  %v1947_v30 = vld [vmem:[#allocation8 + $0x23d0] sm:$0xff] }
 0x5cd   : > { %v3307_v21 = vadd.f32 %v3306_v17, %v2160_v9  ;;  %v3308_v22 = vpop.f32.mrb[11].mxu1  ;;  %v7878_v9 = vld [vmem:[#allocation10 + $0x18] sm:$0xff]  ;;  %v1402_v17 = vld [vmem:[#allocation8 + $0x12c8] sm:$0xff] }
 0x5ce   : > { %v3309_v4 = vadd.f32 %v3308_v22, %v2164_v10  ;;  %6660 = vmatpush1.bf16.msra.mxu1 %v6659_v11  ;;  %v6707_v10 = vpack.c.bf16 %v1089_v60, %v1011_v59  ;;  %v6687_v11 = vpack.c.bf16 %v1555_v1, %v1477_v56  ;;  %v2168_v0 = vrot.slane %v7878_v9, %v7707_v63  ;;  %v1635_v60 = vld [vmem:[#allocation8 + $0x1a10] sm:$0xff] }
 0x5cf   : > { %5250 = vst [vmem:[%s8164_s6 + $0xb0] sm:$0xff] %v3307_v21  ;;  %6662 = vmatprep.subr.bf16.mxu1 %v6661_v13  ;;  %6684 = vmatpush1.bf16.msra.mxu0 %v6683_v55  ;;  %v1167_v13 = vld [vmem:[#allocation8 + $0xb70] sm:$0xff]  ;;  %v2172_v21 = vrot.slane %v7878_v9, %v7711_v2  ;;  %v6691_v22 = vpack.c.bf16 %v1711_v16, %v1633_v5 }
 0x5d0   : > { %5251 = vst [vmem:[%s8164_s6 + $0xb8] sm:$0xff] %v3309_v4  ;;  %6686 = vmatprep.subr.bf16.mxu0 %v6685_v49  ;;  %v6711_v20 = vpack.c.bf16 %v1245_v14, %v1167_v13  ;;  %v1789_v4 = vld [vmem:[#allocation8 + $0x1ee0] sm:$0xff]  ;;  %v6719_v55 = vpack.c.bf16 %v1557_v44, %v1479_v42  ;;  %v6721_v59 = vpack.c.bf16 %v1714_v52, %v1636_v51  ;;  %v1791_v16 = vld [vmem:[#allocation8 + $0x1ef0] sm:$0xff]  ;;  %v1016_v52 = vld [vmem:[#allocation8 + $0x6b8] sm:$0xff] }
 0x5d1   : > { %v6695_v39 = vpack.c.bf16 %v1867_v28, %v1789_v4  ;;  %v1713_v49 = vld [vmem:[#allocation8 + $0x1c80] sm:$0xff]  ;;  %v2180_v5 = vrot.slane %v7878_v9, %v7727_v47  ;;  %v859_v44 = vld [vmem:[#allocation8 + $0x1d0] sm:$0xff] }
 0x5d2   : > { %6664 = vmatpush1.bf16.msra.mxu1 %v6663_v23  ;;  %v6713_v23 = vpack.c.bf16 %v1402_v17, %v1324_v62  ;;  %v1013_v14 = vld [vmem:[#allocation8 + $0x6a0] sm:$0xff]  ;;  %v1403_v51 = vld [vmem:[#allocation8 + $0x12d0] sm:$0xff] }
 0x5d3   : > { %6666 = vmatprep.subr.bf16.mxu1 %v6665_v27  ;;  %6688 = vmatpush1.bf16.msra.mxu0 %v6687_v11  ;;  %v6693_v27 = vpack.c.bf16 %v1868_v19, %v1790_v18  ;;  %v2176_v11 = vrot.slane %v7878_v9, %v7724_v45  ;;  %v1869_v62 = vld [vmem:[#allocation8 + $0x2160] sm:$0xff]  ;;  %v1091_v18 = vld [vmem:[#allocation8 + $0x910] sm:$0xff] }
 0x5d4   : > { %6690 = vmatprep.subr.bf16.mxu0 %v6689_v15  ;;  %v6725_v15 = vpack.c.bf16 %v1870_v7, %v1792_v6  ;;  %v1169_v28 = vld [vmem:[#allocation8 + $0xb80] sm:$0xff]  ;;  %v1559_v6 = vld [vmem:[#allocation8 + $0x17b0] sm:$0xff]  ;;  %v1172_v7 = vld [vmem:[#allocation8 + $0xb98] sm:$0xff] }
 0x5d5   : > { %v3377_v31 = vpop.f32.mrb[12].mxu0 }
 0x5d6   : > { %6668 = vmatpush1.bf16.msra.mxu1 %v6667_v37  ;;  %v3378_v35 = vadd.f32 %v3377_v31, %v2168_v0  ;;  %v3379_v36 = vpop.f32.mrb[13].mxu0  ;;  %v6715_v37 = vpack.c.bf16 %v1401_v26, %v1323_v25  ;;  %v1948_v0 = vld [vmem:[#allocation8 + $0x23d8] sm:$0xff]  ;;  %v6727_v26 = vpack.c.bf16 %v1869_v62, %v1791_v16  ;;  %v2025_v31 = vld [vmem:[#allocation8 + $0x2640] sm:$0xff] }
 0x5d7   : > { %6702 = vmatprep.subr.bf16.mxu1 %v6701_v40  ;;  %v3380_v38 = vadd.f32 %v3379_v36, %v2172_v21  ;;  %6692 = vmatpush1.bf16.msra.mxu0 %v6691_v22  ;;  %v1945_v40 = vld [vmem:[#allocation8 + $0x23c0] sm:$0xff]  ;;  %v1170_v21 = vld [vmem:[#allocation8 + $0xb88] sm:$0xff]  ;;  %v1248_v22 = vld [vmem:[#allocation8 + $0xdf8] sm:$0xff] }
 0x5d8   : > { %5252 = vst [vmem:[%s8164_s6 + $0xc0] sm:$0xff] %v3378_v35  ;;  %6694 = vmatprep.subr.bf16.mxu0 %v6693_v27  ;;  %v6699_v56 = vpack.c.bf16 %v2023_v50, %v1945_v40  ;;  %v6739_v27 = vpack.c.bf16 %v1091_v18, %v1013_v14  ;;  %v6741_v33 = vpack.c.bf16 %v1248_v22, %v1170_v21  ;;  %v860_v35 = vld [vmem:[#allocation8 + $0x1d8] sm:$0xff]  ;;  %v938_v36 = vld [vmem:[#allocation8 + $0x448] sm:$0xff]  ;;  %v1249_v16 = vld [vmem:[#allocation8 + $0xe00] sm:$0xff] }
 0x5d9   : > { %4299 = vmatmul.mubr.f32.vlgmr.msra.gmra.mrb[24].mxu1 %v7669_v24  ;;  %5253 = vst [vmem:[%s8164_s6 + $0xc8] sm:$0xff] %v3380_v38  ;;  %v1404_v38 = vld [vmem:[#allocation8 + $0x12d8] sm:$0xff]  ;;  %v6743_v40 = vpack.c.bf16 %v1247_v34, %v1169_v28  ;;  %v6765_v42 = vpack.c.bf16 %v938_v36, %v860_v35  ;;  %v2184_v21 = vrot.slane %v7878_v9, %v7743_v58  ;;  %v1405_v28 = vld [vmem:[#allocation8 + $0x12e0] sm:$0xff]  ;;  %v1950_v35 = vld [vmem:[#allocation8 + $0x23e8] sm:$0xff] }
 0x5da   : > { %6704 = vmatpush1.bf16.msra.mxu1 %v6703_v54  ;;  %4440 = vmatprep.mubr.f32.mxu1 %v7366_v32  ;;  %v936_v54 = vld [vmem:[#allocation8 + $0x438] sm:$0xff] }
 0x5db   : > { %6706 = vmatprep.subr.bf16.mxu1 %v6705_v57  ;;  %6696 = vmatpush1.bf16.msra.mxu0 %v6695_v39  ;;  %v857_v57 = vld [vmem:[#allocation8 + $0x1c0] sm:$0xff]  ;;  %v6733_v1 = vpack.c.bf16 %v936_v54, %v858_v53  ;;  %v6731_v39 = vpack.c.bf16 %v2025_v31, %v1947_v30  ;;  %v1094_v53 = vld [vmem:[#allocation8 + $0x928] sm:$0xff]  ;;  %v1328_v18 = vld [vmem:[#allocation8 + $0x1078] sm:$0xff] }
 0x5dc   : > { %6698 = vmatprep.subr.bf16.mxu0 %v6697_v48  ;;  %v6735_v13 = vpack.c.bf16 %v935_v3, %v857_v57  ;;  %v937_v48 = vld [vmem:[#allocation8 + $0x440] sm:$0xff]  ;;  %v1482_v54 = vld [vmem:[#allocation8 + $0x1548] sm:$0xff]  ;;  %v1871_v30 = vld [vmem:[#allocation8 + $0x2170] sm:$0xff] }
 0x5dd   : > { %v1484_v31 = vld [vmem:[#allocation8 + $0x1558] sm:$0xff] }
 0x5de   : > { %6708 = vmatpush1.bf16.msra.mxu1 %v6707_v10  ;;  %v1092_v10 = vld [vmem:[#allocation8 + $0x918] sm:$0xff] }
 0x5df   : > { %6710 = vmatprep.subr.bf16.mxu1 %v6709_v12  ;;  %v6723_v12 = vpack.c.bf16 %v1713_v49, %v1635_v60  ;;  %6700 = vmatpush1.bf16.msra.mxu0 %v6699_v56  ;;  %v6737_v17 = vpack.c.bf16 %v1092_v10, %v1014_v8  ;;  %v6767_v56 = vpack.c.bf16 %v937_v48, %v859_v44  ;;  %v1015_v49 = vld [vmem:[#allocation8 + $0x6b0] sm:$0xff]  ;;  %v1250_v8 = vld [vmem:[#allocation8 + $0xe08] sm:$0xff]  ;;  %v2028_v36 = vld [vmem:[#allocation8 + $0x2658] sm:$0xff] }
 0x5e0   : > { %6734 = vmatprep.subr.bf16.mxu0 %v6733_v1  ;;  %v6769_v60 = vpack.c.bf16 %v1094_v53, %v1016_v52  ;;  %v1093_v1 = vld [vmem:[#allocation8 + $0x920] sm:$0xff]  ;;  %v1638_v10 = vld [vmem:[#allocation8 + $0x1a28] sm:$0xff]  ;;  %v6773_v14 = vpack.c.bf16 %v1250_v8, %v1172_v7  ;;  %v1483_v48 = vld [vmem:[#allocation8 + $0x1550] sm:$0xff] }
 0x5e1   : > { %v2027_v52 = vld [vmem:[#allocation8 + $0x2650] sm:$0xff]  ;;  %v1640_v53 = vld [vmem:[#allocation8 + $0x1a38] sm:$0xff] }
 0x5e2   : > { %6712 = vmatpush1.bf16.msra.mxu1 %v6711_v20  ;;  %v2026_v20 = vld [vmem:[#allocation8 + $0x2648] sm:$0xff]  ;;  %4370 = vmatmul.mubr.f32.vlgmr.msra.gmra.mrb[26].mxu0 %v7669_v24  ;;  %v939_v7 = vld [vmem:[#allocation8 + $0x450] sm:$0xff]  ;;  %v1796_v8 = vld [vmem:[#allocation8 + $0x1f18] sm:$0xff] }
 0x5e3   : > { %6714 = vmatprep.subr.bf16.mxu1 %v6713_v23  ;;  %6736 = vmatpush1.bf16.msra.mxu0 %v6735_v13  ;;  %v6729_v29 = vpack.c.bf16 %v2026_v20, %v1948_v0  ;;  %v1637_v13 = vld [vmem:[#allocation8 + $0x1a20] sm:$0xff]  ;;  %v1794_v0 = vld [vmem:[#allocation8 + $0x1f08] sm:$0xff]  ;;  %v1872_v20 = vld [vmem:[#allocation8 + $0x2178] sm:$0xff] }
 0x5e4   : > { %6738 = vmatprep.subr.bf16.mxu0 %v6737_v17  ;;  %4511 = vmatprep.mubr.f32.mxu0 %v7366_v32  ;;  %v1715_v17 = vld [vmem:[#allocation8 + $0x1c90] sm:$0xff] }
 0x5e6   : > { %6716 = vmatpush1.bf16.msra.mxu1 %v6715_v37  ;;  %v1326_v37 = vld [vmem:[#allocation8 + $0x1068] sm:$0xff] }
 0x5e7   : > { %6718 = vmatprep.subr.bf16.mxu1 %v6717_v41  ;;  %6740 = vmatpush1.bf16.msra.mxu0 %v6739_v27  ;;  %v1325_v41 = vld [vmem:[#allocation8 + $0x1060] sm:$0xff]  ;;  %v6745_v50 = vpack.c.bf16 %v1404_v38, %v1326_v37  ;;  %v1327_v27 = vld [vmem:[#allocation8 + $0x1070] sm:$0xff] }
 0x5e8   : > { %6742 = vmatprep.subr.bf16.mxu0 %v6741_v33  ;;  %v6747_v57 = vpack.c.bf16 %v1403_v51, %v1325_v41  ;;  %v1562_v33 = vld [vmem:[#allocation8 + $0x17c8] sm:$0xff]  ;;  %v6761_v51 = vpack.c.bf16 %v2028_v36, %v1950_v35  ;;  %v1251_v35 = vld [vmem:[#allocation8 + $0xe10] sm:$0xff]  ;;  %v864_v36 = vld [vmem:[#allocation8 + $0x1f8] sm:$0xff] }
 0x5e9   : > { %v6781_v44 = vpack.c.bf16 %v1562_v33, %v1484_v31  ;;  %v1951_v31 = vld [vmem:[#allocation8 + $0x23f0] sm:$0xff]  ;;  %v2029_v33 = vld [vmem:[#allocation8 + $0x2660] sm:$0xff] }
 0x5ea   : > { %6720 = vmatpush1.bf16.msra.mxu1 %v6719_v55  ;;  %v1560_v55 = vld [vmem:[#allocation8 + $0x17b8] sm:$0xff] }
 0x5eb   : > { %6722 = vmatprep.subr.bf16.mxu1 %v6721_v59  ;;  %6744 = vmatpush1.bf16.msra.mxu0 %v6743_v40  ;;  %v1481_v59 = vld [vmem:[#allocation8 + $0x1540] sm:$0xff]  ;;  %v6749_v3 = vpack.c.bf16 %v1560_v55, %v1482_v54  ;;  %v1718_v54 = vld [vmem:[#allocation8 + $0x1ca8] sm:$0xff] }
 0x5ec   : > { %v3448_v19 = vpop.f32.mrb[12].mxu1  ;;  %6746 = vmatprep.subr.bf16.mxu0 %v6745_v50  ;;  %v1561_v50 = vld [vmem:[#allocation8 + $0x17c0] sm:$0xff]  ;;  %v862_v55 = vld [vmem:[#allocation8 + $0x1e8] sm:$0xff] }
 0x5ed   : > { %v3449_v4 = vadd.f32 %v3448_v19, %v2176_v11  ;;  %v3450_v23 = vpop.f32.mrb[13].mxu1  ;;  %v1716_v11 = vld [vmem:[#allocation8 + $0x1c98] sm:$0xff]  ;;  %v1406_v19 = vld [vmem:[#allocation8 + $0x12e8] sm:$0xff] }
 0x5ee   : > { %v3451_v25 = vadd.f32 %v3450_v23, %v2180_v5  ;;  %6724 = vmatpush1.bf16.msra.mxu1 %v6723_v12  ;;  %v6771_v5 = vpack.c.bf16 %v1093_v1, %v1015_v49  ;;  %v6751_v12 = vpack.c.bf16 %v1559_v6, %v1481_v59  ;;  %v6753_v62 = vpack.c.bf16 %v1716_v11, %v1638_v10  ;;  %v1639_v1 = vld [vmem:[#allocation8 + $0x1a30] sm:$0xff]  ;;  %v1874_v10 = vld [vmem:[#allocation8 + $0x2188] sm:$0xff] }
 0x5ef   : > { %5254 = vst [vmem:[%s8164_s6 + $0xd0] sm:$0xff] %v3449_v4  ;;  %6726 = vmatprep.subr.bf16.mxu1 %v6725_v15  ;;  %6748 = vmatpush1.bf16.msra.mxu0 %v6747_v57  ;;  %v1171_v15 = vld [vmem:[#allocation8 + $0xb90] sm:$0xff]  ;;  %v2188_v4 = vrot.slane %v7878_v9, %v7747_v61  ;;  %v6755_v23 = vpack.c.bf16 %v1715_v17, %v1637_v13  ;;  %v1018_v11 = vld [vmem:[#allocation8 + $0x6c8] sm:$0xff] }
 0x5f0   : > { %5255 = vst [vmem:[%s8164_s6 + $0xd8] sm:$0xff] %v3451_v25  ;;  %6750 = vmatprep.subr.bf16.mxu0 %v6749_v3  ;;  %v6775_v22 = vpack.c.bf16 %v1249_v16, %v1171_v15  ;;  %v1793_v25 = vld [vmem:[#allocation8 + $0x1f00] sm:$0xff]  ;;  %v6783_v57 = vpack.c.bf16 %v1561_v50, %v1483_v48  ;;  %v6785_v49 = vpack.c.bf16 %v1718_v54, %v1640_v53  ;;  %v1795_v17 = vld [vmem:[#allocation8 + $0x1f10] sm:$0xff]  ;;  %v1020_v53 = vld [vmem:[#allocation8 + $0x6d8] sm:$0xff] }
 0x5f1   : > { %v6759_v41 = vpack.c.bf16 %v1871_v30, %v1793_v25  ;;  %v1717_v3 = vld [vmem:[#allocation8 + $0x1ca0] sm:$0xff]  ;;  %v2196_v13 = vrot.slane %v7878_v9, %v7763_v46  ;;  %v863_v48 = vld [vmem:[#allocation8 + $0x1f0] sm:$0xff]  ;;  %v1098_v54 = vld [vmem:[#allocation8 + $0x948] sm:$0xff] }
 0x5f2   : > { %6728 = vmatpush1.bf16.msra.mxu1 %v6727_v26  ;;  %v6777_v26 = vpack.c.bf16 %v1406_v19, %v1328_v18  ;;  %v1017_v16 = vld [vmem:[#allocation8 + $0x6c0] sm:$0xff] }
 0x5f3   : > { %6730 = vmatprep.subr.bf16.mxu1 %v6729_v29  ;;  %6752 = vmatpush1.bf16.msra.mxu0 %v6751_v12  ;;  %v6757_v29 = vpack.c.bf16 %v1872_v20, %v1794_v0  ;;  %v2192_v12 = vrot.slane %v7878_v9, %v7760_v43  ;;  %v1873_v18 = vld [vmem:[#allocation8 + $0x2180] sm:$0xff]  ;;  %v1095_v0 = vld [vmem:[#allocation8 + $0x930] sm:$0xff] }
 0x5f4   : > { %6754 = vmatprep.subr.bf16.mxu0 %v6753_v62  ;;  %v6789_v62 = vpack.c.bf16 %v1874_v10, %v1796_v8  ;;  %v941_v50 = vld [vmem:[#allocation8 + $0x460] sm:$0xff]  ;;  %v1176_v8 = vld [vmem:[#allocation8 + $0xbb8] sm:$0xff]  ;;  %v1254_v10 = vld [vmem:[#allocation8 + $0xe28] sm:$0xff] }
 0x5f5   : > { %v3519_v34 = vpop.f32.mrb[14].mxu0 }
 0x5f6   : > { %6732 = vmatpush1.bf16.msra.mxu1 %v6731_v39  ;;  %v3520_v37 = vadd.f32 %v3519_v34, %v2184_v21  ;;  %v3521_v38 = vpop.f32.mrb[15].mxu0  ;;  %v6779_v39 = vpack.c.bf16 %v1405_v28, %v1327_v27  ;;  %v1952_v21 = vld [vmem:[#allocation8 + $0x23f8] sm:$0xff]  ;;  %v6791_v27 = vpack.c.bf16 %v1873_v18, %v1795_v17  ;;  %v6803_v28 = vpack.c.bf16 %v1095_v0, %v1017_v16  ;;  %v1253_v17 = vld [vmem:[#allocation8 + $0xe20] sm:$0xff] }
 0x5f7   : > { %6766 = vmatprep.subr.bf16.mxu1 %v6765_v42  ;;  %v3522_v40 = vadd.f32 %v3521_v38, %v2188_v4  ;;  %6756 = vmatpush1.bf16.msra.mxu0 %v6755_v23  ;;  %v1949_v42 = vld [vmem:[#allocation8 + $0x23e0] sm:$0xff]  ;;  %v1174_v4 = vld [vmem:[#allocation8 + $0xba8] sm:$0xff]  ;;  %v1252_v23 = vld [vmem:[#allocation8 + $0xe18] sm:$0xff]  ;;  %v6837_v16 = vpack.c.bf16 %v1254_v10, %v1176_v8 }
 0x5f8   : > { %5256 = vst [vmem:[%s8164_s6 + $0xe0] sm:$0xff] %v3520_v37  ;;  %6758 = vmatprep.subr.bf16.mxu0 %v6757_v29  ;;  %v6763_v59 = vpack.c.bf16 %v2027_v52, %v1949_v42  ;;  %v1173_v29 = vld [vmem:[#allocation8 + $0xba0] sm:$0xff]  ;;  %v6805_v34 = vpack.c.bf16 %v1252_v23, %v1174_v4  ;;  %v942_v37 = vld [vmem:[#allocation8 + $0x468] sm:$0xff]  ;;  %v1407_v52 = vld [vmem:[#allocation8 + $0x12f0] sm:$0xff] }
 0x5f9   : > { %4441 = vmatmul.mubr.f32.vlgmr.msra.gmra.mrb[26].mxu1 %v7669_v24  ;;  %5257 = vst [vmem:[%s8164_s6 + $0xe8] sm:$0xff] %v3522_v40  ;;  %v1330_v38 = vld [vmem:[#allocation8 + $0x1088] sm:$0xff]  ;;  %v6795_v40 = vpack.c.bf16 %v2029_v33, %v1951_v31  ;;  %v1329_v42 = vld [vmem:[#allocation8 + $0x1080] sm:$0xff]  ;;  %v1332_v0 = vld [vmem:[#allocation8 + $0x1098] sm:$0xff] }
 0x5fa   : > { %6768 = vmatpush1.bf16.msra.mxu1 %v6767_v56  ;;  %4582 = vmatprep.mubr.f32.mxu1 %v7366_v32  ;;  %v940_v56 = vld [vmem:[#allocation8 + $0x458] sm:$0xff]  ;;  %v1875_v31 = vld [vmem:[#allocation8 + $0x2190] sm:$0xff] }
 0x5fb   : > { %6770 = vmatprep.subr.bf16.mxu1 %v6769_v60  ;;  %6760 = vmatpush1.bf16.msra.mxu0 %v6759_v41  ;;  %v861_v60 = vld [vmem:[#allocation8 + $0x1e0] sm:$0xff]  ;;  %v6797_v6 = vpack.c.bf16 %v940_v56, %v862_v55  ;;  %v6807_v41 = vpack.c.bf16 %v1251_v35, %v1173_v29  ;;  %v1486_v55 = vld [vmem:[#allocation8 + $0x1568] sm:$0xff]  ;;  %v1564_v56 = vld [vmem:[#allocation8 + $0x17d8] sm:$0xff] }
 0x5fc   : > { %6762 = vmatprep.subr.bf16.mxu0 %v6761_v51  ;;  %v6799_v15 = vpack.c.bf16 %v939_v7, %v861_v60  ;;  %v1485_v60 = vld [vmem:[#allocation8 + $0x1560] sm:$0xff]  ;;  %v1563_v7 = vld [vmem:[#allocation8 + $0x17d0] sm:$0xff]  ;;  %v1488_v33 = vld [vmem:[#allocation8 + $0x1578] sm:$0xff] }
 0x5fd   : > { %v1409_v29 = vld [vmem:[#allocation8 + $0x1300] sm:$0xff]  ;;  %v943_v8 = vld [vmem:[#allocation8 + $0x470] sm:$0xff]  ;;  %v1800_v10 = vld [vmem:[#allocation8 + $0x1f38] sm:$0xff] }
 0x5fe   : > { %6772 = vmatpush1.bf16.msra.mxu1 %v6771_v5  ;;  %v1096_v5 = vld [vmem:[#allocation8 + $0x938] sm:$0xff] }
 0x5ff   : > { %6774 = vmatprep.subr.bf16.mxu1 %v6773_v14  ;;  %v6787_v14 = vpack.c.bf16 %v1717_v3, %v1639_v1  ;;  %6764 = vmatpush1.bf16.msra.mxu0 %v6763_v59  ;;  %v6801_v19 = vpack.c.bf16 %v1096_v5, %v1018_v11  ;;  %v6811_v59 = vpack.c.bf16 %v1407_v52, %v1329_v42  ;;  %v1019_v1 = vld [vmem:[#allocation8 + $0x6d0] sm:$0xff]  ;;  %v1097_v3 = vld [vmem:[#allocation8 + $0x940] sm:$0xff]  ;;  %v1642_v11 = vld [vmem:[#allocation8 + $0x1a48] sm:$0xff] }
 0x600   : > { %6798 = vmatprep.subr.bf16.mxu0 %v6797_v6  ;;  %v6813_v6 = vpack.c.bf16 %v1564_v56, %v1486_v55  ;;  %v1720_v5 = vld [vmem:[#allocation8 + $0x1cb8] sm:$0xff]  ;;  %v1722_v55 = vld [vmem:[#allocation8 + $0x1cc8] sm:$0xff] }
 0x601   : > { %v6817_v18 = vpack.c.bf16 %v1720_v5, %v1642_v11  ;;  %v866_v56 = vld [vmem:[#allocation8 + $0x208] sm:$0xff] }
 0x602   : > { %6776 = vmatpush1.bf16.msra.mxu1 %v6775_v22  ;;  %v2030_v22 = vld [vmem:[#allocation8 + $0x2668] sm:$0xff]  ;;  %4512 = vmatmul.mubr.f32.vlgmr.msra.gmra.mrb[28].mxu0 %v7669_v24 }
 0x603   : > { %6778 = vmatprep.subr.bf16.mxu1 %v6777_v26  ;;  %6800 = vmatpush1.bf16.msra.mxu0 %v6799_v15  ;;  %v6793_v30 = vpack.c.bf16 %v2030_v22, %v1952_v21  ;;  %v1641_v15 = vld [vmem:[#allocation8 + $0x1a40] sm:$0xff]  ;;  %v1798_v21 = vld [vmem:[#allocation8 + $0x1f28] sm:$0xff]  ;;  %v1876_v22 = vld [vmem:[#allocation8 + $0x2198] sm:$0xff] }
 0x604   : > { %6802 = vmatprep.subr.bf16.mxu0 %v6801_v19  ;;  %4653 = vmatprep.mubr.f32.mxu0 %v7366_v32  ;;  %v1719_v19 = vld [vmem:[#allocation8 + $0x1cb0] sm:$0xff]  ;;  %v1878_v11 = vld [vmem:[#allocation8 + $0x21a8] sm:$0xff] }
 0x605   : > { %v1022_v5 = vld [vmem:[#allocation8 + $0x6e8] sm:$0xff] }
 0x606   : > { %6780 = vmatpush1.bf16.msra.mxu1 %v6779_v39  ;;  %v1408_v39 = vld [vmem:[#allocation8 + $0x12f8] sm:$0xff] }
 0x607   : > { %6782 = vmatprep.subr.bf16.mxu1 %v6781_v44  ;;  %6804 = vmatpush1.bf16.msra.mxu0 %v6803_v28  ;;  %v6829_v44 = vpack.c.bf16 %v942_v37, %v864_v36  ;;  %v6809_v51 = vpack.c.bf16 %v1408_v39, %v1330_v38  ;;  %v1331_v28 = vld [vmem:[#allocation8 + $0x1090] sm:$0xff]  ;;  %v1954_v36 = vld [vmem:[#allocation8 + $0x2408] sm:$0xff]  ;;  %v2032_v37 = vld [vmem:[#allocation8 + $0x2678] sm:$0xff] }
 0x608   : > { %6806 = vmatprep.subr.bf16.mxu0 %v6805_v34  ;;  %v1566_v34 = vld [vmem:[#allocation8 + $0x17e8] sm:$0xff]  ;;  %v6825_v52 = vpack.c.bf16 %v2032_v37, %v1954_v36  ;;  %v1255_v37 = vld [vmem:[#allocation8 + $0xe30] sm:$0xff] }
 0x60a   : > { %6784 = vmatpush1.bf16.msra.mxu1 %v6783_v57  ;;  %v6831_v57 = vpack.c.bf16 %v941_v50, %v863_v48  ;;  %v6845_v48 = vpack.c.bf16 %v1566_v34, %v1488_v33  ;;  %v1487_v50 = vld [vmem:[#allocation8 + $0x1570] sm:$0xff] }
 0x60b   : > { %6786 = vmatprep.subr.bf16.mxu1 %v6785_v49  ;;  %6808 = vmatpush1.bf16.msra.mxu0 %v6807_v41  ;;  %v6833_v49 = vpack.c.bf16 %v1098_v54, %v1020_v53  ;;  %v2031_v53 = vld [vmem:[#allocation8 + $0x2670] sm:$0xff]  ;;  %v1644_v54 = vld [vmem:[#allocation8 + $0x1a58] sm:$0xff] }
 0x60c   : > { %v3590_v20 = vpop.f32.mrb[14].mxu1  ;;  %6810 = vmatprep.subr.bf16.mxu0 %v6809_v51  ;;  %v1565_v51 = vld [vmem:[#allocation8 + $0x17e0] sm:$0xff]  ;;  %v1955_v34 = vld [vmem:[#allocation8 + $0x2410] sm:$0xff] }
 0x60d   : > { %v3591_v25 = vadd.f32 %v3590_v20, %v2192_v12  ;;  %v3592_v26 = vpop.f32.mrb[15].mxu1  ;;  %v7928_v12 = vld [vmem:[#allocation10 + $0x20] sm:$0xff]  ;;  %v1410_v20 = vld [vmem:[#allocation8 + $0x1308] sm:$0xff] }
 0x60e   : > { %v3593_v9 = vadd.f32 %v3592_v26, %v2196_v13  ;;  %6788 = vmatpush1.bf16.msra.mxu1 %v6787_v14  ;;  %v6835_v13 = vpack.c.bf16 %v1097_v3, %v1019_v1  ;;  %v6815_v14 = vpack.c.bf16 %v1563_v7, %v1485_v60  ;;  %v2200_v4 = vrot.slane %v7928_v12, %v7707_v63  ;;  %v1643_v3 = vld [vmem:[#allocation8 + $0x1a50] sm:$0xff] }
 0x60f   : > { %5258 = vst [vmem:[%s8164_s6 + $0xf0] sm:$0xff] %v3591_v25  ;;  %6790 = vmatprep.subr.bf16.mxu1 %v6789_v62  ;;  %6812 = vmatpush1.bf16.msra.mxu0 %v6811_v59  ;;  %v1175_v62 = vld [vmem:[#allocation8 + $0xbb0] sm:$0xff]  ;;  %v2204_v25 = vrot.slane %v7928_v12, %v7711_v2  ;;  %v6819_v26 = vpack.c.bf16 %v1719_v19, %v1641_v15 }
 0x610   : > { %5259 = vst [vmem:[%s8164_s6 + $0xf8] sm:$0xff] %v3593_v9  ;;  %6814 = vmatprep.subr.bf16.mxu0 %v6813_v6  ;;  %v6839_v23 = vpack.c.bf16 %v1253_v17, %v1175_v62  ;;  %v1797_v9 = vld [vmem:[#allocation8 + $0x1f20] sm:$0xff]  ;;  %v6847_v59 = vpack.c.bf16 %v1565_v51, %v1487_v50  ;;  %v6849_v1 = vpack.c.bf16 %v1722_v55, %v1644_v54  ;;  %v1799_v19 = vld [vmem:[#allocation8 + $0x1f30] sm:$0xff]  ;;  %v1024_v55 = vld [vmem:[#allocation8 + $0x6f8] sm:$0xff] }
 0x611   : > { %v6823_v42 = vpack.c.bf16 %v1875_v31, %v1797_v9  ;;  %v1721_v6 = vld [vmem:[#allocation8 + $0x1cc0] sm:$0xff]  ;;  %v2212_v15 = vrot.slane %v7928_v12, %v7727_v47  ;;  %v867_v51 = vld [vmem:[#allocation8 + $0x210] sm:$0xff] }
 0x612   : > { %6792 = vmatpush1.bf16.msra.mxu1 %v6791_v27  ;;  %v6841_v27 = vpack.c.bf16 %v1410_v20, %v1332_v0  ;;  %v1021_v17 = vld [vmem:[#allocation8 + $0x6e0] sm:$0xff]  ;;  %v1411_v54 = vld [vmem:[#allocation8 + $0x1310] sm:$0xff] }
 0x613   : > { %6794 = vmatprep.subr.bf16.mxu1 %v6793_v30  ;;  %6816 = vmatpush1.bf16.msra.mxu0 %v6815_v14  ;;  %v6821_v30 = vpack.c.bf16 %v1876_v22, %v1798_v21  ;;  %v2208_v14 = vrot.slane %v7928_v12, %v7724_v45  ;;  %v1877_v0 = vld [vmem:[#allocation8 + $0x21a0] sm:$0xff]  ;;  %v1099_v21 = vld [vmem:[#allocation8 + $0x950] sm:$0xff] }
 0x614   : > { %6818 = vmatprep.subr.bf16.mxu0 %v6817_v18  ;;  %v6853_v18 = vpack.c.bf16 %v1878_v11, %v1800_v10  ;;  %v1177_v31 = vld [vmem:[#allocation8 + $0xbc0] sm:$0xff]  ;;  %v1567_v10 = vld [vmem:[#allocation8 + $0x17f0] sm:$0xff]  ;;  %v1180_v11 = vld [vmem:[#allocation8 + $0xbd8] sm:$0xff] }
 0x615   : > { %v3661_v35 = vpop.f32.mrb[16].mxu0 }
 0x616   : > { %6796 = vmatpush1.bf16.msra.mxu1 %v6795_v40  ;;  %v3662_v38 = vadd.f32 %v3661_v35, %v2200_v4  ;;  %v3663_v39 = vpop.f32.mrb[17].mxu0  ;;  %v6843_v40 = vpack.c.bf16 %v1409_v29, %v1331_v28  ;;  %v1956_v4 = vld [vmem:[#allocation8 + $0x2418] sm:$0xff]  ;;  %v6855_v29 = vpack.c.bf16 %v1877_v0, %v1799_v19  ;;  %v2033_v35 = vld [vmem:[#allocation8 + $0x2680] sm:$0xff] }
 0x617   : > { %6830 = vmatprep.subr.bf16.mxu1 %v6829_v44  ;;  %v3664_v41 = vadd.f32 %v3663_v39, %v2204_v25  ;;  %6820 = vmatpush1.bf16.msra.mxu0 %v6819_v26  ;;  %v1953_v44 = vld [vmem:[#allocation8 + $0x2400] sm:$0xff]  ;;  %v1178_v25 = vld [vmem:[#allocation8 + $0xbc8] sm:$0xff]  ;;  %v1256_v26 = vld [vmem:[#allocation8 + $0xe38] sm:$0xff] }
 0x618   : > { %5260 = vst [vmem:[%s8164_s6 + $0x100] sm:$0xff] %v3662_v38  ;;  %6822 = vmatprep.subr.bf16.mxu0 %v6821_v30  ;;  %v6827_v60 = vpack.c.bf16 %v2031_v53, %v1953_v44  ;;  %v6867_v30 = vpack.c.bf16 %v1099_v21, %v1021_v17  ;;  %v6869_v36 = vpack.c.bf16 %v1256_v26, %v1178_v25  ;;  %v868_v38 = vld [vmem:[#allocation8 + $0x218] sm:$0xff]  ;;  %v946_v39 = vld [vmem:[#allocation8 + $0x488] sm:$0xff]  ;;  %v1257_v19 = vld [vmem:[#allocation8 + $0xe40] sm:$0xff] }
 0x619   : > { %4583 = vmatmul.mubr.f32.vlgmr.msra.gmra.mrb[28].mxu1 %v7669_v24  ;;  %5261 = vst [vmem:[%s8164_s6 + $0x108] sm:$0xff] %v3664_v41  ;;  %v1412_v41 = vld [vmem:[#allocation8 + $0x1318] sm:$0xff]  ;;  %v6871_v44 = vpack.c.bf16 %v1255_v37, %v1177_v31  ;;  %v6893_v50 = vpack.c.bf16 %v946_v39, %v868_v38  ;;  %v2216_v25 = vrot.slane %v7928_v12, %v7743_v58  ;;  %v1413_v31 = vld [vmem:[#allocation8 + $0x1320] sm:$0xff]  ;;  %v1958_v38 = vld [vmem:[#allocation8 + $0x2428] sm:$0xff] }
 0x61a   : > { %6832 = vmatpush1.bf16.msra.mxu1 %v6831_v57  ;;  %4724 = vmatprep.mubr.f32.mxu1 %v7366_v32  ;;  %v944_v57 = vld [vmem:[#allocation8 + $0x478] sm:$0xff] }
 0x61b   : > { %6834 = vmatprep.subr.bf16.mxu1 %v6833_v49  ;;  %6824 = vmatpush1.bf16.msra.mxu0 %v6823_v42  ;;  %v865_v49 = vld [vmem:[#allocation8 + $0x200] sm:$0xff]  ;;  %v6861_v7 = vpack.c.bf16 %v944_v57, %v866_v56  ;;  %v6859_v42 = vpack.c.bf16 %v2033_v35, %v1955_v34  ;;  %v1102_v56 = vld [vmem:[#allocation8 + $0x968] sm:$0xff]  ;;  %v1336_v21 = vld [vmem:[#allocation8 + $0x10b8] sm:$0xff] }
 0x61c   : > { %6826 = vmatprep.subr.bf16.mxu0 %v6825_v52  ;;  %v6863_v62 = vpack.c.bf16 %v943_v8, %v865_v49  ;;  %v945_v52 = vld [vmem:[#allocation8 + $0x480] sm:$0xff]  ;;  %v1490_v57 = vld [vmem:[#allocation8 + $0x1588] sm:$0xff]  ;;  %v1879_v34 = vld [vmem:[#allocation8 + $0x21b0] sm:$0xff] }
 0x61d   : > { %v1492_v35 = vld [vmem:[#allocation8 + $0x1598] sm:$0xff] }
 0x61e   : > { %6836 = vmatpush1.bf16.msra.mxu1 %v6835_v13  ;;  %v1100_v13 = vld [vmem:[#allocation8 + $0x958] sm:$0xff] }
 0x61f   : > { %6838 = vmatprep.subr.bf16.mxu1 %v6837_v16  ;;  %v6851_v16 = vpack.c.bf16 %v1721_v6, %v1643_v3  ;;  %6828 = vmatpush1.bf16.msra.mxu0 %v6827_v60  ;;  %v6865_v20 = vpack.c.bf16 %v1100_v13, %v1022_v5  ;;  %v6895_v60 = vpack.c.bf16 %v945_v52, %v867_v51  ;;  %v1023_v6 = vld [vmem:[#allocation8 + $0x6f0] sm:$0xff]  ;;  %v1258_v5 = vld [vmem:[#allocation8 + $0xe48] sm:$0xff]  ;;  %v2036_v39 = vld [vmem:[#allocation8 + $0x2698] sm:$0xff] }
 0x620   : > { %6862 = vmatprep.subr.bf16.mxu0 %v6861_v7  ;;  %v6897_v3 = vpack.c.bf16 %v1102_v56, %v1024_v55  ;;  %v1101_v7 = vld [vmem:[#allocation8 + $0x960] sm:$0xff]  ;;  %v1646_v13 = vld [vmem:[#allocation8 + $0x1a68] sm:$0xff]  ;;  %v6901_v17 = vpack.c.bf16 %v1258_v5, %v1180_v11  ;;  %v1491_v52 = vld [vmem:[#allocation8 + $0x1590] sm:$0xff] }
 0x621   : > { %v2035_v55 = vld [vmem:[#allocation8 + $0x2690] sm:$0xff]  ;;  %v1648_v56 = vld [vmem:[#allocation8 + $0x1a78] sm:$0xff] }
 0x622   : > { %6840 = vmatpush1.bf16.msra.mxu1 %v6839_v23  ;;  %v2034_v23 = vld [vmem:[#allocation8 + $0x2688] sm:$0xff]  ;;  %4654 = vmatmul.mubr.f32.vlgmr.msra.gmra.mrb[30].mxu0 %v7669_v24  ;;  %v947_v11 = vld [vmem:[#allocation8 + $0x490] sm:$0xff]  ;;  %v1804_v5 = vld [vmem:[#allocation8 + $0x1f58] sm:$0xff] }
 0x623   : > { %6842 = vmatprep.subr.bf16.mxu1 %v6841_v27  ;;  %6864 = vmatpush1.bf16.msra.mxu0 %v6863_v62  ;;  %v6857_v33 = vpack.c.bf16 %v2034_v23, %v1956_v4  ;;  %v1645_v62 = vld [vmem:[#allocation8 + $0x1a60] sm:$0xff]  ;;  %v1802_v4 = vld [vmem:[#allocation8 + $0x1f48] sm:$0xff]  ;;  %v1880_v23 = vld [vmem:[#allocation8 + $0x21b8] sm:$0xff] }
 0x624   : > { %6866 = vmatprep.subr.bf16.mxu0 %v6865_v20  ;;  %4795 = vmatprep.mubr.f32.mxu0 %v7366_v32  ;;  %v1723_v20 = vld [vmem:[#allocation8 + $0x1cd0] sm:$0xff] }
 0x626   : > { %6844 = vmatpush1.bf16.msra.mxu1 %v6843_v40  ;;  %v1334_v40 = vld [vmem:[#allocation8 + $0x10a8] sm:$0xff] }
 0x627   : > { %6846 = vmatprep.subr.bf16.mxu1 %v6845_v48  ;;  %6868 = vmatpush1.bf16.msra.mxu0 %v6867_v30  ;;  %v1333_v48 = vld [vmem:[#allocation8 + $0x10a0] sm:$0xff]  ;;  %v6873_v53 = vpack.c.bf16 %v1412_v41, %v1334_v40  ;;  %v1335_v30 = vld [vmem:[#allocation8 + $0x10b0] sm:$0xff] }
 0x628   : > { %6870 = vmatprep.subr.bf16.mxu0 %v6869_v36  ;;  %v6875_v49 = vpack.c.bf16 %v1411_v54, %v1333_v48  ;;  %v1570_v36 = vld [vmem:[#allocation8 + $0x1808] sm:$0xff]  ;;  %v6889_v54 = vpack.c.bf16 %v2036_v39, %v1958_v38  ;;  %v1259_v38 = vld [vmem:[#allocation8 + $0xe50] sm:$0xff]  ;;  %v872_v39 = vld [vmem:[#allocation8 + $0x238] sm:$0xff] }
 0x629   : > { %v6909_v51 = vpack.c.bf16 %v1570_v36, %v1492_v35  ;;  %v1959_v35 = vld [vmem:[#allocation8 + $0x2430] sm:$0xff]  ;;  %v2037_v36 = vld [vmem:[#allocation8 + $0x26a0] sm:$0xff] }
 0x62a   : > { %6848 = vmatpush1.bf16.msra.mxu1 %v6847_v59  ;;  %v1568_v59 = vld [vmem:[#allocation8 + $0x17f8] sm:$0xff] }
 0x62b   : > { %6850 = vmatprep.subr.bf16.mxu1 %v6849_v1  ;;  %6872 = vmatpush1.bf16.msra.mxu0 %v6871_v44  ;;  %v1489_v1 = vld [vmem:[#allocation8 + $0x1580] sm:$0xff]  ;;  %v6877_v8 = vpack.c.bf16 %v1568_v59, %v1490_v57  ;;  %v1726_v57 = vld [vmem:[#allocation8 + $0x1ce8] sm:$0xff] }
 0x62c   : > { %v3732_v22 = vpop.f32.mrb[16].mxu1  ;;  %6874 = vmatprep.subr.bf16.mxu0 %v6873_v53  ;;  %v1569_v53 = vld [vmem:[#allocation8 + $0x1800] sm:$0xff]  ;;  %v870_v59 = vld [vmem:[#allocation8 + $0x228] sm:$0xff] }
 0x62d   : > { %v3733_v9 = vadd.f32 %v3732_v22, %v2208_v14  ;;  %v3734_v27 = vpop.f32.mrb[17].mxu1  ;;  %v1724_v14 = vld [vmem:[#allocation8 + $0x1cd8] sm:$0xff]  ;;  %v1414_v22 = vld [vmem:[#allocation8 + $0x1328] sm:$0xff] }
 0x62e   : > { %v3735_v28 = vadd.f32 %v3734_v27, %v2212_v15  ;;  %6852 = vmatpush1.bf16.msra.mxu1 %v6851_v16  ;;  %v6899_v15 = vpack.c.bf16 %v1101_v7, %v1023_v6  ;;  %v6879_v16 = vpack.c.bf16 %v1567_v10, %v1489_v1  ;;  %v6881_v0 = vpack.c.bf16 %v1724_v14, %v1646_v13  ;;  %v1647_v7 = vld [vmem:[#allocation8 + $0x1a70] sm:$0xff]  ;;  %v1882_v13 = vld [vmem:[#allocation8 + $0x21c8] sm:$0xff] }
 0x62f   : > { %5262 = vst [vmem:[%s8164_s6 + $0x110] sm:$0xff] %v3733_v9  ;;  %6854 = vmatprep.subr.bf16.mxu1 %v6853_v18  ;;  %6876 = vmatpush1.bf16.msra.mxu0 %v6875_v49  ;;  %v1179_v18 = vld [vmem:[#allocation8 + $0xbd0] sm:$0xff]  ;;  %v2220_v9 = vrot.slane %v7928_v12, %v7747_v61  ;;  %v6883_v27 = vpack.c.bf16 %v1723_v20, %v1645_v62  ;;  %v1026_v14 = vld [vmem:[#allocation8 + $0x708] sm:$0xff] }
 0x630   : > { %5263 = vst [vmem:[%s8164_s6 + $0x118] sm:$0xff] %v3735_v28  ;;  %6878 = vmatprep.subr.bf16.mxu0 %v6877_v8  ;;  %v6903_v26 = vpack.c.bf16 %v1257_v19, %v1179_v18  ;;  %v1801_v28 = vld [vmem:[#allocation8 + $0x1f40] sm:$0xff]  ;;  %v6911_v49 = vpack.c.bf16 %v1569_v53, %v1491_v52  ;;  %v6913_v6 = vpack.c.bf16 %v1726_v57, %v1648_v56  ;;  %v1803_v20 = vld [vmem:[#allocation8 + $0x1f50] sm:$0xff]  ;;  %v1028_v56 = vld [vmem:[#allocation8 + $0x718] sm:$0xff] }
 0x631   : > { %v6887_v48 = vpack.c.bf16 %v1879_v34, %v1801_v28  ;;  %v1725_v8 = vld [vmem:[#allocation8 + $0x1ce0] sm:$0xff]  ;;  %v2228_v62 = vrot.slane %v7928_v12, %v7763_v46  ;;  %v871_v52 = vld [vmem:[#allocation8 + $0x230] sm:$0xff]  ;;  %v1106_v57 = vld [vmem:[#allocation8 + $0x988] sm:$0xff] }
 0x632   : > { %6856 = vmatpush1.bf16.msra.mxu1 %v6855_v29  ;;  %v6905_v29 = vpack.c.bf16 %v1414_v22, %v1336_v21  ;;  %v1025_v19 = vld [vmem:[#allocation8 + $0x700] sm:$0xff] }
 0x633   : > { %6858 = vmatprep.subr.bf16.mxu1 %v6857_v33  ;;  %6880 = vmatpush1.bf16.msra.mxu0 %v6879_v16  ;;  %v6885_v33 = vpack.c.bf16 %v1880_v23, %v1802_v4  ;;  %v2224_v16 = vrot.slane %v7928_v12, %v7760_v43  ;;  %v1881_v21 = vld [vmem:[#allocation8 + $0x21c0] sm:$0xff]  ;;  %v1103_v4 = vld [vmem:[#allocation8 + $0x970] sm:$0xff] }
 0x634   : > { %6882 = vmatprep.subr.bf16.mxu0 %v6881_v0  ;;  %v6917_v0 = vpack.c.bf16 %v1882_v13, %v1804_v5  ;;  %v949_v53 = vld [vmem:[#allocation8 + $0x4a0] sm:$0xff]  ;;  %v1184_v5 = vld [vmem:[#allocation8 + $0xbf8] sm:$0xff]  ;;  %v1262_v13 = vld [vmem:[#allocation8 + $0xe68] sm:$0xff] }
 0x635   : > { %v3803_v37 = vpop.f32.mrb[18].mxu0 }
 0x636   : > { %6860 = vmatpush1.bf16.msra.mxu1 %v6859_v42  ;;  %v3804_v40 = vadd.f32 %v3803_v37, %v2216_v25  ;;  %v3805_v41 = vpop.f32.mrb[19].mxu0  ;;  %v6907_v42 = vpack.c.bf16 %v1413_v31, %v1335_v30  ;;  %v1960_v25 = vld [vmem:[#allocation8 + $0x2438] sm:$0xff]  ;;  %v6919_v30 = vpack.c.bf16 %v1881_v21, %v1803_v20  ;;  %v6931_v31 = vpack.c.bf16 %v1103_v4, %v1025_v19  ;;  %v1261_v20 = vld [vmem:[#allocation8 + $0xe60] sm:$0xff] }
 0x637   : > { %6894 = vmatprep.subr.bf16.mxu1 %v6893_v50  ;;  %v3806_v44 = vadd.f32 %v3805_v41, %v2220_v9  ;;  %6884 = vmatpush1.bf16.msra.mxu0 %v6883_v27  ;;  %v1957_v50 = vld [vmem:[#allocation8 + $0x2420] sm:$0xff]  ;;  %v1182_v9 = vld [vmem:[#allocation8 + $0xbe8] sm:$0xff]  ;;  %v1260_v27 = vld [vmem:[#allocation8 + $0xe58] sm:$0xff]  ;;  %v6965_v19 = vpack.c.bf16 %v1262_v13, %v1184_v5 }
 0x638   : > { %5264 = vst [vmem:[%s8164_s6 + $0x120] sm:$0xff] %v3804_v40  ;;  %6886 = vmatprep.subr.bf16.mxu0 %v6885_v33  ;;  %v6891_v1 = vpack.c.bf16 %v2035_v55, %v1957_v50  ;;  %v1181_v33 = vld [vmem:[#allocation8 + $0xbe0] sm:$0xff]  ;;  %v6933_v37 = vpack.c.bf16 %v1260_v27, %v1182_v9  ;;  %v950_v40 = vld [vmem:[#allocation8 + $0x4a8] sm:$0xff]  ;;  %v1415_v55 = vld [vmem:[#allocation8 + $0x1330] sm:$0xff] }
 0x639   : > { %4725 = vmatmul.mubr.f32.vlgmr.msra.gmra.mrb[30].mxu1 %v7669_v24  ;;  %5265 = vst [vmem:[%s8164_s6 + $0x128] sm:$0xff] %v3806_v44  ;;  %v1338_v41 = vld [vmem:[#allocation8 + $0x10c8] sm:$0xff]  ;;  %v6923_v44 = vpack.c.bf16 %v2037_v36, %v1959_v35  ;;  %v1337_v50 = vld [vmem:[#allocation8 + $0x10c0] sm:$0xff]  ;;  %v1340_v4 = vld [vmem:[#allocation8 + $0x10d8] sm:$0xff] }
 0x63a   : > { %6896 = vmatpush1.bf16.msra.mxu1 %v6895_v60  ;;  %4866 = vmatprep.mubr.f32.mxu1 %v7366_v32  ;;  %v948_v60 = vld [vmem:[#allocation8 + $0x498] sm:$0xff]  ;;  %v1883_v35 = vld [vmem:[#allocation8 + $0x21d0] sm:$0xff] }
 0x63b   : > { %6898 = vmatprep.subr.bf16.mxu1 %v6897_v3  ;;  %6888 = vmatpush1.bf16.msra.mxu0 %v6887_v48  ;;  %v869_v3 = vld [vmem:[#allocation8 + $0x220] sm:$0xff]  ;;  %v6925_v10 = vpack.c.bf16 %v948_v60, %v870_v59  ;;  %v6935_v48 = vpack.c.bf16 %v1259_v38, %v1181_v33  ;;  %v1494_v59 = vld [vmem:[#allocation8 + $0x15a8] sm:$0xff]  ;;  %v1572_v60 = vld [vmem:[#allocation8 + $0x1818] sm:$0xff] }
 0x63c   : > { %6890 = vmatprep.subr.bf16.mxu0 %v6889_v54  ;;  %v6927_v18 = vpack.c.bf16 %v947_v11, %v869_v3  ;;  %v1493_v3 = vld [vmem:[#allocation8 + $0x15a0] sm:$0xff]  ;;  %v1571_v11 = vld [vmem:[#allocation8 + $0x1810] sm:$0xff]  ;;  %v1496_v36 = vld [vmem:[#allocation8 + $0x15b8] sm:$0xff] }
 0x63d   : > { %v1417_v33 = vld [vmem:[#allocation8 + $0x1340] sm:$0xff]  ;;  %v951_v5 = vld [vmem:[#allocation8 + $0x4b0] sm:$0xff]  ;;  %v1808_v13 = vld [vmem:[#allocation8 + $0x1f78] sm:$0xff] }
 0x63e   : > { %6900 = vmatpush1.bf16.msra.mxu1 %v6899_v15  ;;  %v1104_v15 = vld [vmem:[#allocation8 + $0x978] sm:$0xff] }
 0x63f   : > { %6902 = vmatprep.subr.bf16.mxu1 %v6901_v17  ;;  %v6915_v17 = vpack.c.bf16 %v1725_v8, %v1647_v7  ;;  %6892 = vmatpush1.bf16.msra.mxu0 %v6891_v1  ;;  %v6929_v22 = vpack.c.bf16 %v1104_v15, %v1026_v14  ;;  %v6939_v1 = vpack.c.bf16 %v1415_v55, %v1337_v50  ;;  %v1027_v7 = vld [vmem:[#allocation8 + $0x710] sm:$0xff]  ;;  %v1105_v8 = vld [vmem:[#allocation8 + $0x980] sm:$0xff]  ;;  %v1650_v14 = vld [vmem:[#allocation8 + $0x1a88] sm:$0xff] }
 0x640   : > { %6926 = vmatprep.subr.bf16.mxu0 %v6925_v10  ;;  %v6941_v10 = vpack.c.bf16 %v1572_v60, %v1494_v59  ;;  %v1728_v15 = vld [vmem:[#allocation8 + $0x1cf8] sm:$0xff]  ;;  %v1730_v59 = vld [vmem:[#allocation8 + $0x1d08] sm:$0xff] }
 0x641   : > { %v6945_v21 = vpack.c.bf16 %v1728_v15, %v1650_v14  ;;  %v874_v60 = vld [vmem:[#allocation8 + $0x248] sm:$0xff] }
 0x642   : > { %6904 = vmatpush1.bf16.msra.mxu1 %v6903_v26  ;;  %v2038_v26 = vld [vmem:[#allocation8 + $0x26a8] sm:$0xff]  ;;  %4796 = vmatmul.mubr.f32.vlgmr.msra.gmra.mrb[32].mxu0 %v7669_v24 }
 0x643   : > { %6906 = vmatprep.subr.bf16.mxu1 %v6905_v29  ;;  %6928 = vmatpush1.bf16.msra.mxu0 %v6927_v18  ;;  %v6921_v34 = vpack.c.bf16 %v2038_v26, %v1960_v25  ;;  %v1649_v18 = vld [vmem:[#allocation8 + $0x1a80] sm:$0xff]  ;;  %v1806_v25 = vld [vmem:[#allocation8 + $0x1f68] sm:$0xff]  ;;  %v1884_v26 = vld [vmem:[#allocation8 + $0x21d8] sm:$0xff] }
 0x644   : > { %6930 = vmatprep.subr.bf16.mxu0 %v6929_v22  ;;  %4937 = vmatprep.mubr.f32.mxu0 %v7366_v32  ;;  %v1727_v22 = vld [vmem:[#allocation8 + $0x1cf0] sm:$0xff]  ;;  %v1886_v14 = vld [vmem:[#allocation8 + $0x21e8] sm:$0xff] }
 0x645   : > { %v1030_v15 = vld [vmem:[#allocation8 + $0x728] sm:$0xff] }
 0x646   : > { %6908 = vmatpush1.bf16.msra.mxu1 %v6907_v42  ;;  %v1416_v42 = vld [vmem:[#allocation8 + $0x1338] sm:$0xff] }
 0x647   : > { %6910 = vmatprep.subr.bf16.mxu1 %v6909_v51  ;;  %6932 = vmatpush1.bf16.msra.mxu0 %v6931_v31  ;;  %v6957_v51 = vpack.c.bf16 %v950_v40, %v872_v39  ;;  %v6937_v54 = vpack.c.bf16 %v1416_v42, %v1338_v41  ;;  %v1339_v31 = vld [vmem:[#allocation8 + $0x10d0] sm:$0xff]  ;;  %v1962_v39 = vld [vmem:[#allocation8 + $0x2448] sm:$0xff]  ;;  %v2040_v40 = vld [vmem:[#allocation8 + $0x26b8] sm:$0xff] }
 0x648   : > { %6934 = vmatprep.subr.bf16.mxu0 %v6933_v37  ;;  %v1574_v37 = vld [vmem:[#allocation8 + $0x1828] sm:$0xff]  ;;  %v6953_v55 = vpack.c.bf16 %v2040_v40, %v1962_v39  ;;  %v1263_v40 = vld [vmem:[#allocation8 + $0xe70] sm:$0xff] }
 0x64a   : > { %6912 = vmatpush1.bf16.msra.mxu1 %v6911_v49  ;;  %v6959_v49 = vpack.c.bf16 %v949_v53, %v871_v52  ;;  %v6973_v52 = vpack.c.bf16 %v1574_v37, %v1496_v36  ;;  %v1495_v53 = vld [vmem:[#allocation8 + $0x15b0] sm:$0xff] }
 0x64b   : > { %6914 = vmatprep.subr.bf16.mxu1 %v6913_v6  ;;  %6936 = vmatpush1.bf16.msra.mxu0 %v6935_v48  ;;  %v6961_v6 = vpack.c.bf16 %v1106_v57, %v1028_v56  ;;  %v2039_v56 = vld [vmem:[#allocation8 + $0x26b0] sm:$0xff]  ;;  %v1652_v57 = vld [vmem:[#allocation8 + $0x1a98] sm:$0xff] }
 0x64c   : > { %v3874_v23 = vpop.f32.mrb[18].mxu1  ;;  %6938 = vmatprep.subr.bf16.mxu0 %v6937_v54  ;;  %v1573_v54 = vld [vmem:[#allocation8 + $0x1820] sm:$0xff]  ;;  %v1963_v37 = vld [vmem:[#allocation8 + $0x2450] sm:$0xff] }
 0x64d   : > { %v3875_v28 = vadd.f32 %v3874_v23, %v2224_v16  ;;  %v3876_v29 = vpop.f32.mrb[19].mxu1  ;;  %v7978_v16 = vld [vmem:[#allocation10 + $0x28] sm:$0xff] }
 0x64e   : > { %v3877_v12 = vadd.f32 %v3876_v29, %v2228_v62  ;;  %6916 = vmatpush1.bf16.msra.mxu1 %v6915_v17  ;;  %v6963_v62 = vpack.c.bf16 %v1105_v8, %v1027_v7  ;;  %v6943_v17 = vpack.c.bf16 %v1571_v11, %v1493_v3  ;;  %v1418_v23 = vld [vmem:[#allocation8 + $0x1348] sm:$0xff]  ;;  %v2232_v9 = vrot.slane %v7978_v16, %v7707_v63  ;;  %v1651_v8 = vld [vmem:[#allocation8 + $0x1a90] sm:$0xff] }
 0x64f   : > { %5266 = vst [vmem:[%s8164_s6 + $0x130] sm:$0xff] %v3875_v28  ;;  %6918 = vmatprep.subr.bf16.mxu1 %v6917_v0  ;;  %6940 = vmatpush1.bf16.msra.mxu0 %v6939_v1  ;;  %v1183_v0 = vld [vmem:[#allocation8 + $0xbf0] sm:$0xff]  ;;  %v2236_v28 = vrot.slane %v7978_v16, %v7711_v2  ;;  %v6947_v29 = vpack.c.bf16 %v1727_v22, %v1649_v18 }
 0x650   : > { %5267 = vst [vmem:[%s8164_s6 + $0x138] sm:$0xff] %v3877_v12  ;;  %6942 = vmatprep.subr.bf16.mxu0 %v6941_v10  ;;  %v6967_v27 = vpack.c.bf16 %v1261_v20, %v1183_v0  ;;  %v1805_v12 = vld [vmem:[#allocation8 + $0x1f60] sm:$0xff]  ;;  %v6975_v1 = vpack.c.bf16 %v1573_v54, %v1495_v53  ;;  %v6977_v7 = vpack.c.bf16 %v1730_v59, %v1652_v57  ;;  %v1807_v22 = vld [vmem:[#allocation8 + $0x1f70] sm:$0xff]  ;;  %v1032_v59 = vld [vmem:[#allocation8 + $0x738] sm:$0xff] }
 0x651   : > { %v6951_v50 = vpack.c.bf16 %v1883_v35, %v1805_v12  ;;  %v1729_v10 = vld [vmem:[#allocation8 + $0x1d00] sm:$0xff]  ;;  %v2244_v18 = vrot.slane %v7978_v16, %v7727_v47  ;;  %v875_v54 = vld [vmem:[#allocation8 + $0x250] sm:$0xff] }
 0x652   : > { %6920 = vmatpush1.bf16.msra.mxu1 %v6919_v30  ;;  %v6969_v30 = vpack.c.bf16 %v1418_v23, %v1340_v4  ;;  %v1029_v20 = vld [vmem:[#allocation8 + $0x720] sm:$0xff]  ;;  %v1419_v57 = vld [vmem:[#allocation8 + $0x1350] sm:$0xff] }
 0x653   : > { %6922 = vmatprep.subr.bf16.mxu1 %v6921_v34  ;;  %6944 = vmatpush1.bf16.msra.mxu0 %v6943_v17  ;;  %v6949_v34 = vpack.c.bf16 %v1884_v26, %v1806_v25  ;;  %v2240_v17 = vrot.slane %v7978_v16, %v7724_v45  ;;  %v1885_v4 = vld [vmem:[#allocation8 + $0x21e0] sm:$0xff]  ;;  %v1107_v25 = vld [vmem:[#allocation8 + $0x990] sm:$0xff] }
 0x654   : > { %6946 = vmatprep.subr.bf16.mxu0 %v6945_v21  ;;  %v6981_v21 = vpack.c.bf16 %v1886_v14, %v1808_v13  ;;  %v1185_v35 = vld [vmem:[#allocation8 + $0xc00] sm:$0xff]  ;;  %v1575_v13 = vld [vmem:[#allocation8 + $0x1830] sm:$0xff]  ;;  %v1188_v14 = vld [vmem:[#allocation8 + $0xc18] sm:$0xff] }
 0x655   : > { %v3945_v38 = vpop.f32.mrb[20].mxu0 }
 0x656   : > { %6924 = vmatpush1.bf16.msra.mxu1 %v6923_v44  ;;  %v3946_v41 = vadd.f32 %v3945_v38, %v2232_v9  ;;  %v3947_v42 = vpop.f32.mrb[21].mxu0  ;;  %v6971_v44 = vpack.c.bf16 %v1417_v33, %v1339_v31  ;;  %v1964_v9 = vld [vmem:[#allocation8 + $0x2458] sm:$0xff]  ;;  %v6983_v33 = vpack.c.bf16 %v1885_v4, %v1807_v22  ;;  %v2041_v38 = vld [vmem:[#allocation8 + $0x26c0] sm:$0xff] }
 0x657   : > { %6958 = vmatprep.subr.bf16.mxu1 %v6957_v51  ;;  %v3948_v48 = vadd.f32 %v3947_v42, %v2236_v28  ;;  %6948 = vmatpush1.bf16.msra.mxu0 %v6947_v29  ;;  %v1961_v51 = vld [vmem:[#allocation8 + $0x2440] sm:$0xff]  ;;  %v1186_v28 = vld [vmem:[#allocation8 + $0xc08] sm:$0xff]  ;;  %v1264_v29 = vld [vmem:[#allocation8 + $0xe78] sm:$0xff] }
 0x658   : > { %5268 = vst [vmem:[%s8164_s6 + $0x140] sm:$0xff] %v3946_v41  ;;  %6950 = vmatprep.subr.bf16.mxu0 %v6949_v34  ;;  %v6955_v3 = vpack.c.bf16 %v2039_v56, %v1961_v51  ;;  %v6995_v34 = vpack.c.bf16 %v1107_v25, %v1029_v20  ;;  %v6997_v39 = vpack.c.bf16 %v1264_v29, %v1186_v28  ;;  %v876_v41 = vld [vmem:[#allocation8 + $0x258] sm:$0xff]  ;;  %v954_v42 = vld [vmem:[#allocation8 + $0x4c8] sm:$0xff]  ;;  %v1265_v22 = vld [vmem:[#allocation8 + $0xe80] sm:$0xff] }
 0x659   : > { %4867 = vmatmul.mubr.f32.vlgmr.msra.gmra.mrb[32].mxu1 %v7669_v24  ;;  %5269 = vst [vmem:[%s8164_s6 + $0x148] sm:$0xff] %v3948_v48  ;;  %v1420_v48 = vld [vmem:[#allocation8 + $0x1358] sm:$0xff]  ;;  %v6999_v51 = vpack.c.bf16 %v1263_v40, %v1185_v35  ;;  %v7021_v53 = vpack.c.bf16 %v954_v42, %v876_v41  ;;  %v2248_v28 = vrot.slane %v7978_v16, %v7743_v58  ;;  %v1421_v35 = vld [vmem:[#allocation8 + $0x1360] sm:$0xff]  ;;  %v1966_v41 = vld [vmem:[#allocation8 + $0x2468] sm:$0xff] }
 0x65a   : > { %6960 = vmatpush1.bf16.msra.mxu1 %v6959_v49  ;;  %5008 = vmatprep.mubr.f32.mxu1 %v7366_v32  ;;  %v952_v49 = vld [vmem:[#allocation8 + $0x4b8] sm:$0xff] }
 0x65b   : > { %6962 = vmatprep.subr.bf16.mxu1 %v6961_v6  ;;  %6952 = vmatpush1.bf16.msra.mxu0 %v6951_v50  ;;  %v873_v6 = vld [vmem:[#allocation8 + $0x240] sm:$0xff]  ;;  %v6989_v11 = vpack.c.bf16 %v952_v49, %v874_v60  ;;  %v6987_v50 = vpack.c.bf16 %v2041_v38, %v1963_v37  ;;  %v1110_v60 = vld [vmem:[#allocation8 + $0x9a8] sm:$0xff]  ;;  %v1344_v25 = vld [vmem:[#allocation8 + $0x10f8] sm:$0xff] }
 0x65c   : > { %6954 = vmatprep.subr.bf16.mxu0 %v6953_v55  ;;  %v6991_v0 = vpack.c.bf16 %v951_v5, %v873_v6  ;;  %v953_v55 = vld [vmem:[#allocation8 + $0x4c0] sm:$0xff]  ;;  %v1498_v49 = vld [vmem:[#allocation8 + $0x15c8] sm:$0xff]  ;;  %v1887_v37 = vld [vmem:[#allocation8 + $0x21f0] sm:$0xff] }
 0x65d   : > { %v1500_v38 = vld [vmem:[#allocation8 + $0x15d8] sm:$0xff] }
 0x65e   : > { %6964 = vmatpush1.bf16.msra.mxu1 %v6963_v62  ;;  %v1108_v62 = vld [vmem:[#allocation8 + $0x998] sm:$0xff] }
 0x65f   : > { %6966 = vmatprep.subr.bf16.mxu1 %v6965_v19  ;;  %v6979_v19 = vpack.c.bf16 %v1729_v10, %v1651_v8  ;;  %6956 = vmatpush1.bf16.msra.mxu0 %v6955_v3  ;;  %v6993_v23 = vpack.c.bf16 %v1108_v62, %v1030_v15  ;;  %v7023_v3 = vpack.c.bf16 %v953_v55, %v875_v54  ;;  %v1031_v10 = vld [vmem:[#allocation8 + $0x730] sm:$0xff]  ;;  %v1266_v15 = vld [vmem:[#allocation8 + $0xe88] sm:$0xff]  ;;  %v2044_v42 = vld [vmem:[#allocation8 + $0x26d8] sm:$0xff] }
 0x660   : > { %6990 = vmatprep.subr.bf16.mxu0 %v6989_v11  ;;  %v7025_v8 = vpack.c.bf16 %v1110_v60, %v1032_v59  ;;  %v1109_v11 = vld [vmem:[#allocation8 + $0x9a0] sm:$0xff]  ;;  %v1654_v62 = vld [vmem:[#allocation8 + $0x1aa8] sm:$0xff]  ;;  %v7029_v20 = vpack.c.bf16 %v1266_v15, %v1188_v14  ;;  %v1499_v55 = vld [vmem:[#allocation8 + $0x15d0] sm:$0xff] }
 0x661   : > { %v2043_v59 = vld [vmem:[#allocation8 + $0x26d0] sm:$0xff]  ;;  %v1656_v60 = vld [vmem:[#allocation8 + $0x1ab8] sm:$0xff] }
 0x662   : > { %6968 = vmatpush1.bf16.msra.mxu1 %v6967_v27  ;;  %v2042_v27 = vld [vmem:[#allocation8 + $0x26c8] sm:$0xff]  ;;  %4938 = vmatmul.mubr.f32.vlgmr.msra.gmra.mrb[34].mxu0 %v7669_v24  ;;  %v955_v14 = vld [vmem:[#allocation8 + $0x4d0] sm:$0xff]  ;;  %v1812_v15 = vld [vmem:[#allocation8 + $0x1f98] sm:$0xff] }
 0x663   : > { %6970 = vmatprep.subr.bf16.mxu1 %v6969_v30  ;;  %6992 = vmatpush1.bf16.msra.mxu0 %v6991_v0  ;;  %v6985_v36 = vpack.c.bf16 %v2042_v27, %v1964_v9  ;;  %v1653_v0 = vld [vmem:[#allocation8 + $0x1aa0] sm:$0xff]  ;;  %v1810_v9 = vld [vmem:[#allocation8 + $0x1f88] sm:$0xff]  ;;  %v1888_v27 = vld [vmem:[#allocation8 + $0x21f8] sm:$0xff] }
 0x664   : > { %6994 = vmatprep.subr.bf16.mxu0 %v6993_v23  ;;  %5079 = vmatprep.mubr.f32.mxu0 %v7366_v32  ;;  %v1731_v23 = vld [vmem:[#allocation8 + $0x1d10] sm:$0xff] }
 0x666   : > { %6972 = vmatpush1.bf16.msra.mxu1 %v6971_v44  ;;  %v1342_v44 = vld [vmem:[#allocation8 + $0x10e8] sm:$0xff] }
 0x667   : > { %6974 = vmatprep.subr.bf16.mxu1 %v6973_v52  ;;  %6996 = vmatpush1.bf16.msra.mxu0 %v6995_v34  ;;  %v1341_v52 = vld [vmem:[#allocation8 + $0x10e0] sm:$0xff]  ;;  %v7001_v56 = vpack.c.bf16 %v1420_v48, %v1342_v44  ;;  %v1343_v34 = vld [vmem:[#allocation8 + $0x10f0] sm:$0xff] }
 0x668   : > { %6998 = vmatprep.subr.bf16.mxu0 %v6997_v39  ;;  %v7003_v6 = vpack.c.bf16 %v1419_v57, %v1341_v52  ;;  %v1578_v39 = vld [vmem:[#allocation8 + $0x1848] sm:$0xff]  ;;  %v7017_v57 = vpack.c.bf16 %v2044_v42, %v1966_v41  ;;  %v1267_v41 = vld [vmem:[#allocation8 + $0xe90] sm:$0xff] }
 0x669   : > { %v7037_v54 = vpack.c.bf16 %v1578_v39, %v1500_v38  ;;  %v2045_v38 = vld [vmem:[#allocation8 + $0x26e0] sm:$0xff]  ;;  %v1346_v42 = vld [vmem:[#allocation8 + $0x1108] sm:$0xff] }
 0x66a   : > { %6976 = vmatpush1.bf16.msra.mxu1 %v6975_v1  ;;  %v1576_v1 = vld [vmem:[#allocation8 + $0x1838] sm:$0xff] }
 0x66b   : > { %6978 = vmatprep.subr.bf16.mxu1 %v6977_v7  ;;  %7000 = vmatpush1.bf16.msra.mxu0 %v6999_v51  ;;  %v1497_v7 = vld [vmem:[#allocation8 + $0x15c0] sm:$0xff]  ;;  %v7005_v5 = vpack.c.bf16 %v1576_v1, %v1498_v49  ;;  %v1734_v49 = vld [vmem:[#allocation8 + $0x1d28] sm:$0xff] }
 0x66c   : > { %v4016_v26 = vpop.f32.mrb[20].mxu1  ;;  %7002 = vmatprep.subr.bf16.mxu0 %v7001_v56  ;;  %v1577_v56 = vld [vmem:[#allocation8 + $0x1840] sm:$0xff]  ;;  %v878_v1 = vld [vmem:[#allocation8 + $0x268] sm:$0xff] }
 0x66d   : > { %v4017_v12 = vadd.f32 %v4016_v26, %v2240_v17  ;;  %v4018_v30 = vpop.f32.mrb[21].mxu1  ;;  %v1732_v17 = vld [vmem:[#allocation8 + $0x1d18] sm:$0xff]  ;;  %v1422_v26 = vld [vmem:[#allocation8 + $0x1368] sm:$0xff] }
 0x66e   : > { %v4019_v31 = vadd.f32 %v4018_v30, %v2244_v18  ;;  %6980 = vmatpush1.bf16.msra.mxu1 %v6979_v19  ;;  %v7027_v18 = vpack.c.bf16 %v1109_v11, %v1031_v10  ;;  %v7007_v19 = vpack.c.bf16 %v1575_v13, %v1497_v7  ;;  %v7009_v4 = vpack.c.bf16 %v1732_v17, %v1654_v62  ;;  %v1655_v11 = vld [vmem:[#allocation8 + $0x1ab0] sm:$0xff]  ;;  %v1890_v62 = vld [vmem:[#allocation8 + $0x2208] sm:$0xff] }
 0x66f   : > { %5270 = vst [vmem:[%s8164_s6 + $0x150] sm:$0xff] %v4017_v12  ;;  %6982 = vmatprep.subr.bf16.mxu1 %v6981_v21  ;;  %7004 = vmatpush1.bf16.msra.mxu0 %v7003_v6  ;;  %v1187_v21 = vld [vmem:[#allocation8 + $0xc10] sm:$0xff]  ;;  %v2252_v12 = vrot.slane %v7978_v16, %v7747_v61  ;;  %v7011_v30 = vpack.c.bf16 %v1731_v23, %v1653_v0  ;;  %v1034_v17 = vld [vmem:[#allocation8 + $0x748] sm:$0xff] }
 0x670   : > { %5271 = vst [vmem:[%s8164_s6 + $0x158] sm:$0xff] %v4019_v31  ;;  %7006 = vmatprep.subr.bf16.mxu0 %v7005_v5  ;;  %v7031_v29 = vpack.c.bf16 %v1265_v22, %v1187_v21  ;;  %v1809_v31 = vld [vmem:[#allocation8 + $0x1f80] sm:$0xff]  ;;  %v7039_v6 = vpack.c.bf16 %v1577_v56, %v1499_v55  ;;  %v7041_v10 = vpack.c.bf16 %v1734_v49, %v1656_v60  ;;  %v1811_v23 = vld [vmem:[#allocation8 + $0x1f90] sm:$0xff]  ;;  %v1580_v55 = vld [vmem:[#allocation8 + $0x1858] sm:$0xff] }
 0x671   : > { %v7015_v52 = vpack.c.bf16 %v1887_v37, %v1809_v31  ;;  %v1733_v5 = vld [vmem:[#allocation8 + $0x1d20] sm:$0xff]  ;;  %v2260_v0 = vrot.slane %v7978_v16, %v7763_v46  ;;  %v1967_v37 = vld [vmem:[#allocation8 + $0x2470] sm:$0xff]  ;;  %v1658_v60 = vld [vmem:[#allocation8 + $0x1ac8] sm:$0xff] }
 0x672   : > { %6984 = vmatpush1.bf16.msra.mxu1 %v6983_v33  ;;  %v7033_v33 = vpack.c.bf16 %v1422_v26, %v1344_v25  ;;  %v1033_v22 = vld [vmem:[#allocation8 + $0x740] sm:$0xff]  ;;  %v1736_v49 = vld [vmem:[#allocation8 + $0x1d38] sm:$0xff] }
 0x673   : > { %6986 = vmatprep.subr.bf16.mxu1 %v6985_v36  ;;  %7008 = vmatpush1.bf16.msra.mxu0 %v7007_v19  ;;  %v7013_v36 = vpack.c.bf16 %v1888_v27, %v1810_v9  ;;  %v2256_v19 = vrot.slane %v7978_v16, %v7760_v43  ;;  %v1889_v25 = vld [vmem:[#allocation8 + $0x2200] sm:$0xff]  ;;  %v1111_v9 = vld [vmem:[#allocation8 + $0x9b0] sm:$0xff] }
 0x674   : > { %7010 = vmatprep.subr.bf16.mxu0 %v7009_v4  ;;  %v7045_v4 = vpack.c.bf16 %v1890_v62, %v1812_v15  ;;  %v1813_v62 = vld [vmem:[#allocation8 + $0x1fa0] sm:$0xff] }
 0x675   : > { %v4087_v40 = vpop.f32.mrb[22].mxu0 }
 0x676   : > { %6988 = vmatpush1.bf16.msra.mxu1 %v6987_v50  ;;  %v4088_v44 = vadd.f32 %v4087_v40, %v2248_v28  ;;  %v4089_v48 = vpop.f32.mrb[23].mxu0  ;;  %v7035_v50 = vpack.c.bf16 %v1421_v35, %v1343_v34  ;;  %v1968_v28 = vld [vmem:[#allocation8 + $0x2478] sm:$0xff]  ;;  %v7047_v34 = vpack.c.bf16 %v1889_v25, %v1811_v23  ;;  %v7059_v35 = vpack.c.bf16 %v1111_v9, %v1033_v22  ;;  %v1189_v40 = vld [vmem:[#allocation8 + $0xc20] sm:$0xff] }
 0x677   : > { %7022 = vmatprep.subr.bf16.mxu1 %v7021_v53  ;;  %v4090_v51 = vadd.f32 %v4089_v48, %v2252_v12  ;;  %7012 = vmatpush1.bf16.msra.mxu0 %v7011_v30  ;;  %v1965_v53 = vld [vmem:[#allocation8 + $0x2460] sm:$0xff]  ;;  %v1190_v12 = vld [vmem:[#allocation8 + $0xc28] sm:$0xff]  ;;  %v1268_v30 = vld [vmem:[#allocation8 + $0xe98] sm:$0xff]  ;;  %v7051_v48 = vpack.c.bf16 %v2045_v38, %v1967_v37 }
 0x678   : > { %5272 = vst [vmem:[%s8164_s6 + $0x160] sm:$0xff] %v4088_v44  ;;  %7014 = vmatprep.subr.bf16.mxu0 %v7013_v36  ;;  %v7019_v7 = vpack.c.bf16 %v2043_v59, %v1965_v53  ;;  %v7061_v39 = vpack.c.bf16 %v1268_v30, %v1190_v12  ;;  %v1424_v44 = vld [vmem:[#allocation8 + $0x1378] sm:$0xff]  ;;  %v1423_v53 = vld [vmem:[#allocation8 + $0x1370] sm:$0xff]  ;;  %v1501_v59 = vld [vmem:[#allocation8 + $0x15e0] sm:$0xff] }
 0x679   : > { %5009 = vmatmul.mubr.f32.vlgmr.msra.gmra.mrb[34].mxu1 %v7669_v24  ;;  %5273 = vst [vmem:[%s8164_s6 + $0x168] sm:$0xff] %v4090_v51  ;;  %v7065_v51 = vpack.c.bf16 %v1424_v44, %v1346_v42  ;;  %v1969_v25 = vld [vmem:[#allocation8 + $0x2480] sm:$0xff]  ;;  %v2056_v44 = vld [vmem:[#allocation10 + $0x38] sm:$0xff] }
 0x67a   : > { %7024 = vmatpush1.bf16.msra.mxu1 %v7023_v3  ;;  %5150 = vmatprep.mubr.f32.mxu1 %v7366_v32  ;;  %v956_v3 = vld [vmem:[#allocation8 + $0x4d8] sm:$0xff] }
 0x67b   : > { %7026 = vmatprep.subr.bf16.mxu1 %v7025_v8  ;;  %7016 = vmatpush1.bf16.msra.mxu0 %v7015_v52  ;;  %v877_v8 = vld [vmem:[#allocation8 + $0x260] sm:$0xff]  ;;  %v7053_v13 = vpack.c.bf16 %v956_v3, %v878_v1  ;;  %v2055_v3 = vld [vmem:[#allocation10 + $0x30] sm:$0xff] }
 0x67c   : > { %7018 = vmatprep.subr.bf16.mxu0 %v7017_v57  ;;  %v7055_v21 = vpack.c.bf16 %v955_v14, %v877_v8  ;;  %v1345_v52 = vld [vmem:[#allocation8 + $0x1100] sm:$0xff]  ;;  %v1735_v8 = vld [vmem:[#allocation8 + $0x1d30] sm:$0xff]  ;;  %v2292_v38 = vrot.slane %v2055_v3, %v7763_v46 }
 0x67d   : > { %v7067_v56 = vpack.c.bf16 %v1423_v53, %v1345_v52 }
 0x67e   : > { %7028 = vmatpush1.bf16.msra.mxu1 %v7027_v18  ;;  %v1112_v18 = vld [vmem:[#allocation8 + $0x9b8] sm:$0xff] }
 0x67f   : > { %7030 = vmatprep.subr.bf16.mxu1 %v7029_v20  ;;  %v7043_v20 = vpack.c.bf16 %v1733_v5, %v1655_v11  ;;  %7020 = vmatpush1.bf16.msra.mxu0 %v7019_v7  ;;  %v7057_v26 = vpack.c.bf16 %v1112_v18, %v1034_v17  ;;  %v1657_v7 = vld [vmem:[#allocation8 + $0x1ac0] sm:$0xff]  ;;  %v1892_v11 = vld [vmem:[#allocation8 + $0x2218] sm:$0xff]  ;;  %v2264_v5 = vrot.slane %v2055_v3, %v7707_v63  ;;  %v1891_v17 = vld [vmem:[#allocation8 + $0x2210] sm:$0xff] }
 0x680   : > { %7054 = vmatprep.subr.bf16.mxu0 %v7053_v13  ;;  %v2268_v13 = vrot.slane %v2055_v3, %v7711_v2  ;;  %v7075_v14 = vpack.c.bf16 %v1735_v8, %v1657_v7 }
 0x682   : > { %7032 = vmatpush1.bf16.msra.mxu1 %v7031_v29  ;;  %v2046_v29 = vld [vmem:[#allocation8 + $0x26e8] sm:$0xff]  ;;  %5080 = vmatmul.mubr.f32.vlgmr.msra.gmra.mrb[36].mxu0 %v7669_v24 }
 0x683   : > { %7034 = vmatprep.subr.bf16.mxu1 %v7033_v33  ;;  %7056 = vmatpush1.bf16.msra.mxu0 %v7055_v21  ;;  %v7049_v36 = vpack.c.bf16 %v2046_v29, %v1968_v28  ;;  %v2276_v28 = vrot.slane %v2055_v3, %v7727_v47 }
 0x684   : > { %7058 = vmatprep.subr.bf16.mxu0 %v7057_v26  ;;  %5221 = vmatprep.mubr.f32.mxu0 %v7366_v32  ;;  %v1579_v32 = vld [vmem:[#allocation8 + $0x1850] sm:$0xff] }
 0x685   : > { %v7071_v1 = vpack.c.bf16 %v1579_v32, %v1501_v59  ;;  %v2047_v26 = vld [vmem:[#allocation8 + $0x26f0] sm:$0xff] }
 0x686   : > { %7036 = vmatpush1.bf16.msra.mxu1 %v7035_v50  ;;  %v7063_v50 = vpack.c.bf16 %v1267_v41, %v1189_v40  ;;  %v7083_v9 = vpack.c.bf16 %v2047_v26, %v1969_v25 }
 0x687   : > { %7038 = vmatprep.subr.bf16.mxu1 %v7037_v54  ;;  %7060 = vmatpush1.bf16.msra.mxu0 %v7059_v35  ;;  %v1502_v54 = vld [vmem:[#allocation8 + $0x15e8] sm:$0xff] }
 0x688   : > { %7062 = vmatprep.subr.bf16.mxu0 %v7061_v39  ;;  %v7069_v57 = vpack.c.bf16 %v1580_v55, %v1502_v54  ;;  %v2304_v55 = vrot.slane %v2056_v44, %v7724_v45 }
 0x68a   : > { %7040 = vmatpush1.bf16.msra.mxu1 %v7039_v6  ;;  %v7073_v6 = vpack.c.bf16 %v1736_v49, %v1658_v60  ;;  %v2312_v49 = vrot.slane %v2056_v44, %v7743_v58 }
 0x68b   : > { %7042 = vmatprep.subr.bf16.mxu1 %v7041_v10  ;;  %7064 = vmatpush1.bf16.msra.mxu0 %v7063_v50  ;;  %v1814_v10 = vld [vmem:[#allocation8 + $0x1fa8] sm:$0xff]  ;;  %v2300_v50 = vrot.slane %v2056_v44, %v7711_v2 }
 0x68c   : > { %v4158_v27 = vpop.f32.mrb[22].mxu1  ;;  %7066 = vmatprep.subr.bf16.mxu0 %v7065_v51  ;;  %v7077_v15 = vpack.c.bf16 %v1892_v11, %v1814_v10  ;;  %v2320_v10 = vrot.slane %v2056_v44, %v7760_v43  ;;  %v2324_v11 = vrot.slane %v2056_v44, %v7763_v46 }
 0x68d   : > { %v4159_v31 = vadd.f32 %v4158_v27, %v2256_v19  ;;  %v4160_v33 = vpop.f32.mrb[23].mxu1  ;;  %v1970_v19 = vld [vmem:[#allocation8 + $0x2488] sm:$0xff]  ;;  %v2272_v27 = vrot.slane %v2055_v3, %v7724_v45 }
 0x68e   : > { %v4161_v16 = vadd.f32 %v4160_v33, %v2260_v0  ;;  %7044 = vmatpush1.bf16.msra.mxu1 %v7043_v20  ;;  %v2048_v0 = vld [vmem:[#allocation8 + $0x26f8] sm:$0xff]  ;;  %v2280_v33 = vrot.slane %v2055_v3, %v7743_v58 }
 0x68f   : > { %5274 = vst [vmem:[%s8164_s6 + $0x170] sm:$0xff] %v4159_v31  ;;  %7046 = vmatprep.subr.bf16.mxu1 %v7045_v4  ;;  %7068 = vmatpush1.bf16.msra.mxu0 %v7067_v56  ;;  %v7079_v4 = vpack.c.bf16 %v1891_v17, %v1813_v62  ;;  %v7081_v23 = vpack.c.bf16 %v2048_v0, %v1970_v19  ;;  %v2057_v62 = vld [vmem:[#allocation10 + $0x40] sm:$0xff] }
 0x690   : > { %5275 = vst [vmem:[%s8164_s6 + $0x178] sm:$0xff] %v4161_v16  ;;  %7070 = vmatprep.subr.bf16.mxu0 %v7069_v57  ;;  %v2284_v16 = vrot.slane %v2055_v3, %v7747_v61  ;;  %v2308_v56 = vrot.slane %v2056_v44, %v7727_v47  ;;  %v2328_v17 = vrot.slane %v2057_v62, %v7707_v63 }
 0x692   : > { %7048 = vmatpush1.bf16.msra.mxu1 %v7047_v34 }
 0x693   : > { %7050 = vmatprep.subr.bf16.mxu1 %v7049_v36  ;;  %7072 = vmatpush1.bf16.msra.mxu0 %v7071_v1  ;;  %v2316_v1 = vrot.slane %v2056_v44, %v7747_v61 }
 0x694   : > { %7074 = vmatprep.subr.bf16.mxu0 %v7073_v6 }
 0x695   : > { %v4229_v18 = vpop.f32.mrb[24].mxu0 }
 0x696   : > { %7052 = vmatpush1.bf16.msra.mxu1 %v7051_v48  ;;  %v4230_v20 = vadd.f32 %v4229_v18, %v2264_v5  ;;  %v4231_v21 = vpop.f32.mrb[25].mxu0  ;;  %v2296_v48 = vrot.slane %v2056_v44, %v7707_v63  ;;  %v2332_v18 = vrot.slane %v2057_v62, %v7711_v2 }
 0x697   : > { %v4232_v22 = vadd.f32 %v4231_v21, %v2268_v13  ;;  %7076 = vmatpush1.bf16.msra.mxu0 %v7075_v14 }
 0x698   : > { %5276 = vst [vmem:[%s8164_s6 + $0x180] sm:$0xff] %v4230_v20  ;;  %7078 = vmatprep.subr.bf16.mxu0 %v7077_v15 }
 0x699   : > { %5151 = vmatmul.mubr.f32.vlgmr.msra.gmra.mrb[36].mxu1 %v7669_v24  ;;  %5277 = vst [vmem:[%s8164_s6 + $0x188] sm:$0xff] %v4232_v22  ;;  %v2336_v22 = vrot.slane %v2057_v62, %v7724_v45 }
 0x69b   : > { %7080 = vmatpush1.bf16.msra.mxu0 %v7079_v4  ;;  %v2340_v4 = vrot.slane %v2057_v62, %v7727_v47 }
 0x69c   : > { %7082 = vmatprep.subr.bf16.mxu0 %v7081_v23 }
 0x69f   : > { %7084 = vmatpush1.bf16.msra.mxu0 %v7083_v9 }
 0x6a2   : > { %5222 = vmatmul.mubr.f32.vlgmr.msra.gmra.mrb[38].mxu0 %v7669_v24  ;;  %v2288_v24 = vrot.slane %v2055_v3, %v7760_v43 }
 0x6ac   : > { %v4300_v29 = vpop.f32.mrb[24].mxu1 }
 0x6ad   : > { %v4301_v12 = vadd.f32 %v4300_v29, %v2272_v27  ;;  %v4302_v30 = vpop.f32.mrb[25].mxu1  ;;  %v2344_v27 = vrot.slane %v2057_v62, %v7743_v58 }
 0x6ae   : > { %v4303_v31 = vadd.f32 %v4302_v30, %v2276_v28  ;;  %v2348_v28 = vrot.slane %v2057_v62, %v7747_v61 }
 0x6af   : > { %5278 = vst [vmem:[%s8164_s6 + $0x190] sm:$0xff] %v4301_v12 }
 0x6b0   : > { %5279 = vst [vmem:[%s8164_s6 + $0x198] sm:$0xff] %v4303_v31 }
 0x6b5   : > { %v4371_v34 = vpop.f32.mrb[26].mxu0 }
 0x6b6   : > { %v4372_v35 = vadd.f32 %v4371_v34, %v2280_v33  ;;  %v4373_v36 = vpop.f32.mrb[27].mxu0  ;;  %v2352_v33 = vrot.slane %v2057_v62, %v7760_v43 }
 0x6b7   : > { %v4374_v37 = vadd.f32 %v4373_v36, %v2284_v16  ;;  %v2356_v16 = vrot.slane %v2057_v62, %v7763_v46 }
 0x6b8   : > { %5280 = vst [vmem:[%s8164_s6 + $0x1a0] sm:$0xff] %v4372_v35 }
 0x6b9   : > { %5281 = vst [vmem:[%s8164_s6 + $0x1a8] sm:$0xff] %v4374_v37 }
 0x6cc   : > { %v4442_v39 = vpop.f32.mrb[26].mxu1 }
 0x6cd   : > { %v4443_v40 = vadd.f32 %v4442_v39, %v2288_v24  ;;  %v4444_v41 = vpop.f32.mrb[27].mxu1  ;;  %v2058_v24 = vld [vmem:[#allocation10 + $0x48] sm:$0x3f] }
 0x6ce   : > { %v4445_v42 = vadd.f32 %v4444_v41, %v2292_v38  ;;  %v2360_v38 = vrot.slane %v2058_v24, %v7707_v63  ;;  %v2364_v39 = vrot.slane %v2058_v24, %v7711_v2  ;;  %v2372_v44 = vrot.slane %v2058_v24, %v7727_v47 }
 0x6cf   : > { %5282 = vst [vmem:[%s8164_s6 + $0x1b0] sm:$0xff] %v4443_v40 }
 0x6d0   : > { %5283 = vst [vmem:[%s8164_s6 + $0x1b8] sm:$0xff] %v4445_v42  ;;  %v2368_v42 = vrot.slane %v2058_v24, %v7724_v45 }
 0x6d5   : > { %v4513_v51 = vpop.f32.mrb[28].mxu0 }
 0x6d6   : > { %v4514_v52 = vadd.f32 %v4513_v51, %v2296_v48  ;;  %v4515_v53 = vpop.f32.mrb[29].mxu0  ;;  %v2376_v51 = vrot.slane %v2058_v24, %v7743_v58 }
 0x6d7   : > { %v4516_v54 = vadd.f32 %v4515_v53, %v2300_v50 }
 0x6d8   : > { %5284 = vst [vmem:[%s8164_s6 + $0x1c0] sm:$0xff] %v4514_v52  ;;  %v2380_v52 = vrot.slane %v2058_v24, %v7747_v61 }
 0x6d9   : > { %5285 = vst [vmem:[%s8164_s6 + $0x1c8] sm:$0xff] %v4516_v54 }
 0x6ec   : > { %v4584_v57 = vpop.f32.mrb[28].mxu1 }
 0x6ed   : > { %v4585_v59 = vadd.f32 %v4584_v57, %v2304_v55  ;;  %v4586_v32 = vpop.f32.mrb[29].mxu1 }
 0x6ee   : > { %v4587_v60 = vadd.f32 %v4586_v32, %v2308_v56 }
 0x6ef   : > { %5286 = vst [vmem:[%s8164_s6 + $0x1d0] sm:$0xff] %v4585_v59 }
 0x6f0   : > { %5287 = vst [vmem:[%s8164_s6 + $0x1d8] sm:$0xff] %v4587_v60 }
 0x6f5   : > { %v4655_v3 = vpop.f32.mrb[30].mxu0 }
 0x6f6   : > { %v4656_v6 = vadd.f32 %v4655_v3, %v2312_v49  ;;  %v4657_v7 = vpop.f32.mrb[31].mxu0 }
 0x6f7   : > { %v4658_v8 = vadd.f32 %v4657_v7, %v2316_v1 }
 0x6f8   : > { %5288 = vst [vmem:[%s8164_s6 + $0x1e0] sm:$0xff] %v4656_v6 }
 0x6f9   : > { %5289 = vst [vmem:[%s8164_s6 + $0x1e8] sm:$0xff] %v4658_v8 }
 0x70c   : > { %v4726_v5 = vpop.f32.mrb[30].mxu1 }
 0x70d   : > { %v4727_v13 = vadd.f32 %v4726_v5, %v2320_v10  ;;  %v4728_v14 = vpop.f32.mrb[31].mxu1 }
 0x70e   : > { %v4729_v15 = vadd.f32 %v4728_v14, %v2324_v11 }
 0x70f   : > { %5290 = vst [vmem:[%s8164_s6 + $0x1f0] sm:$0xff] %v4727_v13 }
 0x710   : > { %5291 = vst [vmem:[%s8164_s6 + $0x1f8] sm:$0xff] %v4729_v15 }
 0x715   : > { %v4797_v19 = vpop.f32.mrb[32].mxu0 }
 0x716   : > { %v4798_v0 = vadd.f32 %v4797_v19, %v2328_v17  ;;  %v4799_v20 = vpop.f32.mrb[33].mxu0 }
 0x717   : > { %v4800_v21 = vadd.f32 %v4799_v20, %v2332_v18 }
 0x718   : > { %5292 = vst [vmem:[%s8164_s6 + $0x200] sm:$0xff] %v4798_v0 }
 0x719   : > { %5293 = vst [vmem:[%s8164_s6 + $0x208] sm:$0xff] %v4800_v21 }
 0x72c   : > { %v4868_v23 = vpop.f32.mrb[32].mxu1 }
 0x72d   : > { %v4869_v25 = vadd.f32 %v4868_v23, %v2336_v22  ;;  %v4870_v26 = vpop.f32.mrb[33].mxu1 }
 0x72e   : > { %v4871_v9 = vadd.f32 %v4870_v26, %v2340_v4 }
 0x72f   : > { %5294 = vst [vmem:[%s8164_s6 + $0x210] sm:$0xff] %v4869_v25 }
 0x730   : > { %5295 = vst [vmem:[%s8164_s6 + $0x218] sm:$0xff] %v4871_v9 }
 0x735   : > { %v4939_v29 = vpop.f32.mrb[34].mxu0 }
 0x736   : > { %v4940_v12 = vadd.f32 %v4939_v29, %v2344_v27  ;;  %v4941_v30 = vpop.f32.mrb[35].mxu0 }
 0x737   : > { %v4942_v31 = vadd.f32 %v4941_v30, %v2348_v28 }
 0x738   : > { %5296 = vst [vmem:[%s8164_s6 + $0x220] sm:$0xff] %v4940_v12 }
 0x739   : > { %5297 = vst [vmem:[%s8164_s6 + $0x228] sm:$0xff] %v4942_v31 }
 0x74c   : > { %v5010_v34 = vpop.f32.mrb[34].mxu1 }
 0x74d   : > { %v5011_v35 = vadd.f32 %v5010_v34, %v2352_v33  ;;  %v5012_v36 = vpop.f32.mrb[35].mxu1 }
 0x74e   : > { %v5013_v37 = vadd.f32 %v5012_v36, %v2356_v16 }
 0x74f   : > { %5298 = vst [vmem:[%s8164_s6 + $0x230] sm:$0xff] %v5011_v35 }
 0x750   : > { %5299 = vst [vmem:[%s8164_s6 + $0x238] sm:$0xff] %v5013_v37 }
 0x755   : > { %v5081_v43 = vpop.f32.mrb[36].mxu0 }
 0x756   : > { %v5082_v40 = vadd.f32 %v5081_v43, %v2360_v38  ;;  %v5083_v46 = vpop.f32.mrb[37].mxu0 }
 0x757   : > { %v5084_v41 = vadd.f32 %v5083_v46, %v2364_v39 }
 0x758   : > { %5300 = vst [vmem:[%s8164_s6 + $0x240] sm:$0xff] %v5082_v40 }
 0x759   : > { %5301 = vst [vmem:[%s8164_s6 + $0x248] sm:$0xff] %v5084_v41 }
 0x76c   : > { %v5152_v48 = vpop.f32.mrb[36].mxu1 }
 0x76d   : > { %v5153_v63 = vadd.f32 %v5152_v48, %v2368_v42  ;;  %v5154_v50 = vpop.f32.mrb[37].mxu1 }
 0x76e   : > { %v5155_v2 = vadd.f32 %v5154_v50, %v2372_v44 }
 0x76f   : > { %5302 = vst [vmem:[%s8164_s6 + $0x250] sm:$0xff] %v5153_v63 }
 0x770   : > { %5303 = vst [vmem:[%s8164_s6 + $0x258] sm:$0xff] %v5155_v2 }
 0x775   : > { %v5223_v53 = vpop.f32.mrb[38].mxu0 }
 0x776   : > { %v5224_v45 = vadd.f32 %v5223_v53, %v2376_v51  ;;  %v5225_v54 = vpop.f32.mrb[39].mxu0 }
 0x777   : > { %v5226_v47 = vadd.f32 %v5225_v54, %v2380_v52 }
 0x778   : > { %5304 = vst [vmem:[%s8164_s6 + $0x260] sm:$0xff] %v5224_v45 }
 0x779   : > { %5305 = vst [vmem:[%s8164_s6 + $0x268] sm:$0xff] %v5226_v47 }
 0x77a PF: > { %s19_s23 = sadd.s32 1, %s7351_s23   ;;  %s8174_s21 = smov %s7347_s22 }
 0x77b   : > { %p16_p13 = scmp.ge.s32.totalorder %s19_s23, 4   ;;  %s8175_s22 = smov %s8177_s19 }
 0x77d   :  { %18 = sbr.rel (!%p16_p13) target bundleno = 4 (0x4), region = 103 }
 0x784   :  { %5327 = vsyncpa [#allocation4], 1 }
 0x785   :  { %5329 = vsyncpa [#allocation4 + $0x1], 1 }
 0x786   :  { %5330 = vsyncpa [#allocation6], 1 }
 0x787   :  { %5331 = vsyncpa [#allocation9], 1 }

</bundles_post_ra>
